<compile_context>
chip_gen: v6e
topology: v6e:2x2x1
jax: 0.10.0
libtpu: 0.0.40
codegen_flags: <defaults>
</compile_context>

<pallas_src>
import functools

import jax
import jax.numpy as jnp
from jax.experimental import pallas as pl
from jax.experimental.pallas import tpu as pltpu

LN_EPS = 1e-5  # PyTorch nn.LayerNorm default


def _round_up(n, m):
    return ((n + m - 1) // m) * m


def _actor_kernel(x_ref, w1_ref, p1_ref, w2_ref, b2_ref, w3_ref, b3_ref,
                  out_ref, *, action_dim, logvar_min, logvar_max):
    mm_dtype = w1_ref.dtype

    # ---- Linear 1 (MXU; x cast in-kernel — VPU cast is free under MXU slack) ----
    h = jnp.dot(x_ref[...].astype(mm_dtype), w1_ref[...],
                preferred_element_type=jnp.float32)

    p1 = p1_ref[...]                       # (3, H1) f32: [bias; gamma; beta]
    b1 = p1[0:1, :]
    g1 = p1[1:2, :]
    bt1 = p1[2:3, :]
    h = h + b1

    # ---- LayerNorm (f32; eps matches nn.LayerNorm) + ReLU ----
    mu_ln = jnp.mean(h, axis=-1, keepdims=True)
    d = h - mu_ln
    var_ln = jnp.mean(d * d, axis=-1, keepdims=True)
    inv = jax.lax.rsqrt(var_ln + LN_EPS)     # (tb, 1)
    h = d * inv * g1 + bt1
    h = jnp.maximum(h, 0.0)

    # ---- Linear 2 + ReLU (the Actor has no LayerNorm before the head) ----
    h = jnp.dot(h.astype(mm_dtype), w2_ref[...],
                preferred_element_type=jnp.float32) + b2_ref[...]
    h = jnp.maximum(h, 0.0)

    # ---- Head: Linear to (mu | logvar) ----
    y = jnp.dot(h.astype(mm_dtype), w3_ref[...],
                preferred_element_type=jnp.float32) + b3_ref[...]   # (tb, 2A)

    # tanh/exp (EUP) on every column, then select the logvar half with an iota
    # mask: avoids any sublane slicing/concat (works for any action_dim) and
    # keeps a single merged output.  tanh bounds the value so exp never
    # overflows on the discarded mu columns.
    lv = jnp.tanh(y)
    lv = logvar_min + 0.5 * (logvar_max - logvar_min) * (lv + 1.0)
    lv = jnp.exp(lv)
    col = jax.lax.broadcasted_iota(jnp.int32, y.shape, 1)
    out = jnp.where(col >= action_dim, lv, y)                       # (tb, 2A)

    out_ref[...] = out.astype(out_ref.dtype)


def prepare_actor_params(params, matmul_dtype=jnp.bfloat16):
    """One-time parameter prep (do this OUTSIDE the per-call hot path).

    Casts the matmul weights to `matmul_dtype` (bf16 default: native MXU rate
    on v5e/v6e/v7x) and packs layer-1 bias / LN gamma / LN beta into a single
    (3, H1) f32 array.  Head/bias/LN params stay f32.
    """
    (w1, b1, g1, bt1, w2, b2, w3, b3) = params
    p1 = jnp.concatenate([b1, g1, bt1], axis=0).astype(jnp.float32)   # (3, H1)
    return (w1.astype(matmul_dtype), p1,
            w2.astype(matmul_dtype), b2.astype(jnp.float32),
            w3.astype(matmul_dtype), b3.astype(jnp.float32))


def actor_forward(x, prepared, *, logvar_min, logvar_max, batch_tile=None):
    """x: (B, obs_dim) f32.  prepared: output of prepare_actor_params.

    Returns (mu, var), each (B, action_dim) f32.
    """
    (w1, p1, w2, b2, w3, b3) = prepared
    B, D_in = x.shape
    H1 = w1.shape[1]
    H2 = w2.shape[1]
    two_a = w3.shape[1]
    A = two_a // 2

    if batch_tile is None:
        # Single grid step for small batches: at these layer sizes each step is
        # only a few hundred compute cycles vs ~600 cycles of per-step pipeline
        # overhead, so fewer/fatter steps win.  VMEM is not the constraint here
        # (weights ~300 KiB, intermediates a few MiB at tb=2048).
        # On v7x (2 TCs) pass batch_tile=_round_up(B // 2, 128) for exactly one
        # step per core.
        tb = min(_round_up(max(B, 1), 128), 2048)
    else:
        tb = int(batch_tile)
    assert tb % 128 == 0 and 0 < tb <= 8192, \
        "batch_tile must be a multiple of 128 and <= 8192"

    # Pad the batch to a whole number of tiles (zero rows are harmless).
    B_pad = _round_up(B, tb)
    if B_pad != B:
        x = jnp.pad(x, ((0, B_pad - B), (0, 0)))
    grid = (B_pad // tb,)

    full = lambda shape: pl.BlockSpec(shape, lambda i: (0, 0))

    flops = 2 * B_pad * (D_in * H1 + H1 * H2 + H2 * two_a)
    transcendentals = B_pad * (2 * two_a + 1)       # tanh + exp (all cols) + rsqrt
    bytes_accessed = (
        int(x.size) * x.dtype.itemsize
        + sum(int(a.size) * a.dtype.itemsize for a in (w1, p1, w2, b2, w3, b3))
        + B_pad * two_a * 4)

    kernel = functools.partial(_actor_kernel, action_dim=A,
                               logvar_min=float(logvar_min),
                               logvar_max=float(logvar_max))

    y = pl.pallas_call(
        kernel,
        out_shape=jax.ShapeDtypeStruct((B_pad, two_a), jnp.float32),
        grid_spec=pltpu.PrefetchScalarGridSpec(
            num_scalar_prefetch=0,
            grid=grid,
            in_specs=[
                pl.BlockSpec((tb, D_in), lambda i: (i, 0)),   # x (streamed, f32)
                full((D_in, H1)),                             # w1 (resident)
                full((3, H1)),                                # [b1; gamma1; beta1]
                full((H1, H2)), full((1, H2)),                # w2, b2
                full((H2, two_a)), full((1, two_a)),          # w3, b3
            ],
            out_specs=pl.BlockSpec((tb, two_a), lambda i: (i, 0)),   # [mu | var]
        ),
        compiler_params=pltpu.CompilerParams(
            dimension_semantics=("parallel",)),
        cost_estimate=pl.CostEstimate(flops=flops,
                                      transcendentals=transcendentals,
                                      bytes_accessed=bytes_accessed),
    )(x, w1, p1, w2, b2, w3, b3)

    mu = y[:B, :A]
    var = y[:B, A:]
    return mu, var


def init_actor_params(key, obs_dim, action_dim, hidden_dims):
    """Deterministic synthetic parameters (weights stored as (in, out))."""
    h1, h2 = hidden_dims
    keys = jax.random.split(key, 3)

    def lin(k, fan_in, fan_out):
        kw, kb = jax.random.split(k)
        bound = 1.0 / (fan_in ** 0.5)
        w = jax.random.uniform(kw, (fan_in, fan_out), jnp.float32, -bound, bound)
        b = jax.random.uniform(kb, (1, fan_out), jnp.float32, -bound, bound)
        return w, b

    w1, b1 = lin(keys[0], obs_dim, h1)
    w2, b2 = lin(keys[1], h1, h2)
    w3, b3 = lin(keys[2], h2, 2 * action_dim)
    g1 = jnp.ones((1, h1), jnp.float32)     # LayerNorm gamma
    bt1 = jnp.zeros((1, h1), jnp.float32)   # LayerNorm beta
    return (w1, b1, g1, bt1, w2, b2, w3, b3)


def actor_reference(x, params, logvar_min, logvar_max):
    """Pure-JAX reference matching the PyTorch Actor forward exactly."""
    (w1, b1, g1, bt1, w2, b2, w3, b3) = params
    hi = jax.lax.Precision.HIGHEST
    h = jnp.dot(x, w1, precision=hi) + b1
    mu_ln = jnp.mean(h, axis=-1, keepdims=True)
    var_ln = jnp.mean((h - mu_ln) ** 2, axis=-1, keepdims=True)
    h = (h - mu_ln) * jax.lax.rsqrt(var_ln + LN_EPS) * g1 + bt1
    h = jnp.maximum(h, 0.0)
    h = jnp.maximum(jnp.dot(h, w2, precision=hi) + b2, 0.0)
    y = jnp.dot(h, w3, precision=hi) + b3
    mu, logvar = jnp.split(y, 2, axis=-1)
    logvar = jnp.tanh(logvar)
    logvar = logvar_min + 0.5 * (logvar_max - logvar_min) * (logvar + 1.0)
    return mu, jnp.exp(logvar)


if __name__ == "__main__":
    obs_dim, action_dim = 32, 8
    hidden_dims = (256, 256)
    logvar_min, logvar_max = -10.0, 2.0
    batch = 500   # not a multiple of 128 -> exercises padding; tb=512, grid=(1,)

    key = jax.random.PRNGKey(0)
    k_params, k_obs = jax.random.split(key)
    params = init_actor_params(k_params, obs_dim, action_dim, hidden_dims)
    x = jax.random.normal(k_obs, (batch, obs_dim), jnp.float32)

    mu_ref, var_ref = actor_reference(x, params, logvar_min, logvar_max)

    # f32 matmul path (tight check)
    prepared_f32 = prepare_actor_params(params, matmul_dtype=jnp.float32)
    mu, var = actor_forward(x, prepared_f32,
                            logvar_min=logvar_min, logvar_max=logvar_max)
    (mu, var) = jax.block_until_ready((mu, var))
    assert mu.shape == (batch, action_dim) and var.shape == (batch, action_dim)
    assert jnp.allclose(mu, mu_ref, atol=2e-3, rtol=2e-3)
    assert jnp.allclose(var, var_ref, atol=2e-3, rtol=2e-3)

    # bf16 matmul path (default; native MXU rate on v5e/v6e/v7x) —
    # looser tolerance, log-space compare for var.
    prepared_bf16 = prepare_actor_params(params)          # bf16 default
    mu_bf, var_bf = actor_forward(x, prepared_bf16,
                                  logvar_min=logvar_min, logvar_max=logvar_max)
    (mu_bf, var_bf) = jax.block_until_ready((mu_bf, var_bf))
    assert jnp.allclose(mu_bf, mu_ref, atol=5e-2, rtol=5e-2)
    assert jnp.allclose(jnp.log(var_bf), jnp.log(var_ref), atol=8e-2, rtol=8e-2)

    print("KERNEL_OK")
</pallas_src>

<mosaic_0001>
module attributes {stable_mosaic.version = 11 : i64} {
  func.func @_actor_kernel(%arg0: i32, %arg1: memref<512x32xf32, #tpu.memory_space<vmem>>, %arg2: memref<32x256xf32, #tpu.memory_space<vmem>>, %arg3: memref<3x256xf32, #tpu.memory_space<vmem>>, %arg4: memref<256x256xf32, #tpu.memory_space<vmem>>, %arg5: memref<1x256xf32, #tpu.memory_space<vmem>>, %arg6: memref<256x16xf32, #tpu.memory_space<vmem>>, %arg7: memref<1x16xf32, #tpu.memory_space<vmem>>, %arg8: memref<512x16xf32, #tpu.memory_space<vmem>>) attributes {dimension_semantics = [#tpu.dimension_semantics<parallel>], iteration_bounds = array<i64: 1>, scalar_prefetch = 0 : i64, scratch_operands = 0 : i64, tpu.core_type = #tpu.core_type<tc>, window_params = [{transform_indices = @transform_0, window_bounds = array<i64: 512, 32>}, {pipeline_mode = #tpu.pipeline_mode<synchronous>, transform_indices = @transform_1, window_bounds = array<i64: 32, 256>}, {pipeline_mode = #tpu.pipeline_mode<synchronous>, transform_indices = @transform_2, window_bounds = array<i64: 3, 256>}, {pipeline_mode = #tpu.pipeline_mode<synchronous>, transform_indices = @transform_3, window_bounds = array<i64: 256, 256>}, {pipeline_mode = #tpu.pipeline_mode<synchronous>, transform_indices = @transform_4, window_bounds = array<i64: 1, 256>}, {pipeline_mode = #tpu.pipeline_mode<synchronous>, transform_indices = @transform_5, window_bounds = array<i64: 256, 16>}, {pipeline_mode = #tpu.pipeline_mode<synchronous>, transform_indices = @transform_6, window_bounds = array<i64: 1, 16>}, {transform_indices = @transform_7, window_bounds = array<i64: 512, 16>}]} {
    %c0 = arith.constant 0 : index
    %c0_0 = arith.constant 0 : index
    %0 = vector.load %arg1[%c0, %c0_0] : memref<512x32xf32, #tpu.memory_space<vmem>>, vector<512x32xf32>
    %c0_1 = arith.constant 0 : index
    %c0_2 = arith.constant 0 : index
    %1 = vector.load %arg2[%c0_1, %c0_2] : memref<32x256xf32, #tpu.memory_space<vmem>>, vector<32x256xf32>
    %cst = arith.constant dense<0.000000e+00> : vector<512x256xf32>
    %2 = tpu.matmul %0, %1, %cst {dimension_numbers = #tpu.dot_dimension_numbers<[1], [0], [0], [1], [0, 0, 1, 1], [], []>} : vector<512x32xf32>, vector<32x256xf32>, vector<512x256xf32> -> vector<512x256xf32>
    %c0_3 = arith.constant 0 : index
    %c0_4 = arith.constant 0 : index
    %3 = vector.load %arg3[%c0_3, %c0_4] : memref<3x256xf32, #tpu.memory_space<vmem>>, vector<3x256xf32>
    %4 = vector.extract_strided_slice %3 {offsets = [0, 0], sizes = [1, 256], strides = [1, 1]} : vector<3x256xf32> to vector<1x256xf32>
    %5 = vector.extract_strided_slice %3 {offsets = [1, 0], sizes = [1, 256], strides = [1, 1]} : vector<3x256xf32> to vector<1x256xf32>
    %6 = vector.extract_strided_slice %3 {offsets = [2, 0], sizes = [1, 256], strides = [1, 1]} : vector<3x256xf32> to vector<1x256xf32>
    %7 = vector.broadcast %4 : vector<1x256xf32> to vector<512x256xf32>
    %8 = arith.addf %2, %7 : vector<512x256xf32>
    %cst_5 = arith.constant dense<0.000000e+00> : vector<512xf32>
    %9 = vector.multi_reduction <add>, %8, %cst_5 [1] : vector<512x256xf32> to vector<512xf32>
    %10 = vector.shape_cast %9 : vector<512xf32> to vector<512x1xf32>
    %cst_6 = arith.constant 2.560000e+02 : f32
    %11 = vector.broadcast %cst_6 : f32 to vector<512x1xf32>
    %12 = arith.divf %10, %11 : vector<512x1xf32>
    %13 = vector.broadcast %12 : vector<512x1xf32> to vector<512x256xf32>
    %14 = arith.subf %8, %13 : vector<512x256xf32>
    %15 = arith.mulf %14, %14 : vector<512x256xf32>
    %cst_7 = arith.constant dense<0.000000e+00> : vector<512xf32>
    %16 = vector.multi_reduction <add>, %15, %cst_7 [1] : vector<512x256xf32> to vector<512xf32>
    %17 = vector.shape_cast %16 : vector<512xf32> to vector<512x1xf32>
    %cst_8 = arith.constant 2.560000e+02 : f32
    %18 = vector.broadcast %cst_8 : f32 to vector<512x1xf32>
    %19 = arith.divf %17, %18 : vector<512x1xf32>
    %cst_9 = arith.constant 9.99999974E-6 : f32
    %20 = vector.broadcast %cst_9 : f32 to vector<512x1xf32>
    %21 = arith.addf %19, %20 : vector<512x1xf32>
    %22 = math.rsqrt %21 : vector<512x1xf32>
    %23 = vector.broadcast %22 : vector<512x1xf32> to vector<512x256xf32>
    %24 = arith.mulf %14, %23 : vector<512x256xf32>
    %25 = vector.broadcast %5 : vector<1x256xf32> to vector<512x256xf32>
    %26 = arith.mulf %24, %25 : vector<512x256xf32>
    %27 = vector.broadcast %6 : vector<1x256xf32> to vector<512x256xf32>
    %28 = arith.addf %26, %27 : vector<512x256xf32>
    %cst_10 = arith.constant 0.000000e+00 : f32
    %29 = vector.broadcast %cst_10 : f32 to vector<512x256xf32>
    %30 = arith.maximumf %28, %29 : vector<512x256xf32>
    %c0_11 = arith.constant 0 : index
    %c0_12 = arith.constant 0 : index
    %31 = vector.load %arg4[%c0_11, %c0_12] : memref<256x256xf32, #tpu.memory_space<vmem>>, vector<256x256xf32>
    %cst_13 = arith.constant dense<0.000000e+00> : vector<512x256xf32>
    %32 = tpu.matmul %30, %31, %cst_13 {dimension_numbers = #tpu.dot_dimension_numbers<[1], [0], [0], [1], [0, 0, 1, 1], [], []>} : vector<512x256xf32>, vector<256x256xf32>, vector<512x256xf32> -> vector<512x256xf32>
    %c0_14 = arith.constant 0 : index
    %c0_15 = arith.constant 0 : index
    %33 = vector.load %arg5[%c0_14, %c0_15] : memref<1x256xf32, #tpu.memory_space<vmem>>, vector<1x256xf32>
    %34 = vector.broadcast %33 : vector<1x256xf32> to vector<512x256xf32>
    %35 = arith.addf %32, %34 : vector<512x256xf32>
    %cst_16 = arith.constant 0.000000e+00 : f32
    %36 = vector.broadcast %cst_16 : f32 to vector<512x256xf32>
    %37 = arith.maximumf %35, %36 : vector<512x256xf32>
    %c0_17 = arith.constant 0 : index
    %c0_18 = arith.constant 0 : index
    %38 = vector.load %arg6[%c0_17, %c0_18] : memref<256x16xf32, #tpu.memory_space<vmem>>, vector<256x16xf32>
    %cst_19 = arith.constant dense<0.000000e+00> : vector<512x16xf32>
    %39 = tpu.matmul %37, %38, %cst_19 {dimension_numbers = #tpu.dot_dimension_numbers<[1], [0], [0], [1], [0, 0, 1, 1], [], []>} : vector<512x256xf32>, vector<256x16xf32>, vector<512x16xf32> -> vector<512x16xf32>
    %c0_20 = arith.constant 0 : index
    %c0_21 = arith.constant 0 : index
    %40 = vector.load %arg7[%c0_20, %c0_21] : memref<1x16xf32, #tpu.memory_space<vmem>>, vector<1x16xf32>
    %41 = vector.broadcast %40 : vector<1x16xf32> to vector<512x16xf32>
    %42 = arith.addf %39, %41 : vector<512x16xf32>
    %43 = math.tanh %42 : vector<512x16xf32>
    %cst_22 = arith.constant 1.000000e+00 : f32
    %44 = vector.broadcast %cst_22 : f32 to vector<512x16xf32>
    %45 = arith.addf %43, %44 : vector<512x16xf32>
    %cst_23 = arith.constant 6.000000e+00 : f32
    %46 = vector.broadcast %cst_23 : f32 to vector<512x16xf32>
    %47 = arith.mulf %46, %45 : vector<512x16xf32>
    %cst_24 = arith.constant -1.000000e+01 : f32
    %48 = vector.broadcast %cst_24 : f32 to vector<512x16xf32>
    %49 = arith.addf %48, %47 : vector<512x16xf32>
    %50 = math.exp %49 : vector<512x16xf32>
    %51 = tpu.iota {dimensions = array<i32: 1>} : vector<512x16xi32>
    %c8_i32 = arith.constant 8 : i32
    %52 = vector.broadcast %c8_i32 : i32 to vector<512x16xi32>
    %53 = arith.cmpi sge, %51, %52 : vector<512x16xi32>
    %54 = arith.select %53, %50, %42 : vector<512x16xi1>, vector<512x16xf32>
    %c0_25 = arith.constant 0 : index
    %c0_26 = arith.constant 0 : index
    %55 = vector.load %arg8[%c0_25, %c0_26] : memref<512x16xf32, #tpu.memory_space<vmem>>, vector<512x16xf32>
    tpu.vector_store %arg8[%c0_25, %c0_26], %54 {strides = array<i32>} : memref<512x16xf32, #tpu.memory_space<vmem>>, vector<512x16xf32>,
    return
  }
  func.func @transform_0(%arg0: i32) -> (i32, i32) {
    %c0_i32 = arith.constant 0 : i32
    %c0_i32_0 = arith.constant 0 : i32
    return %arg0, %c0_i32 : i32, i32
  }
  func.func @transform_1(%arg0: i32) -> (i32, i32) {
    %c0_i32 = arith.constant 0 : i32
    %c0_i32_0 = arith.constant 0 : i32
    %c0_i32_1 = arith.constant 0 : i32
    return %c0_i32, %c0_i32_0 : i32, i32
  }
  func.func @transform_2(%arg0: i32) -> (i32, i32) {
    %c0_i32 = arith.constant 0 : i32
    %c0_i32_0 = arith.constant 0 : i32
    %c0_i32_1 = arith.constant 0 : i32
    return %c0_i32, %c0_i32_0 : i32, i32
  }
  func.func @transform_3(%arg0: i32) -> (i32, i32) {
    %c0_i32 = arith.constant 0 : i32
    %c0_i32_0 = arith.constant 0 : i32
    %c0_i32_1 = arith.constant 0 : i32
    return %c0_i32, %c0_i32_0 : i32, i32
  }
  func.func @transform_4(%arg0: i32) -> (i32, i32) {
    %c0_i32 = arith.constant 0 : i32
    %c0_i32_0 = arith.constant 0 : i32
    %c0_i32_1 = arith.constant 0 : i32
    return %c0_i32, %c0_i32_0 : i32, i32
  }
  func.func @transform_5(%arg0: i32) -> (i32, i32) {
    %c0_i32 = arith.constant 0 : i32
    %c0_i32_0 = arith.constant 0 : i32
    %c0_i32_1 = arith.constant 0 : i32
    return %c0_i32, %c0_i32_0 : i32, i32
  }
  func.func @transform_6(%arg0: i32) -> (i32, i32) {
    %c0_i32 = arith.constant 0 : i32
    %c0_i32_0 = arith.constant 0 : i32
    %c0_i32_1 = arith.constant 0 : i32
    return %c0_i32, %c0_i32_0 : i32, i32
  }
  func.func @transform_7(%arg0: i32) -> (i32, i32) {
    %c0_i32 = arith.constant 0 : i32
    %c0_i32_0 = arith.constant 0 : i32
    return %arg0, %c0_i32 : i32, i32
  }
}

</mosaic_0001>

<bundles_post_ra>
// kernel: tpu_custom_call.1
= control target key start
LH: loop header
LB: loop body
LE: loop exit
PB: predicated region body
PF: predicated region fallthrough
CT: control target
= control target key end

     0   :  { %v7597_v3 = vmov 0.0   ;;  %vm118_vm0 = vcmask 261120   ;;  %vm3733_vm2 = vcmask 130048   ;;  %s7588_s1 = inlined_call_operand.vmem [shape: f32[32,256], index: 1, kind: input, shape index: {}]   ;;  %s7589_s0 = inlined_call_operand.vmem [shape: f32[512,32], index: 0, kind: input, shape index: {}]   ;;  %s7590_s2 = inlined_call_operand.vmem [shape: f32[3,256], index: 2, kind: input, shape index: {}]   ;;  %s7591_s3 = inlined_call_operand.vmem [shape: f32[256,256], index: 3, kind: input, shape index: {}]   ;;  %s7592_s5 = inlined_call_operand.vmem [shape: f32[256,16], index: 5, kind: input, shape index: {}]   ;;  %s7593_s4 = inlined_call_operand.vmem [shape: f32[1,256], index: 4, kind: input, shape index: {}]   ;;  %s7594_s6 = inlined_call_operand.vmem [shape: f32[1,16], index: 6, kind: input, shape index: {}]   ;;  %s7595_s7 = inlined_call_operand.vmem [shape: f32[512,16], index: 7, kind: output, shape index: {}]  }
   0x1   :  { %v97_v0 = vld [vmem:[%s7588_s1 + $0x38] sm:$0xff]  ;;  %v96_v1 = vld [vmem:[%s7588_s1 + $0x30] sm:$0xff]  ;;  %v95_v2 = vld [vmem:[%s7588_s1 + $0x28] sm:$0xff]  ;;  %375 = vmatprep.mubr.f32.mxu0 %v7597_v3  ;;  %567 = vmatprep.mubr.f32.mxu1 %v7597_v3 }
   0x2   :  { %335 = vmatprep.subr.mxu0 %v97_v0  ;;  %v94_v4 = vld [vmem:[%s7588_s1 + $0x20] sm:$0xff]  ;;  %3867 = vmatprep.subr.mxu1 %v97_v0  ;;  %v93_v5 = vld [vmem:[%s7588_s1 + $0x18] sm:$0xff]  ;;  %v92_v6 = vld [vmem:[%s7588_s1 + $0x10] sm:$0xff] }
   0x3   :  { %336 = vmatpush1.msra.mxu0 %v96_v1  ;;  %3871 = vmatpush1.msra.mxu1 %v96_v1  ;;  %v91_v7 = vld [vmem:[%s7588_s1 + $0x8] sm:$0xff]  ;;  %v90_v8 = vld [vmem:[%s7588_s1] sm:$0xff]  ;;  %v28_v12 = vld [vmem:[%s7589_s0 + $0x10] sm:$0xff] }
   0x4   :  { %337 = vmatprep.subr.mxu0 %v95_v2  ;;  %3868 = vmatprep.subr.mxu1 %v95_v2  ;;  %v26_v9 = vld [vmem:[%s7589_s0] sm:$0xff]  ;;  %v27_v10 = vld [vmem:[%s7589_s0 + $0x8] sm:$0xff]  ;;  %v29_v14 = vld [vmem:[%s7589_s0 + $0x18] sm:$0xff] }
   0x5   :  { %338 = vmatpush1.msra.mxu0 %v94_v4  ;;  %3872 = vmatpush1.msra.mxu1 %v94_v4  ;;  %v58_v11 = vld [vmem:[%s7589_s0 + $0x100] sm:$0xff]  ;;  %v59_v13 = vld [vmem:[%s7589_s0 + $0x108] sm:$0xff]  ;;  %v60_v15 = vld [vmem:[%s7589_s0 + $0x110] sm:$0xff] }
   0x6   :  { %339 = vmatprep.subr.mxu0 %v93_v5  ;;  %3869 = vmatprep.subr.mxu1 %v93_v5  ;;  %v30_v16 = vld [vmem:[%s7589_s0 + $0x20] sm:$0xff]  ;;  %v61_v17 = vld [vmem:[%s7589_s0 + $0x118] sm:$0xff]  ;;  %v31_v18 = vld [vmem:[%s7589_s0 + $0x28] sm:$0xff] }
   0x7   :  { %340 = vmatpush1.msra.mxu0 %v92_v6  ;;  %3873 = vmatpush1.msra.mxu1 %v92_v6  ;;  %v62_v19 = vld [vmem:[%s7589_s0 + $0x120] sm:$0xff]  ;;  %v32_v20 = vld [vmem:[%s7589_s0 + $0x30] sm:$0xff]  ;;  %v63_v21 = vld [vmem:[%s7589_s0 + $0x128] sm:$0xff] }
   0x8   :  { %341 = vmatprep.subr.mxu0 %v91_v7  ;;  %3870 = vmatprep.subr.mxu1 %v91_v7  ;;  %v33_v22 = vld [vmem:[%s7589_s0 + $0x38] sm:$0xff]  ;;  %v64_v23 = vld [vmem:[%s7589_s0 + $0x130] sm:$0xff]  ;;  %v34_v24 = vld [vmem:[%s7589_s0 + $0x40] sm:$0xff] }
   0x9   :  { %342 = vmatpush1.msra.mxu0 %v90_v8  ;;  %3874 = vmatpush1.msra.mxu1 %v90_v8  ;;  %v65_v25 = vld [vmem:[%s7589_s0 + $0x138] sm:$0xff]  ;;  %v35_v26 = vld [vmem:[%s7589_s0 + $0x48] sm:$0xff]  ;;  %v66_v27 = vld [vmem:[%s7589_s0 + $0x140] sm:$0xff] }
   0xa   :  { %3802 = vmatmul.mubr.msk.f32.vlgmr.msra.gmra.mxu0 %vm118_vm0, %v26_v9  ;;  %2897 = vmatprep.subr.mxu0 %v7597_v3  ;;  %v36_v28 = vld [vmem:[%s7589_s0 + $0x50] sm:$0xff]  ;;  %v67_v29 = vld [vmem:[%s7589_s0 + $0x148] sm:$0xff]  ;;  %v37_v30 = vld [vmem:[%s7589_s0 + $0x58] sm:$0xff] }
   0xb   :  { %381 = vmatprep.mubr.f32.mxu0 %v7597_v3  ;;  %3834 = vmatmul.mubr.msk.f32.vlgmr.msra.gmra.mxu1 %vm118_vm0, %v58_v11  ;;  %v68_v31 = vld [vmem:[%s7589_s0 + $0x150] sm:$0xff]  ;;  %v38_v32 = vld [vmem:[%s7589_s0 + $0x60] sm:$0xff]  ;;  %v69_v33 = vld [vmem:[%s7589_s0 + $0x158] sm:$0xff] }
   0xc   :  { %573 = vmatprep.mubr.f32.mxu1 %v7597_v3  ;;  %v39_v34 = vld [vmem:[%s7589_s0 + $0x68] sm:$0xff]  ;;  %v70_v35 = vld [vmem:[%s7589_s0 + $0x160] sm:$0xff]  ;;  %v40_v36 = vld [vmem:[%s7589_s0 + $0x70] sm:$0xff] }
   0xd   :  { %v71_v37 = vld [vmem:[%s7589_s0 + $0x168] sm:$0xff]  ;;  %v41_v38 = vld [vmem:[%s7589_s0 + $0x78] sm:$0xff]  ;;  %v72_v39 = vld [vmem:[%s7589_s0 + $0x170] sm:$0xff] }
   0xe   :  { %3803 = vmatmul.mubr.msk.f32.gmra.mxu0 %vm118_vm0, %v27_v10  ;;  %v42_v40 = vld [vmem:[%s7589_s0 + $0x80] sm:$0xff]  ;;  %v73_v41 = vld [vmem:[%s7589_s0 + $0x178] sm:$0xff]  ;;  %v43_v42 = vld [vmem:[%s7589_s0 + $0x88] sm:$0xff]  ;;  %v7596_v10 = vlaneseq }
   0xf   :  { %387 = vmatprep.mubr.f32.mxu0 %v7597_v3  ;;  %3835 = vmatmul.mubr.msk.f32.gmra.mxu1 %vm118_vm0, %v59_v13  ;;  %v74_v43 = vld [vmem:[%s7589_s0 + $0x180] sm:$0xff]  ;;  %v44_v44 = vld [vmem:[%s7589_s0 + $0x90] sm:$0xff]  ;;  %v75_v45 = vld [vmem:[%s7589_s0 + $0x188] sm:$0xff] }
  0x10   :  { %579 = vmatprep.mubr.f32.mxu1 %v7597_v3  ;;  %v45_v46 = vld [vmem:[%s7589_s0 + $0x98] sm:$0xff]  ;;  %v76_v47 = vld [vmem:[%s7589_s0 + $0x190] sm:$0xff]  ;;  %v46_v48 = vld [vmem:[%s7589_s0 + $0xa0] sm:$0xff]  ;;  %v4649_v11 = vshrl.u32 %v7596_v10, 7 }
  0x11   :  { %v77_v49 = vld [vmem:[%s7589_s0 + $0x198] sm:$0xff]  ;;  %v47_v50 = vld [vmem:[%s7589_s0 + $0xa8] sm:$0xff]  ;;  %v78_v51 = vld [vmem:[%s7589_s0 + $0x1a0] sm:$0xff] }
  0x12   :  { %3804 = vmatmul.mubr.msk.f32.gmra.mxu0 %vm118_vm0, %v28_v12  ;;  %v48_v52 = vld [vmem:[%s7589_s0 + $0xb0] sm:$0xff]  ;;  %v79_v53 = vld [vmem:[%s7589_s0 + $0x1a8] sm:$0xff]  ;;  %v49_v54 = vld [vmem:[%s7589_s0 + $0xb8] sm:$0xff]  ;;  %7757 = vst [vmem:[#allocation2_spill] sm:$0xff] %v4649_v11  ;;  %v4652_v12 = vsub.s32 0, %v4649_v11  ;;  %v106_v13 = vsub.s32 4, %v4649_v11 }
  0x13   :  { %393 = vmatprep.mubr.f32.mxu0 %v7597_v3  ;;  %3836 = vmatmul.mubr.msk.f32.gmra.mxu1 %vm118_vm0, %v60_v15  ;;  %v80_v55 = vld [vmem:[%s7589_s0 + $0x1b0] sm:$0xff]  ;;  %v50_v56 = vld [vmem:[%s7589_s0 + $0xc0] sm:$0xff]  ;;  %v81_v57 = vld [vmem:[%s7589_s0 + $0x1b8] sm:$0xff] }
  0x14   :  { %585 = vmatprep.mubr.f32.mxu1 %v7597_v3  ;;  %v51_v58 = vld [vmem:[%s7589_s0 + $0xc8] sm:$0xff]  ;;  %v82_v59 = vld [vmem:[%s7589_s0 + $0x1c0] sm:$0xff]  ;;  %v52_v60 = vld [vmem:[%s7589_s0 + $0xd0] sm:$0xff]  ;;  %7758 = vst [vmem:[#allocation3_spill] sm:$0xff] %v4652_v12 }
  0x15   :  { %v83_v61 = vld [vmem:[%s7589_s0 + $0x1c8] sm:$0xff]  ;;  %v53_v62 = vld [vmem:[%s7589_s0 + $0xd8] sm:$0xff]  ;;  %v84_v63 = vld [vmem:[%s7589_s0 + $0x1d0] sm:$0xff] }
  0x16   :  { %3805 = vmatmul.mubr.msk.f32.gmra.mxu0 %vm118_vm0, %v29_v14  ;;  %v54_v0 = vld [vmem:[%s7589_s0 + $0xe0] sm:$0xff]  ;;  %v85_v1 = vld [vmem:[%s7589_s0 + $0x1d8] sm:$0xff]  ;;  %v55_v2 = vld [vmem:[%s7589_s0 + $0xe8] sm:$0xff] }
  0x17   :  { %399 = vmatprep.mubr.f32.mxu0 %v7597_v3  ;;  %3837 = vmatmul.mubr.msk.f32.gmra.mxu1 %vm118_vm0, %v61_v17  ;;  %v86_v4 = vld [vmem:[%s7589_s0 + $0x1e0] sm:$0xff]  ;;  %v56_v5 = vld [vmem:[%s7589_s0 + $0xf0] sm:$0xff]  ;;  %v87_v6 = vld [vmem:[%s7589_s0 + $0x1e8] sm:$0xff] }
  0x18   :  { %591 = vmatprep.mubr.f32.mxu1 %v7597_v3  ;;  %v57_v7 = vld [vmem:[%s7589_s0 + $0xf8] sm:$0xff]  ;;  %v88_v8 = vld [vmem:[%s7589_s0 + $0x1f0] sm:$0xff]  ;;  %v98_v14 = vld [vmem:[%s7590_s2] sm:$0x77] }
  0x19   :  { %v89_v9 = vld [vmem:[%s7589_s0 + $0x1f8] sm:$0xff]  ;;  %v103_v15 = vrot.slane %v98_v14, %v4652_v12  ;;  %v2233_v10 = vld [vmem:[%s7591_s3 + $0xe0] sm:$0xff] }
  0x1a   :  { %3806 = vmatmul.mubr.msk.f32.gmra.mxu0 %vm118_vm0, %v30_v16  ;;  %v107_v16 = vrot.slane %v98_v14, %v106_v13 }
  0x1b   :  { %405 = vmatprep.mubr.f32.mxu0 %v7597_v3  ;;  %3838 = vmatmul.mubr.msk.f32.gmra.mxu1 %vm118_vm0, %v62_v19  ;;  %v4660_v17 = vrot.slane %v103_v15, %v4652_v12 }
  0x1c   :  { %597 = vmatprep.mubr.f32.mxu1 %v7597_v3 }
  0x1e   :  { %3807 = vmatmul.mubr.msk.f32.gmra.mxu0 %vm118_vm0, %v31_v18  ;;  %v4663_v18 = vrot.slane %v107_v16, %v4652_v12  ;;  %v2232_v12 = vld [vmem:[%s7591_s3 + $0xd8] sm:$0xff] }
  0x1f   :  { %411 = vmatprep.mubr.f32.mxu0 %v7597_v3  ;;  %3839 = vmatmul.mubr.msk.f32.gmra.mxu1 %vm118_vm0, %v63_v21 }
  0x20   :  { %603 = vmatprep.mubr.f32.mxu1 %v7597_v3 }
  0x22   :  { %3808 = vmatmul.mubr.msk.f32.gmra.mxu0 %vm118_vm0, %v32_v20 }
  0x23   :  { %417 = vmatprep.mubr.f32.mxu0 %v7597_v3  ;;  %3840 = vmatmul.mubr.msk.f32.gmra.mxu1 %vm118_vm0, %v64_v23 }
  0x24   :  { %609 = vmatprep.mubr.f32.mxu1 %v7597_v3 }
  0x26   :  { %3809 = vmatmul.mubr.msk.f32.gmra.mxu0 %vm118_vm0, %v33_v22 }
  0x27   :  { %423 = vmatprep.mubr.f32.mxu0 %v7597_v3  ;;  %3841 = vmatmul.mubr.msk.f32.gmra.mxu1 %vm118_vm0, %v65_v25 }
  0x28   :  { %615 = vmatprep.mubr.f32.mxu1 %v7597_v3 }
  0x2a   :  { %3810 = vmatmul.mubr.msk.f32.gmra.mxu0 %vm118_vm0, %v34_v24 }
  0x2b   :  { %429 = vmatprep.mubr.f32.mxu0 %v7597_v3  ;;  %3842 = vmatmul.mubr.msk.f32.gmra.mxu1 %vm118_vm0, %v66_v27 }
  0x2c   :  { %621 = vmatprep.mubr.f32.mxu1 %v7597_v3 }
  0x2e   :  { %3811 = vmatmul.mubr.msk.f32.gmra.mxu0 %vm118_vm0, %v35_v26 }
  0x2f   :  { %435 = vmatprep.mubr.f32.mxu0 %v7597_v3  ;;  %3843 = vmatmul.mubr.msk.f32.gmra.mxu1 %vm118_vm0, %v67_v29 }
  0x30   :  { %627 = vmatprep.mubr.f32.mxu1 %v7597_v3 }
  0x32   :  { %3812 = vmatmul.mubr.msk.f32.gmra.mxu0 %vm118_vm0, %v36_v28 }
  0x33   :  { %441 = vmatprep.mubr.f32.mxu0 %v7597_v3  ;;  %3844 = vmatmul.mubr.msk.f32.gmra.mxu1 %vm118_vm0, %v68_v31 }
  0x34   :  { %633 = vmatprep.mubr.f32.mxu1 %v7597_v3 }
  0x36   :  { %3813 = vmatmul.mubr.msk.f32.gmra.mxu0 %vm118_vm0, %v37_v30 }
  0x37   :  { %447 = vmatprep.mubr.f32.mxu0 %v7597_v3  ;;  %3845 = vmatmul.mubr.msk.f32.gmra.mxu1 %vm118_vm0, %v69_v33 }
  0x38   :  { %639 = vmatprep.mubr.f32.mxu1 %v7597_v3 }
  0x3a   :  { %3814 = vmatmul.mubr.msk.f32.gmra.mxu0 %vm118_vm0, %v38_v32 }
  0x3b   :  { %453 = vmatprep.mubr.f32.mxu0 %v7597_v3  ;;  %3846 = vmatmul.mubr.msk.f32.gmra.mxu1 %vm118_vm0, %v70_v35 }
  0x3c   :  { %645 = vmatprep.mubr.f32.mxu1 %v7597_v3 }
  0x3e   :  { %3815 = vmatmul.mubr.msk.f32.gmra.mxu0 %vm118_vm0, %v39_v34 }
  0x3f   :  { %459 = vmatprep.mubr.f32.mxu0 %v7597_v3  ;;  %3847 = vmatmul.mubr.msk.f32.gmra.mxu1 %vm118_vm0, %v71_v37 }
  0x40   :  { %651 = vmatprep.mubr.f32.mxu1 %v7597_v3 }
  0x42   :  { %3816 = vmatmul.mubr.msk.f32.gmra.mxu0 %vm118_vm0, %v40_v36 }
  0x43   :  { %465 = vmatprep.mubr.f32.mxu0 %v7597_v3  ;;  %3848 = vmatmul.mubr.msk.f32.gmra.mxu1 %vm118_vm0, %v72_v39 }
  0x44   :  { %657 = vmatprep.mubr.f32.mxu1 %v7597_v3 }
  0x46   :  { %3817 = vmatmul.mubr.msk.f32.gmra.mxu0 %vm118_vm0, %v41_v38 }
  0x47   :  { %471 = vmatprep.mubr.f32.mxu0 %v7597_v3  ;;  %3849 = vmatmul.mubr.msk.f32.gmra.mxu1 %vm118_vm0, %v73_v41 }
  0x48   :  { %663 = vmatprep.mubr.f32.mxu1 %v7597_v3 }
  0x4a   :  { %3818 = vmatmul.mubr.msk.f32.gmra.mxu0 %vm118_vm0, %v42_v40 }
  0x4b   :  { %477 = vmatprep.mubr.f32.mxu0 %v7597_v3  ;;  %3850 = vmatmul.mubr.msk.f32.gmra.mxu1 %vm118_vm0, %v74_v43 }
  0x4c   :  { %669 = vmatprep.mubr.f32.mxu1 %v7597_v3 }
  0x4e   :  { %3819 = vmatmul.mubr.msk.f32.gmra.mxu0 %vm118_vm0, %v43_v42 }
  0x4f   :  { %483 = vmatprep.mubr.f32.mxu0 %v7597_v3  ;;  %3851 = vmatmul.mubr.msk.f32.gmra.mxu1 %vm118_vm0, %v75_v45 }
  0x50   :  { %675 = vmatprep.mubr.f32.mxu1 %v7597_v3 }
  0x52   :  { %3820 = vmatmul.mubr.msk.f32.gmra.mxu0 %vm118_vm0, %v44_v44 }
  0x53   :  { %489 = vmatprep.mubr.f32.mxu0 %v7597_v3  ;;  %3852 = vmatmul.mubr.msk.f32.gmra.mxu1 %vm118_vm0, %v76_v47 }
  0x54   :  { %681 = vmatprep.mubr.f32.mxu1 %v7597_v3 }
  0x56   :  { %3821 = vmatmul.mubr.msk.f32.gmra.mxu0 %vm118_vm0, %v45_v46 }
  0x57   :  { %495 = vmatprep.mubr.f32.mxu0 %v7597_v3  ;;  %3853 = vmatmul.mubr.msk.f32.gmra.mxu1 %vm118_vm0, %v77_v49 }
  0x58   :  { %687 = vmatprep.mubr.f32.mxu1 %v7597_v3 }
  0x5a   :  { %3822 = vmatmul.mubr.msk.f32.gmra.mxu0 %vm118_vm0, %v46_v48 }
  0x5b   :  { %501 = vmatprep.mubr.f32.mxu0 %v7597_v3  ;;  %3854 = vmatmul.mubr.msk.f32.gmra.mxu1 %vm118_vm0, %v78_v51 }
  0x5c   :  { %693 = vmatprep.mubr.f32.mxu1 %v7597_v3 }
  0x5e   :  { %3823 = vmatmul.mubr.msk.f32.gmra.mxu0 %vm118_vm0, %v47_v50 }
  0x5f   :  { %507 = vmatprep.mubr.f32.mxu0 %v7597_v3  ;;  %3855 = vmatmul.mubr.msk.f32.gmra.mxu1 %vm118_vm0, %v79_v53 }
  0x60   :  { %699 = vmatprep.mubr.f32.mxu1 %v7597_v3 }
  0x62   :  { %3824 = vmatmul.mubr.msk.f32.gmra.mxu0 %vm118_vm0, %v48_v52 }
  0x63   :  { %513 = vmatprep.mubr.f32.mxu0 %v7597_v3  ;;  %3856 = vmatmul.mubr.msk.f32.gmra.mxu1 %vm118_vm0, %v80_v55 }
  0x64   :  { %705 = vmatprep.mubr.f32.mxu1 %v7597_v3 }
  0x66   :  { %3825 = vmatmul.mubr.msk.f32.gmra.mxu0 %vm118_vm0, %v49_v54 }
  0x67   :  { %519 = vmatprep.mubr.f32.mxu0 %v7597_v3  ;;  %3857 = vmatmul.mubr.msk.f32.gmra.mxu1 %vm118_vm0, %v81_v57 }
  0x68   :  { %711 = vmatprep.mubr.f32.mxu1 %v7597_v3 }
  0x6a   :  { %3826 = vmatmul.mubr.msk.f32.gmra.mxu0 %vm118_vm0, %v50_v56 }
  0x6b   :  { %525 = vmatprep.mubr.f32.mxu0 %v7597_v3  ;;  %3858 = vmatmul.mubr.msk.f32.gmra.mxu1 %vm118_vm0, %v82_v59 }
  0x6c   :  { %717 = vmatprep.mubr.f32.mxu1 %v7597_v3 }
  0x6e   :  { %3827 = vmatmul.mubr.msk.f32.gmra.mxu0 %vm118_vm0, %v51_v58 }
  0x6f   :  { %531 = vmatprep.mubr.f32.mxu0 %v7597_v3  ;;  %3859 = vmatmul.mubr.msk.f32.gmra.mxu1 %vm118_vm0, %v83_v61 }
  0x70   :  { %723 = vmatprep.mubr.f32.mxu1 %v7597_v3 }
  0x72   :  { %3828 = vmatmul.mubr.msk.f32.gmra.mxu0 %vm118_vm0, %v52_v60 }
  0x73   :  { %537 = vmatprep.mubr.f32.mxu0 %v7597_v3  ;;  %3860 = vmatmul.mubr.msk.f32.gmra.mxu1 %vm118_vm0, %v84_v63 }
  0x74   :  { %729 = vmatprep.mubr.f32.mxu1 %v7597_v3 }
  0x76   :  { %3829 = vmatmul.mubr.msk.f32.gmra.mxu0 %vm118_vm0, %v53_v62 }
  0x77   :  { %543 = vmatprep.mubr.f32.mxu0 %v7597_v3  ;;  %3861 = vmatmul.mubr.msk.f32.gmra.mxu1 %vm118_vm0, %v85_v1 }
  0x78   :  { %735 = vmatprep.mubr.f32.mxu1 %v7597_v3 }
  0x7a   :  { %3830 = vmatmul.mubr.msk.f32.gmra.mxu0 %vm118_vm0, %v54_v0 }
  0x7b   :  { %549 = vmatprep.mubr.f32.mxu0 %v7597_v3  ;;  %3862 = vmatmul.mubr.msk.f32.gmra.mxu1 %vm118_vm0, %v86_v4 }
  0x7c   :  { %741 = vmatprep.mubr.f32.mxu1 %v7597_v3 }
  0x7e   :  { %3831 = vmatmul.mubr.msk.f32.gmra.mxu0 %vm118_vm0, %v55_v2 }
  0x7f   :  { %555 = vmatprep.mubr.f32.mxu0 %v7597_v3  ;;  %3863 = vmatmul.mubr.msk.f32.gmra.mxu1 %vm118_vm0, %v87_v6 }
  0x80   :  { %747 = vmatprep.mubr.f32.mxu1 %v7597_v3 }
  0x82   :  { %3832 = vmatmul.mubr.msk.f32.gmra.mxu0 %vm118_vm0, %v56_v5 }
  0x83   :  { %561 = vmatprep.mubr.f32.mxu0 %v7597_v3  ;;  %3864 = vmatmul.mubr.msk.f32.gmra.mxu1 %vm118_vm0, %v88_v8 }
  0x84   :  { %753 = vmatprep.mubr.f32.mxu1 %v7597_v3 }
  0x86   :  { %3833 = vmatmul.mubr.msk.f32.gmra.mxu0 %vm118_vm0, %v57_v7 }
  0x87   :  { %3865 = vmatmul.mubr.msk.f32.gmra.mxu1 %vm118_vm0, %v89_v9 }
  0xca   :  { %v377_v19 = vpop.f32.mrf.mxu0 }
  0xcb   :  { %v4666_v21 = vadd.f32 %v377_v19, %v4660_v17  ;;  %v4673_v25 = vpop.f32.mrf.mxu1 }
  0xcc   :  { %v379_v20 = vpop.f32.mrf.mxu0 }
  0xcd   :  { %v4669_v22 = vadd.f32 %v379_v20, %v4663_v18  ;;  %v4681_v29 = vpop.f32.mrf.mxu1 }
  0xce   :  { %v383_v23 = vpop.f32.mrf.mxu0 }
  0xcf   :  { %v760_v24 = vadd.f32 %v4669_v22, %v4666_v21  ;;  %v4676_v27 = vadd.f32 %v383_v23, %v4660_v17  ;;  %v4685_v32 = vpop.f32.mrf.mxu1 }
  0xd0   :  { %v385_v26 = vpop.f32.mrf.mxu0 }
  0xd1   :  { %v4679_v28 = vadd.f32 %v385_v26, %v4663_v18  ;;  %761 = vadd.xlane.f32.xlu0 %v760_v24  ;;  %v4693_v36 = vpop.f32.mrf.mxu1 }
  0xd2   :  { %v389_v30 = vpop.f32.mrf.mxu0 }
  0xd3   :  { %v763_v31 = vadd.f32 %v4679_v28, %v4676_v27  ;;  %v4688_v34 = vadd.f32 %v389_v30, %v4660_v17  ;;  %v4697_v40 = vpop.f32.mrf.mxu1 }
  0xd4   :  { %v391_v33 = vpop.f32.mrf.mxu0 }
  0xd5   :  { %v4691_v35 = vadd.f32 %v391_v33, %v4663_v18  ;;  %764 = vadd.xlane.f32.xlu0 %v763_v31  ;;  %v4707_v46 = vpop.f32.mrf.mxu1 }
  0xd6   :  { %v395_v37 = vpop.f32.mrf.mxu0 }
  0xd7   :  { %v766_v38 = vadd.f32 %v4691_v35, %v4688_v34  ;;  %v4700_v41 = vadd.f32 %v395_v37, %v4660_v17  ;;  %v4717_v52 = vpop.f32.mrf.mxu1 }
  0xd8   :  { %v397_v39 = vpop.f32.mrf.mxu0 }
  0xd9   :  { %v4703_v42 = vadd.f32 %v397_v39, %v4663_v18  ;;  %767 = vadd.xlane.f32.xlu1 %v766_v38  ;;  %v4727_v58 = vpop.f32.mrf.mxu1 }
  0xda   :  { %v401_v43 = vpop.f32.mrf.mxu0 }
  0xdb   :  { %v769_v44 = vadd.f32 %v4703_v42, %v4700_v41  ;;  %v4710_v47 = vadd.f32 %v401_v43, %v4660_v17  ;;  %v4737_v0 = vpop.f32.mrf.mxu1 }
  0xdc   :  { %v403_v45 = vpop.f32.mrf.mxu0 }
  0xdd   :  { %v4713_v48 = vadd.f32 %v403_v45, %v4663_v18  ;;  %770 = vadd.xlane.f32.xlu1 %v769_v44  ;;  %v4747_v7 = vpop.f32.mrf.mxu1 }
  0xde   :  { %v407_v49 = vpop.f32.mrf.mxu0 }
  0xdf   :  { %v772_v50 = vadd.f32 %v4713_v48, %v4710_v47  ;;  %v4720_v53 = vadd.f32 %v407_v49, %v4660_v17  ;;  %v4757_v16 = vpop.f32.mrf.mxu1 }
  0xe0   :  { %v409_v51 = vpop.f32.mrf.mxu0 }
  0xe1   :  { %v4723_v54 = vadd.f32 %v409_v51, %v4663_v18  ;;  %773 = vadd.xlane.f32.xlu0 %v772_v50  ;;  %v4767_v30 = vpop.f32.mrf.mxu1 }
  0xe2   :  { %v413_v55 = vpop.f32.mrf.mxu0 }
  0xe3   :  { %v775_v56 = vadd.f32 %v4723_v54, %v4720_v53  ;;  %v4730_v59 = vadd.f32 %v413_v55, %v4660_v17  ;;  %v4777_v43 = vpop.f32.mrf.mxu1 }
  0xe4   :  { %v415_v57 = vpop.f32.mrf.mxu0 }
  0xe5   :  { %v4733_v60 = vadd.f32 %v415_v57, %v4663_v18  ;;  %776 = vadd.xlane.f32.xlu1 %v775_v56  ;;  %v4787_v55 = vpop.f32.mrf.mxu1 }
  0xe6   :  { %v419_v61 = vpop.f32.mrf.mxu0 }
  0xe7   :  { %v778_v62 = vadd.f32 %v4733_v60, %v4730_v59  ;;  %v4740_v1 = vadd.f32 %v419_v61, %v4660_v17 }
  0xe8   :  { %v421_v63 = vpop.f32.mrf.mxu0 }
  0xe9   :  { %v4743_v2 = vadd.f32 %v421_v63, %v4663_v18  ;;  %779 = vadd.xlane.f32.xlu0 %v778_v62 }
  0xea   :  { %v425_v4 = vpop.f32.mrf.mxu0 }
  0xeb   :  { %v781_v5 = vadd.f32 %v4743_v2, %v4740_v1  ;;  %v4750_v8 = vadd.f32 %v425_v4, %v4660_v17  ;;  %v4797_v4 = vpop.f32.mrf.mxu1 }
  0xec   :  { %v427_v6 = vpop.f32.mrf.mxu0 }
  0xed   :  { %v4753_v9 = vadd.f32 %v427_v6, %v4663_v18  ;;  %782 = vadd.xlane.f32.xlu1 %v781_v5 }
  0xee   :  { %v431_v13 = vpop.f32.mrf.mxu0 }
  0xef   :  { %v784_v14 = vadd.f32 %v4753_v9, %v4750_v8  ;;  %v4760_v19 = vadd.f32 %v431_v13, %v4660_v17 }
  0xf0   :  { %v433_v15 = vpop.f32.mrf.mxu0 }
  0xf1   :  { %v4763_v20 = vadd.f32 %v433_v15, %v4663_v18  ;;  %785 = vadd.xlane.f32.xlu0 %v784_v14 }
  0xf2   :  { %v437_v23 = vpop.f32.mrf.mxu0 }
  0xf3   :  { %v787_v24 = vadd.f32 %v4763_v20, %v4760_v19  ;;  %v4770_v31 = vadd.f32 %v437_v23, %v4660_v17  ;;  %v4807_v23 = vpop.f32.mrf.mxu1 }
  0xf4   :  { %v439_v26 = vpop.f32.mrf.mxu0 }
  0xf5   :  { %v4773_v33 = vadd.f32 %v439_v26, %v4663_v18  ;;  %788 = vadd.xlane.f32.xlu1 %v787_v24 }
  0xf6   :  { %v443_v37 = vpop.f32.mrf.mxu0 }
  0xf7   :  { %7759 = vst [vmem:[#allocation4_spill] sm:$0xff] %v4773_v33  ;;  %v790_v38 = vadd.f32 %v4773_v33, %v4770_v31  ;;  %v4780_v44 = vadd.f32 %v443_v37, %v4660_v17  ;;  %v2208_v33 = vld [vmem:[%s7591_s3 + $0x18] sm:$0xff] }
  0xf8   :  { %v445_v39 = vpop.f32.mrf.mxu0 }
  0xf9   :  { %7760 = vst [vmem:[#allocation5_spill] sm:$0xff] %v4780_v44  ;;  %v4783_v45 = vadd.f32 %v445_v39, %v4663_v18  ;;  %791 = vadd.xlane.f32.xlu0 %v790_v38 }
  0xfa   :  { %v449_v49 = vpop.f32.mrf.mxu0 }
  0xfb   :  { %7761 = vst [vmem:[#allocation6_spill] sm:$0xff] %v4783_v45  ;;  %v793_v50 = vadd.f32 %v4783_v45, %v4780_v44  ;;  %v4790_v56 = vadd.f32 %v449_v49, %v4660_v17  ;;  %v4817_v49 = vpop.f32.mrf.mxu1  ;;  %v2212_v45 = vld [vmem:[%s7591_s3 + $0x38] sm:$0xff]  ;;  %v2210_v44 = vld [vmem:[%s7591_s3 + $0x28] sm:$0xff] }
  0xfc   :  { %v451_v51 = vpop.f32.mrf.mxu0 }
  0xfd   :  { %7762 = vst [vmem:[#allocation7_spill] sm:$0xff] %v4790_v56  ;;  %v4793_v57 = vadd.f32 %v451_v51, %v4663_v18  ;;  %794 = vadd.xlane.f32.xlu1 %v793_v50 }
  0xfe   :  { %v455_v61 = vpop.f32.mrf.mxu0 }
  0xff   :  { %7763 = vst [vmem:[#allocation8_spill] sm:$0xff] %v4793_v57  ;;  %v796_v62 = vadd.f32 %v4793_v57, %v4790_v56  ;;  %v4800_v5 = vadd.f32 %v455_v61, %v4660_v17  ;;  %v2216_v57 = vld [vmem:[%s7591_s3 + $0x58] sm:$0xff]  ;;  %v2214_v56 = vld [vmem:[%s7591_s3 + $0x48] sm:$0xff] }
 0x100   :  { %v457_v63 = vpop.f32.mrf.mxu0 }
 0x101   :  { %7764 = vst [vmem:[#allocation9_spill] sm:$0xff] %v4800_v5  ;;  %v4803_v6 = vadd.f32 %v457_v63, %v4663_v18  ;;  %797 = vadd.xlane.f32.xlu0 %v796_v62  ;;  %v2236_v62 = vld [vmem:[%s7591_s3 + $0xf8] sm:$0xff]  ;;  %v2235_v63 = vld [vmem:[%s7591_s3 + $0xf0] sm:$0xff] }
 0x102   :  { %v461_v13 = vpop.f32.mrf.mxu0  ;;  %2281 = vmatprep.subr.mxu1 %v2236_v62 }
 0x103   :  { %7765 = vst [vmem:[#allocation10_spill] sm:$0xff] %v4803_v6  ;;  %v799_v14 = vadd.f32 %v4803_v6, %v4800_v5  ;;  %v4810_v24 = vadd.f32 %v461_v13, %v4660_v17  ;;  %2282 = vmatpush1.msra.mxu1 %v2235_v63  ;;  %v2220_v6 = vld [vmem:[%s7591_s3 + $0x78] sm:$0xff]  ;;  %v2218_v5 = vld [vmem:[%s7591_s3 + $0x68] sm:$0xff] }
 0x104   :  { %v463_v15 = vpop.f32.mrf.mxu0 }
 0x105   :  { %7766 = vst [vmem:[#allocation11_spill] sm:$0xff] %v4810_v24  ;;  %v4813_v26 = vadd.f32 %v463_v15, %v4663_v18  ;;  %800 = vadd.xlane.f32.xlu1 %v799_v14  ;;  %v4833_v15 = vpop.f32.mrf.mxu1 }
 0x106   :  { %v467_v37 = vpop.f32.mrf.mxu0 }
 0x107   :  { %7767 = vst [vmem:[#allocation12_spill] sm:$0xff] %v4813_v26  ;;  %v802_v38 = vadd.f32 %v4813_v26, %v4810_v24  ;;  %v4820_v50 = vadd.f32 %v467_v37, %v4660_v17  ;;  %v4849_v3 = vpop.f32.mrf.mxu1  ;;  %v2224_v26 = vld [vmem:[%s7591_s3 + $0x98] sm:$0xff]  ;;  %v2222_v24 = vld [vmem:[%s7591_s3 + $0x88] sm:$0xff] }
 0x108   :  { %v469_v39 = vpop.f32.mrf.mxu0 }
 0x109   :  { %7768 = vst [vmem:[#allocation13_spill] sm:$0xff] %v4820_v50  ;;  %v4823_v51 = vadd.f32 %v469_v39, %v4663_v18  ;;  %803 = vadd.xlane.f32.xlu0 %v802_v38  ;;  %v2234_v39 = vld [vmem:[%s7591_s3 + $0xe8] sm:$0xff] }
 0x10a   :  { %v473_v61 = vpop.f32.mrf.mxu0  ;;  %2283 = vmatprep.subr.mxu1 %v2234_v39  ;;  %v2231_v39 = vld [vmem:[%s7591_s3 + $0xd0] sm:$0xff] }
 0x10b   :  { %7769 = vst [vmem:[#allocation14_spill] sm:$0xff] %v4823_v51  ;;  %v805_v13 = vadd.f32 %v4823_v51, %v4820_v50  ;;  %v4836_v37 = vadd.f32 %v473_v61, %v4660_v17  ;;  %2284 = vmatpush1.msra.mxu1 %v2233_v10  ;;  %v2228_v51 = vld [vmem:[%s7591_s3 + $0xb8] sm:$0xff]  ;;  %v2226_v50 = vld [vmem:[%s7591_s3 + $0xa8] sm:$0xff] }
 0x10c   :  { %v475_v14 = vpop.f32.mrf.mxu0  ;;  %2285 = vmatprep.subr.mxu1 %v2232_v12  ;;  %v2229_v12 = vld [vmem:[%s7591_s3 + $0xc0] sm:$0xff] }
 0x10d   :  { %7770 = vst [vmem:[#allocation15_spill] sm:$0xff] %v4836_v37  ;;  %v4839_v38 = vadd.f32 %v475_v14, %v4663_v18  ;;  %806 = vadd.xlane.f32.xlu1 %v805_v13  ;;  %2286 = vmatpush1.msra.mxu1 %v2231_v39 }
 0x10e   :  { %v479_v62 = vpop.f32.mrf.mxu0 }
 0x10f   :  { %7771 = vst [vmem:[#allocation16_spill] sm:$0xff] %v4839_v38  ;;  %v808_v63 = vadd.f32 %v4839_v38, %v4836_v37  ;;  %v4852_v14 = vadd.f32 %v479_v62, %v4660_v17  ;;  %v4865_v38 = vpop.f32.mrf.mxu1  ;;  %v2230_v37 = vld [vmem:[%s7591_s3 + $0xc8] sm:$0xff] }
 0x110   :  { %v481_v61 = vpop.f32.mrf.mxu0  ;;  %2287 = vmatprep.subr.mxu1 %v2230_v37  ;;  %v2227_v37 = vld [vmem:[%s7591_s3 + $0xb0] sm:$0xff] }
 0x111   :  { %7772 = vst [vmem:[#allocation17_spill] sm:$0xff] %v4852_v14  ;;  %v4855_v13 = vadd.f32 %v481_v61, %v4663_v18  ;;  %809 = vadd.xlane.f32.xlu0 %v808_v63  ;;  %2288 = vmatpush1.msra.mxu1 %v2229_v12 }
 0x112   :  { %v485_v11 = vpop.f32.mrf.mxu0  ;;  %2289 = vmatprep.subr.mxu1 %v2228_v51  ;;  %v2225_v51 = vld [vmem:[%s7591_s3 + $0xa0] sm:$0xff] }
 0x113   :  { %7773 = vst [vmem:[#allocation18_spill] sm:$0xff] %v4855_v13  ;;  %v811_v10 = vadd.f32 %v4855_v13, %v4852_v14  ;;  %v4868_v61 = vadd.f32 %v485_v11, %v4660_v17  ;;  %v4881_v14 = vpop.f32.mrf.mxu1  ;;  %2290 = vmatpush1.msra.mxu1 %v2227_v37 }
 0x114   :  { %v487_v62 = vpop.f32.mrf.mxu0  ;;  %2291 = vmatprep.subr.mxu1 %v2226_v50  ;;  %v2223_v50 = vld [vmem:[%s7591_s3 + $0x90] sm:$0xff] }
 0x115   :  { %7774 = vst [vmem:[#allocation19_spill] sm:$0xff] %v4868_v61  ;;  %v4871_v63 = vadd.f32 %v487_v62, %v4663_v18  ;;  %812 = vadd.xlane.f32.xlu1 %v811_v10  ;;  %2292 = vmatpush1.msra.mxu1 %v2225_v51 }
 0x116   :  { %v491_v13 = vpop.f32.mrf.mxu0  ;;  %2293 = vmatprep.subr.mxu1 %v2224_v26  ;;  %v2221_v26 = vld [vmem:[%s7591_s3 + $0x80] sm:$0xff] }
 0x117   :  { %7775 = vst [vmem:[#allocation20_spill] sm:$0xff] %v4871_v63  ;;  %v814_v39 = vadd.f32 %v4871_v63, %v4868_v61  ;;  %v4884_v62 = vadd.f32 %v491_v13, %v4660_v17  ;;  %v4897_v61 = vpop.f32.mrf.mxu1  ;;  %2294 = vmatpush1.msra.mxu1 %v2223_v50 }
 0x118   :  { %v493_v11 = vpop.f32.mrf.mxu0  ;;  %2295 = vmatprep.subr.mxu1 %v2222_v24  ;;  %v2219_v24 = vld [vmem:[%s7591_s3 + $0x70] sm:$0xff] }
 0x119   :  { %7776 = vst [vmem:[#allocation21_spill] sm:$0xff] %v4884_v62  ;;  %v4887_v10 = vadd.f32 %v493_v11, %v4663_v18  ;;  %815 = vadd.xlane.f32.xlu0 %v814_v39  ;;  %2296 = vmatpush1.msra.mxu1 %v2221_v26 }
 0x11a   :  { %v497_v63 = vpop.f32.mrf.mxu0  ;;  %2297 = vmatprep.subr.mxu1 %v2220_v6  ;;  %v2217_v6 = vld [vmem:[%s7591_s3 + $0x60] sm:$0xff] }
 0x11b   :  { %7777 = vst [vmem:[#allocation22_spill] sm:$0xff] %v4887_v10  ;;  %v817_v12 = vadd.f32 %v4887_v10, %v4884_v62  ;;  %v4900_v11 = vadd.f32 %v497_v63, %v4660_v17  ;;  %v4913_v62 = vpop.f32.mrf.mxu1  ;;  %2298 = vmatpush1.msra.mxu1 %v2219_v24 }
 0x11c   :  { %v499_v13 = vpop.f32.mrf.mxu0  ;;  %2299 = vmatprep.subr.mxu1 %v2218_v5  ;;  %v2215_v5 = vld [vmem:[%s7591_s3 + $0x50] sm:$0xff] }
 0x11d   :  { %7778 = vst [vmem:[#allocation23_spill] sm:$0xff] %v4900_v11  ;;  %v4903_v39 = vadd.f32 %v499_v13, %v4663_v18  ;;  %818 = vadd.xlane.f32.xlu1 %v817_v12  ;;  %2300 = vmatpush1.msra.mxu1 %v2217_v6 }
 0x11e   :  { %v503_v10 = vpop.f32.mrf.mxu0  ;;  %2301 = vmatprep.subr.mxu1 %v2216_v57  ;;  %v2213_v57 = vld [vmem:[%s7591_s3 + $0x40] sm:$0xff] }
 0x11f   :  { %7779 = vst [vmem:[#allocation24_spill] sm:$0xff] %v4903_v39  ;;  %v820_v37 = vadd.f32 %v4903_v39, %v4900_v11  ;;  %v4916_v13 = vadd.f32 %v503_v10, %v4660_v17  ;;  %v4929_v11 = vpop.f32.mrf.mxu1  ;;  %2302 = vmatpush1.msra.mxu1 %v2215_v5 }
 0x120   :  { %v505_v63 = vpop.f32.mrf.mxu0  ;;  %2303 = vmatprep.subr.mxu1 %v2214_v56  ;;  %v2211_v56 = vld [vmem:[%s7591_s3 + $0x30] sm:$0xff] }
 0x121   :  { %7780 = vst [vmem:[#allocation25_spill] sm:$0xff] %v4916_v13  ;;  %v4919_v12 = vadd.f32 %v505_v63, %v4663_v18  ;;  %821 = vadd.xlane.f32.xlu1 %v820_v37  ;;  %2304 = vmatpush1.msra.mxu1 %v2213_v57 }
 0x122   :  { %v509_v39 = vpop.f32.mrf.mxu0  ;;  %2305 = vmatprep.subr.mxu1 %v2212_v45  ;;  %v2209_v45 = vld [vmem:[%s7591_s3 + $0x20] sm:$0xff] }
 0x123   :  { %7781 = vst [vmem:[#allocation26_spill] sm:$0xff] %v4919_v12  ;;  %v823_v51 = vadd.f32 %v4919_v12, %v4916_v13  ;;  %v4932_v63 = vadd.f32 %v509_v39, %v4660_v17  ;;  %v4945_v13 = vpop.f32.mrf.mxu1  ;;  %2306 = vmatpush1.msra.mxu1 %v2211_v56 }
 0x124   :  { %v511_v10 = vpop.f32.mrf.mxu0  ;;  %2307 = vmatprep.subr.mxu1 %v2210_v44  ;;  %v2207_v44 = vld [vmem:[%s7591_s3 + $0x10] sm:$0xff] }
 0x125   :  { %7782 = vst [vmem:[#allocation27_spill] sm:$0xff] %v4932_v63  ;;  %v4935_v37 = vadd.f32 %v511_v10, %v4663_v18  ;;  %824 = vadd.xlane.f32.xlu1 %v823_v51  ;;  %2308 = vmatpush1.msra.mxu1 %v2209_v45 }
 0x126   :  { %v515_v12 = vpop.f32.mrf.mxu0  ;;  %2309 = vmatprep.subr.mxu1 %v2208_v33  ;;  %v2205_v33 = vld [vmem:[%s7591_s3] sm:$0xff] }
 0x127   :  { %7783 = vst [vmem:[#allocation28_spill] sm:$0xff] %v4935_v37  ;;  %v826_v50 = vadd.f32 %v4935_v37, %v4932_v63  ;;  %v4948_v10 = vadd.f32 %v515_v12, %v4660_v17  ;;  %v4961_v63 = vpop.f32.mrf.mxu1  ;;  %2310 = vmatpush1.msra.mxu1 %v2207_v44 }
 0x128   :  { %v517_v39 = vpop.f32.mrf.mxu0 }
 0x129   :  { %7784 = vst [vmem:[#allocation29_spill] sm:$0xff] %v4948_v10  ;;  %v4951_v51 = vadd.f32 %v517_v39, %v4663_v18  ;;  %827 = vadd.xlane.f32.xlu1 %v826_v50 }
 0x12a   :  { %v521_v37 = vpop.f32.mrf.mxu0 }
 0x12b   :  { %7785 = vst [vmem:[#allocation30_spill] sm:$0xff] %v4951_v51  ;;  %v829_v26 = vadd.f32 %v4951_v51, %v4948_v10  ;;  %v4964_v39 = vadd.f32 %v521_v37, %v4660_v17  ;;  %v4977_v10 = vpop.f32.mrf.mxu1 }
 0x12c   :  { %v523_v12 = vpop.f32.mrf.mxu0 }
 0x12d   :  { %7786 = vst [vmem:[#allocation31_spill] sm:$0xff] %v4964_v39  ;;  %v4967_v50 = vadd.f32 %v523_v12, %v4663_v18  ;;  %830 = vadd.xlane.f32.xlu1 %v829_v26 }
 0x12e   :  { %v527_v51 = vpop.f32.mrf.mxu0 }
 0x12f   :  { %7787 = vst [vmem:[#allocation32_spill] sm:$0xff] %v4967_v50  ;;  %v832_v24 = vadd.f32 %v4967_v50, %v4964_v39  ;;  %v4980_v12 = vadd.f32 %v527_v51, %v4660_v17  ;;  %v4993_v39 = vpop.f32.mrf.mxu1 }
 0x130   :  { %v529_v37 = vpop.f32.mrf.mxu0 }
 0x131   :  { %7788 = vst [vmem:[#allocation33_spill] sm:$0xff] %v4980_v12  ;;  %v4983_v26 = vadd.f32 %v529_v37, %v4663_v18  ;;  %833 = vadd.xlane.f32.xlu1 %v832_v24 }
 0x132   :  { %v533_v50 = vpop.f32.mrf.mxu0 }
 0x133   :  { %7789 = vst [vmem:[#allocation34_spill] sm:$0xff] %v4983_v26  ;;  %v835_v6 = vadd.f32 %v4983_v26, %v4980_v12  ;;  %v4996_v37 = vadd.f32 %v533_v50, %v4660_v17  ;;  %v5009_v12 = vpop.f32.mrf.mxu1 }
 0x134   :  { %v535_v51 = vpop.f32.mrf.mxu0 }
 0x135   :  { %7790 = vst [vmem:[#allocation35_spill] sm:$0xff] %v4996_v37  ;;  %v4999_v24 = vadd.f32 %v535_v51, %v4663_v18  ;;  %836 = vadd.xlane.f32.xlu1 %v835_v6 }
 0x136   :  { %v539_v26 = vpop.f32.mrf.mxu0 }
 0x137   :  { %7791 = vst [vmem:[#allocation36_spill] sm:$0xff] %v4999_v24  ;;  %v838_v5 = vadd.f32 %v4999_v24, %v4996_v37  ;;  %v5012_v51 = vadd.f32 %v539_v26, %v4660_v17  ;;  %v5025_v37 = vpop.f32.mrf.mxu1 }
 0x138   :  { %v541_v50 = vpop.f32.mrf.mxu0 }
 0x139   :  { %7792 = vst [vmem:[#allocation37_spill] sm:$0xff] %v5012_v51  ;;  %v5015_v6 = vadd.f32 %v541_v50, %v4663_v18  ;;  %839 = vadd.xlane.f32.xlu1 %v838_v5 }
 0x13a   :  { %v545_v24 = vpop.f32.mrf.mxu0 }
 0x13b   :  { %7793 = vst [vmem:[#allocation38_spill] sm:$0xff] %v5015_v6  ;;  %v841_v57 = vadd.f32 %v5015_v6, %v5012_v51  ;;  %v5028_v50 = vadd.f32 %v545_v24, %v4660_v17  ;;  %v5041_v51 = vpop.f32.mrf.mxu1 }
 0x13c   :  { %v547_v26 = vpop.f32.mrf.mxu0  ;;  %7796 = vst [vmem:[#allocation41_spill] sm:$0xff] %v5041_v51  ;;  %v2206_v51 = vld [vmem:[%s7591_s3 + $0x8] sm:$0xff] }
 0x13d   :  { %7794 = vst [vmem:[#allocation39_spill] sm:$0xff] %v5028_v50  ;;  %v5031_v5 = vadd.f32 %v547_v26, %v4663_v18  ;;  %842 = vadd.xlane.f32.xlu1 %v841_v57  ;;  %2311 = vmatprep.subr.mxu1 %v2206_v51  ;;  %v2267_v51 = vld [vmem:[%s7591_s3 + $0x1f0] sm:$0xff] }
 0x13e   :  { %v551_v6 = vpop.f32.mrf.mxu0  ;;  %2312 = vmatpush1.msra.mxu1 %v2205_v33  ;;  %v5089_v33 = vadd.f32 %v4673_v25, %v4660_v17  ;;  %v2265_v25 = vld [vmem:[%s7591_s3 + $0x1e0] sm:$0xff] }
 0x13f   :  { %7795 = vst [vmem:[#allocation40_spill] sm:$0xff] %v5031_v5  ;;  %v844_v56 = vadd.f32 %v5031_v5, %v5028_v50  ;;  %v5044_v26 = vadd.f32 %v551_v6, %v4660_v17  ;;  %v5057_v50 = vpop.f32.mrf.mxu1 }
 0x140   :  { %v553_v24 = vpop.f32.mrf.mxu0  ;;  %7799 = vst [vmem:[#allocation44_spill] sm:$0xff] %v5057_v50  ;;  %v2268_v50 = vld [vmem:[%s7591_s3 + $0x1f8] sm:$0xff]  ;;  %7802 = vst [vmem:[#allocation47_spill] sm:$0xff] %v5089_v33 }
 0x141   :  { %7797 = vst [vmem:[#allocation42_spill] sm:$0xff] %v5044_v26  ;;  %v5047_v57 = vadd.f32 %v553_v24, %v4663_v18  ;;  %845 = vadd.xlane.f32.xlu1 %v844_v56  ;;  %2313 = vmatprep.subr.mxu1 %v2268_v50  ;;  %v5111_v50 = vadd.f32 %v4693_v36, %v4663_v18 }
 0x142   :  { %v557_v5 = vpop.f32.mrf.mxu0  ;;  %2314 = vmatpush2.msra.mxu1 %v2267_v51  ;;  %v5125_v36 = vadd.f32 %v4697_v40, %v4660_v17  ;;  %v2261_v40 = vld [vmem:[%s7591_s3 + $0x1c0] sm:$0xff] }
 0x143   :  { %7798 = vst [vmem:[#allocation43_spill] sm:$0xff] %v5047_v57  ;;  %v847_v45 = vadd.f32 %v5047_v57, %v5044_v26  ;;  %v5060_v24 = vadd.f32 %v557_v5, %v4660_v17  ;;  %v5073_v26 = vpop.f32.mrf.mxu1  ;;  %7805 = vst [vmem:[#allocation50_spill] sm:$0xff] %v5111_v50 }
 0x144   :  { %v559_v6 = vpop.f32.mrf.mxu0  ;;  %7806 = vst [vmem:[#allocation51_spill] sm:$0xff] %v5125_v36 }
 0x145   :  { %v5063_v56 = vadd.f32 %v559_v6, %v4663_v18  ;;  %848 = vadd.xlane.f32.xlu1 %v847_v45 }
 0x146   :  { %v563_v57 = vpop.f32.mrf.mxu0 }
 0x147   :  { %7800 = vst [vmem:[#allocation45_spill] sm:$0xff] %v5063_v56  ;;  %v850_v44 = vadd.f32 %v5063_v56, %v5060_v24  ;;  %v5076_v6 = vadd.f32 %v563_v57, %v4660_v17  ;;  %v5093_v57 = vadd.f32 %v4681_v29, %v4663_v18  ;;  %v2266_v56 = vld [vmem:[%s7591_s3 + $0x1e8] sm:$0xff]  ;;  %v5107_v29 = vadd.f32 %v4685_v32, %v4660_v17  ;;  %v2263_v32 = vld [vmem:[%s7591_s3 + $0x1d0] sm:$0xff] }
 0x148   :  { %v565_v5 = vpop.f32.mrf.mxu0  ;;  %2315 = vmatprep.subr.mxu1 %v2266_v56  ;;  %v5129_v56 = vadd.f32 %v4707_v46, %v4663_v18  ;;  %v5143_v46 = vadd.f32 %v4717_v52, %v4660_v17  ;;  %v2259_v52 = vld [vmem:[%s7591_s3 + $0x1b0] sm:$0xff] }
 0x149   :  { %v5079_v45 = vadd.f32 %v565_v5, %v4663_v18  ;;  %851 = vadd.xlane.f32.xlu1 %v850_v44  ;;  %7803 = vst [vmem:[#allocation48_spill] sm:$0xff] %v5093_v57  ;;  %v5097_v5 = vpop.f32.mrf.mxu1  ;;  %7804 = vst [vmem:[#allocation49_spill] sm:$0xff] %v5107_v29  ;;  %v856_v51 = vadd.f32 %v5093_v57, %v5089_v33  ;;  %2316 = vmatpush2.msra.mxu1 %v2265_v25  ;;  %v2262_v57 = vld [vmem:[%s7591_s3 + $0x1c8] sm:$0xff] }
 0x14a   :  { %7807 = vst [vmem:[#allocation52_spill] sm:$0xff] %v5129_v56  ;;  %v859_v25 = vadd.f32 %v5111_v50, %v5107_v29  ;;  %v2260_v50 = vld [vmem:[%s7591_s3 + $0x1b8] sm:$0xff] }
 0x14b   :  { %7801 = vst [vmem:[#allocation46_spill] sm:$0xff] %v5079_v45  ;;  %v853_v44 = vadd.f32 %v5079_v45, %v5076_v6  ;;  %v2264_v45 = vld [vmem:[%s7591_s3 + $0x1d8] sm:$0xff] }
 0x14c   :  { %2317 = vmatprep.subr.mxu1 %v2264_v45  ;;  %v5147_v45 = vadd.f32 %v4727_v58, %v4663_v18  ;;  %v5165_v58 = vadd.f32 %v4747_v7, %v4663_v18  ;;  %v2257_v7 = vld [vmem:[%s7591_s3 + $0x1a0] sm:$0xff] }
 0x14d   :  { %854 = vadd.xlane.f32.xlu1 %v853_v44  ;;  %v5115_v44 = vpop.f32.mrf.mxu1  ;;  %2318 = vmatpush2.msra.mxu1 %v2263_v32  ;;  %v862_v32 = vadd.f32 %v5129_v56, %v5125_v36 }
 0x14e   :  { %2319 = vmatprep.subr.mxu1 %v2262_v57  ;;  %7808 = vst [vmem:[#allocation53_spill] sm:$0xff] %v5147_v45  ;;  %v5161_v57 = vadd.f32 %v4737_v0, %v4660_v17  ;;  %7809 = vst [vmem:[#allocation54_spill] sm:$0xff] %v5165_v58  ;;  %v2258_v0 = vld [vmem:[%s7591_s3 + $0x1a8] sm:$0xff] }
 0x14f   :  { %2320 = vmatpush2.msra.mxu1 %v2261_v40 }
 0x150   :  { %2321 = vmatprep.subr.mxu1 %v2260_v50  ;;  %v5185_v50 = vadd.f32 %v4757_v16, %v4660_v17 }
 0x151   :  { %857 = vadd.xlane.f32.xlu1 %v856_v51  ;;  %v5133_v51 = vpop.f32.mrf.mxu1  ;;  %2322 = vmatpush2.msra.mxu1 %v2259_v52 }
 0x152   :  { %2323 = vmatprep.subr.mxu1 %v2258_v0 }
 0x153   :  { %2324 = vmatpush2.msra.mxu1 %v2257_v7  ;;  %v5213_v7 = vadd.f32 %v4777_v43, %v4660_v17 }
 0x155   :  { %860 = vadd.xlane.f32.xlu1 %v859_v25  ;;  %v5151_v25 = vpop.f32.mrf.mxu1 }
 0x157   :  { %v5169_v36 = vpop.f32.mrf.mxu1 }
 0x159   :  { %863 = vadd.xlane.f32.xlu1 %v862_v32  ;;  %v865_v32 = vadd.f32 %v5147_v45, %v5143_v46  ;;  %v5197_v45 = vpop.f32.mrf.mxu1 }
 0x15a   :  { %v762_v40 = vpop.xlane.xlu0 %761 }
 0x15b   :  { %v953_v56 = vmul.f32 0.00390625, %v762_v40  ;;  %v5225_v43 = vpop.f32.mrf.mxu1 }
 0x15d   :  { %v5172_v29 = vsub.f32 %v4666_v21, %v953_v56  ;;  %v5175_v33 = vsub.f32 %v4669_v22, %v953_v56  ;;  %866 = vadd.xlane.f32.xlu1 %v865_v32  ;;  %v868_v21 = vadd.f32 %v5165_v58, %v5161_v57  ;;  %v5191_v22 = vadd.f32 %v4767_v30, %v4663_v18  ;;  %v2256_v30 = vld [vmem:[%s7591_s3 + $0x198] sm:$0xff] }
 0x15e   :  { %v765_v52 = vpop.xlane.xlu0 %764  ;;  %2325 = vmatprep.subr.mxu1 %v2256_v30  ;;  %v2254_v30 = vld [vmem:[%s7591_s3 + $0x188] sm:$0xff] }
 0x15f   :  { %7810 = vst [vmem:[#allocation55_spill] sm:$0xff] %v5172_v29  ;;  %v954_v56 = vmul.f32 0.00390625, %v765_v52  ;;  %v1145_v40 = vmul.f32 %v5172_v29, %v5172_v29  ;;  %v1146_v32 = vmul.f32 %v5175_v33, %v5175_v33  ;;  %v2255_v52 = vld [vmem:[%s7591_s3 + $0x190] sm:$0xff] }
 0x160   :  { %2326 = vmatpush2.msra.mxu1 %v2255_v52  ;;  %v5241_v52 = vadd.f32 %v4797_v4, %v4660_v17  ;;  %v5253_v4 = vpop.f32.mrf.mxu1 }
 0x161   :  { %v5200_v16 = vsub.f32 %v4676_v27, %v954_v56  ;;  %v5203_v58 = vsub.f32 %v4679_v28, %v954_v56  ;;  %869 = vadd.xlane.f32.xlu1 %v868_v21  ;;  %v1273_v0 = vadd.f32 %v1146_v32, %v1145_v40  ;;  %v5217_v27 = vadd.f32 %v4787_v55, %v4663_v18 }
 0x162   :  { %v768_v28 = vpop.xlane.xlu1 %767  ;;  %v871_v56 = vadd.f32 %v5191_v22, %v5185_v50  ;;  %2327 = vmatprep.subr.mxu1 %v2254_v30 }
 0x163   :  { %7811 = vst [vmem:[#allocation56_spill] sm:$0xff] %v5200_v16  ;;  %v955_v21 = vmul.f32 0.00390625, %v768_v28  ;;  %1274 = vadd.xlane.f32.xlu0 %v1273_v0  ;;  %v1147_v40 = vmul.f32 %v5200_v16, %v5200_v16  ;;  %v1148_v32 = vmul.f32 %v5203_v58, %v5203_v58  ;;  %v2253_v28 = vld [vmem:[%s7591_s3 + $0x180] sm:$0xff] }
 0x164   :  { %2328 = vmatpush2.msra.mxu1 %v2253_v28  ;;  %v5269_v28 = vadd.f32 %v4817_v49, %v4660_v17  ;;  %v5281_v49 = vpop.f32.mrf.mxu1 }
 0x165   :  { %v5228_v29 = vsub.f32 %v4688_v34, %v955_v21  ;;  %v5231_v55 = vsub.f32 %v4691_v35, %v955_v21  ;;  %872 = vadd.xlane.f32.xlu1 %v871_v56  ;;  %v1276_v0 = vadd.f32 %v1148_v32, %v1147_v40  ;;  %v874_v34 = vadd.f32 %v5217_v27, %v5213_v7 }
 0x166   :  { %v771_v16 = vpop.xlane.xlu1 %770  ;;  %v5247_v35 = vadd.f32 %v4807_v23, %v4663_v18 }
 0x167   :  { %7812 = vst [vmem:[#allocation57_spill] sm:$0xff] %v5228_v29  ;;  %v956_v21 = vmul.f32 0.00390625, %v771_v16  ;;  %1277 = vadd.xlane.f32.xlu0 %v1276_v0  ;;  %v1149_v56 = vmul.f32 %v5228_v29, %v5228_v29  ;;  %v1150_v40 = vmul.f32 %v5231_v55, %v5231_v55  ;;  %v2252_v16 = vld [vmem:[%s7591_s3 + $0x178] sm:$0xff]  ;;  %v2251_v0 = vld [vmem:[%s7591_s3 + $0x170] sm:$0xff] }
 0x168   :  { %2329 = vmatprep.subr.mxu1 %v2252_v16  ;;  %v2250_v16 = vld [vmem:[%s7591_s3 + $0x168] sm:$0xff] }
 0x169   :  { %v5256_v32 = vsub.f32 %v4700_v41, %v956_v21  ;;  %v5259_v30 = vsub.f32 %v4703_v42, %v956_v21  ;;  %875 = vadd.xlane.f32.xlu1 %v874_v34  ;;  %v1279_v23 = vadd.f32 %v1150_v40, %v1149_v56  ;;  %v5273_v41 = vadd.f32 %v4833_v15, %v4663_v18 }
 0x16a   :  { %v774_v42 = vpop.xlane.xlu0 %773  ;;  %v877_v21 = vadd.f32 %v5247_v35, %v5241_v52  ;;  %2330 = vmatpush2.msra.mxu1 %v2251_v0  ;;  %v5297_v0 = vadd.f32 %v4849_v3, %v4660_v17  ;;  %v5309_v3 = vpop.f32.mrf.mxu1 }
 0x16b   :  { %7813 = vst [vmem:[#allocation58_spill] sm:$0xff] %v5256_v32  ;;  %v957_v34 = vmul.f32 0.00390625, %v774_v42  ;;  %1280 = vadd.xlane.f32.xlu0 %v1279_v23  ;;  %v1151_v56 = vmul.f32 %v5256_v32, %v5256_v32  ;;  %v1152_v40 = vmul.f32 %v5259_v30, %v5259_v30  ;;  %v2249_v42 = vld [vmem:[%s7591_s3 + $0x160] sm:$0xff]  ;;  %2331 = vmatprep.subr.mxu1 %v2250_v16 }
 0x16c   :  { %2332 = vmatpush2.msra.mxu1 %v2249_v42  ;;  %v5325_v42 = vadd.f32 %v4881_v14, %v4660_v17  ;;  %v5337_v14 = vpop.f32.mrf.mxu1 }
 0x16d   :  { %v5284_v29 = vsub.f32 %v4710_v47, %v957_v34  ;;  %v5287_v15 = vsub.f32 %v4713_v48, %v957_v34  ;;  %878 = vadd.xlane.f32.xlu1 %v877_v21  ;;  %v1282_v23 = vadd.f32 %v1152_v40, %v1151_v56  ;;  %v880_v47 = vadd.f32 %v5273_v41, %v5269_v28 }
 0x16e   :  { %v777_v32 = vpop.xlane.xlu1 %776  ;;  %v5303_v48 = vadd.f32 %v4865_v38, %v4663_v18 }
 0x16f   :  { %7814 = vst [vmem:[#allocation59_spill] sm:$0xff] %v5284_v29  ;;  %v958_v34 = vmul.f32 0.00390625, %v777_v32  ;;  %1283 = vadd.xlane.f32.xlu0 %v1282_v23  ;;  %v1153_v21 = vmul.f32 %v5284_v29, %v5284_v29  ;;  %v1154_v56 = vmul.f32 %v5287_v15, %v5287_v15  ;;  %v2248_v32 = vld [vmem:[%s7591_s3 + $0x158] sm:$0xff]  ;;  %v2247_v23 = vld [vmem:[%s7591_s3 + $0x150] sm:$0xff] }
 0x170   :  { %2333 = vmatprep.subr.mxu1 %v2248_v32  ;;  %v2246_v32 = vld [vmem:[%s7591_s3 + $0x148] sm:$0xff] }
 0x171   :  { %v5312_v40 = vsub.f32 %v4720_v53, %v958_v34  ;;  %v5315_v16 = vsub.f32 %v4723_v54, %v958_v34  ;;  %881 = vadd.xlane.f32.xlu1 %v880_v47  ;;  %v1285_v38 = vadd.f32 %v1154_v56, %v1153_v21  ;;  %v5329_v53 = vadd.f32 %v4897_v61, %v4663_v18 }
 0x172   :  { %v780_v54 = vpop.xlane.xlu0 %779  ;;  %v883_v34 = vadd.f32 %v5303_v48, %v5297_v0  ;;  %2334 = vmatpush2.msra.mxu1 %v2247_v23  ;;  %v5353_v23 = vadd.f32 %v4913_v62, %v4660_v17  ;;  %v5365_v62 = vpop.f32.mrf.mxu1 }
 0x173   :  { %7815 = vst [vmem:[#allocation60_spill] sm:$0xff] %v5312_v40  ;;  %7816 = vst [vmem:[#allocation61_spill] sm:$0xff] %v5315_v16  ;;  %v959_v47 = vmul.f32 0.00390625, %v780_v54  ;;  %1286 = vadd.xlane.f32.xlu0 %v1285_v38  ;;  %v1155_v21 = vmul.f32 %v5312_v40, %v5312_v40  ;;  %v1156_v56 = vmul.f32 %v5315_v16, %v5315_v16  ;;  %v2245_v54 = vld [vmem:[%s7591_s3 + $0x140] sm:$0xff]  ;;  %2335 = vmatprep.subr.mxu1 %v2246_v32 }
 0x174   :  { %2336 = vmatpush2.msra.mxu1 %v2245_v54 }
 0x175   :  { %v5340_v29 = vsub.f32 %v4730_v59, %v959_v47  ;;  %v5343_v61 = vsub.f32 %v4733_v60, %v959_v47  ;;  %884 = vadd.xlane.f32.xlu1 %v883_v34  ;;  %v1288_v38 = vadd.f32 %v1156_v56, %v1155_v21  ;;  %v886_v59 = vadd.f32 %v5329_v53, %v5325_v42 }
 0x176   :  { %v783_v40 = vpop.xlane.xlu1 %782  ;;  %v5359_v60 = vadd.f32 %v4929_v11, %v4663_v18 }
 0x177   :  { %7817 = vst [vmem:[#allocation62_spill] sm:$0xff] %v5340_v29  ;;  %7818 = vst [vmem:[#allocation63_spill] sm:$0xff] %v5343_v61  ;;  %v960_v47 = vmul.f32 0.00390625, %v783_v40  ;;  %1289 = vadd.xlane.f32.xlu0 %v1288_v38  ;;  %v1157_v34 = vmul.f32 %v5340_v29, %v5340_v29  ;;  %v1158_v21 = vmul.f32 %v5343_v61, %v5343_v61 }
 0x178   :  { %v5375_v40 = vadd.f32 %v4945_v13, %v4660_v17  ;;  %v5379_v38 = vadd.f32 %v4961_v63, %v4663_v18  ;;  %v2244_v13 = vld [vmem:[%s7591_s3 + $0x138] sm:$0xff]  ;;  %v2243_v63 = vld [vmem:[%s7591_s3 + $0x130] sm:$0xff] }
 0x179   :  { %v5368_v56 = vsub.f32 %v4740_v1, %v960_v47  ;;  %v5371_v32 = vsub.f32 %v4743_v2, %v960_v47  ;;  %887 = vadd.xlane.f32.xlu1 %v886_v59  ;;  %v1291_v11 = vadd.f32 %v1158_v21, %v1157_v34  ;;  %v889_v1 = vadd.f32 %v5359_v60, %v5353_v23  ;;  %v5393_v47 = vpop.f32.mrf.mxu1 }
 0x17a   :  { %v786_v29 = vpop.xlane.xlu0 %785  ;;  %2337 = vmatprep.subr.mxu1 %v2244_v13  ;;  %v5409_v13 = vadd.f32 %v4993_v39, %v4663_v18 }
 0x17b   :  { %7819 = vst [vmem:[#allocation64_spill] sm:$0xff] %v5368_v56  ;;  %7820 = vst [vmem:[#allocation65_spill] sm:$0xff] %v5371_v32  ;;  %v961_v54 = vmul.f32 0.00390625, %v786_v29  ;;  %1292 = vadd.xlane.f32.xlu0 %v1291_v11  ;;  %v1159_v2 = vmul.f32 %v5368_v56, %v5368_v56  ;;  %v1160_v59 = vmul.f32 %v5371_v32, %v5371_v32  ;;  %2338 = vmatpush2.msra.mxu1 %v2243_v63 }
 0x17c   :  { %v5403_v11 = vadd.f32 %v4977_v10, %v4660_v17  ;;  %v892_v32 = vadd.f32 %v5379_v38, %v5375_v40  ;;  %v2242_v10 = vld [vmem:[%s7591_s3 + $0x128] sm:$0xff]  ;;  %v5431_v63 = vadd.f32 %v5009_v12, %v4660_v17  ;;  %v2240_v12 = vld [vmem:[%s7591_s3 + $0x118] sm:$0xff] }
 0x17d   :  { %v5396_v29 = vsub.f32 %v4750_v8, %v961_v54  ;;  %v5399_v34 = vsub.f32 %v4753_v9, %v961_v54  ;;  %890 = vadd.xlane.f32.xlu1 %v889_v1  ;;  %v1294_v21 = vadd.f32 %v1160_v59, %v1159_v2  ;;  %v2241_v1 = vld [vmem:[%s7591_s3 + $0x120] sm:$0xff]  ;;  %v5421_v2 = vpop.f32.mrf.mxu1  ;;  %2339 = vmatprep.subr.mxu1 %v2242_v10 }
 0x17e   :  { %v789_v56 = vpop.xlane.xlu1 %788  ;;  %2340 = vmatpush2.msra.mxu1 %v2241_v1  ;;  %v7828_v1 = vld [vmem:[#allocation41_spill] sm:$0xff] }
 0x17f   :  { %7821 = vst [vmem:[#allocation66_spill] sm:$0xff] %v5396_v29  ;;  %7822 = vst [vmem:[#allocation67_spill] sm:$0xff] %v5399_v34  ;;  %v962_v8 = vmul.f32 0.00390625, %v789_v56  ;;  %1295 = vadd.xlane.f32.xlu0 %v1294_v21  ;;  %v1161_v9 = vmul.f32 %v5396_v29, %v5396_v29  ;;  %v1162_v54 = vmul.f32 %v5399_v34, %v5399_v34  ;;  %2341 = vmatprep.subr.mxu1 %v2240_v12  ;;  %v2238_v12 = vld [vmem:[%s7591_s3 + $0x108] sm:$0xff] }
 0x180   :  { %v5435_v21 = vadd.f32 %v5025_v37, %v4663_v18  ;;  %v2239_v37 = vld [vmem:[%s7591_s3 + $0x110] sm:$0xff] }
 0x181   :  { %v5424_v39 = vsub.f32 %v4760_v19, %v962_v8  ;;  %v5427_v56 = vsub.f32 %v4763_v20, %v962_v8  ;;  %893 = vadd.xlane.f32.xlu1 %v892_v32  ;;  %v1297_v59 = vadd.f32 %v1162_v54, %v1161_v9  ;;  %v895_v19 = vadd.f32 %v5409_v13, %v5403_v11  ;;  %v5449_v8 = vpop.f32.mrf.mxu1  ;;  %v7826_v9 = vld [vmem:[#allocation4_spill] sm:$0xff] }
 0x182   :  { %v792_v29 = vpop.xlane.xlu0 %791  ;;  %2342 = vmatpush2.msra.mxu1 %v2239_v37 }
 0x183   :  { %7823 = vst [vmem:[#allocation68_spill] sm:$0xff] %v5424_v39  ;;  %7824 = vst [vmem:[#allocation69_spill] sm:$0xff] %v5427_v56  ;;  %v963_v34 = vmul.f32 0.00390625, %v792_v29  ;;  %1298 = vadd.xlane.f32.xlu0 %v1297_v59  ;;  %v1163_v20 = vmul.f32 %v5424_v39, %v5424_v39  ;;  %v1164_v32 = vmul.f32 %v5427_v56, %v5427_v56  ;;  %2343 = vmatprep.subr.mxu1 %v2238_v12  ;;  %v5477_v37 = vpop.f32.mrf.mxu1 }
 0x184   :  { %v5459_v59 = vadd.f32 %v7828_v1, %v4660_v17  ;;  %v898_v56 = vadd.f32 %v5435_v21, %v5431_v63  ;;  %v5491_v12 = vadd.f32 %v5097_v5, %v4663_v18 }
 0x185   :  { %v5452_v29 = vsub.f32 %v4770_v31, %v963_v34  ;;  %v5455_v54 = vsub.f32 %v7826_v9, %v963_v34  ;;  %896 = vadd.xlane.f32.xlu1 %v895_v19  ;;  %v1300_v10 = vadd.f32 %v1164_v32, %v1163_v20  ;;  %v7829_v31 = vld [vmem:[#allocation44_spill] sm:$0xff]  ;;  %v2237_v32 = vld [vmem:[%s7591_s3 + $0x100] sm:$0xff]  ;;  %v7831_v9 = vld [vmem:[#allocation5_spill] sm:$0xff] }
 0x186   :  { %v795_v39 = vpop.xlane.xlu1 %794  ;;  %v5468_v61 = vadd.f32 %v7829_v31, %v4663_v18  ;;  %2344 = vmatpush2.msra.mxu1 %v2237_v32  ;;  %v7833_v31 = vld [vmem:[#allocation6_spill] sm:$0xff] }
 0x187   :  { %7825 = vst [vmem:[#allocation70_spill] sm:$0xff] %v5452_v29  ;;  %7827 = vst [vmem:[#allocation4_spill] sm:$0xff] %v5455_v54  ;;  %v964_v34 = vmul.f32 0.00390625, %v795_v39  ;;  %1301 = vadd.xlane.f32.xlu0 %v1300_v10  ;;  %v1165_v19 = vmul.f32 %v5452_v29, %v5452_v29  ;;  %v1166_v20 = vmul.f32 %v5455_v54, %v5455_v54 }
 0x188   :  { %7830 = vst [vmem:[#allocation41_spill] sm:$0xff] %v5468_v61  ;;  %v5487_v29 = vadd.f32 %v5073_v26, %v4660_v17  ;;  %7835 = vst [vmem:[#allocation6_spill] sm:$0xff] %v5491_v12  ;;  %v901_v32 = vadd.f32 %v5468_v61, %v5459_v59  ;;  %v7836_v26 = vld [vmem:[#allocation7_spill] sm:$0xff] }
 0x189   :  { %v5480_v1 = vsub.f32 %v7831_v9, %v964_v34  ;;  %v5483_v39 = vsub.f32 %v7833_v31, %v964_v34  ;;  %899 = vadd.xlane.f32.xlu1 %v898_v56  ;;  %v1303_v10 = vadd.f32 %v1166_v20, %v1165_v19  ;;  %v5499_v19 = vpop.f32.mrf.mxu1  ;;  %v7838_v9 = vld [vmem:[#allocation8_spill] sm:$0xff]  ;;  %v5509_v31 = vadd.f32 %v5115_v44, %v4660_v17  ;;  %v7841_v44 = vld [vmem:[#allocation9_spill] sm:$0xff] }
 0x18a   :  { %v798_v54 = vpop.xlane.xlu0 %797 }
 0x18b   :  { %7832 = vst [vmem:[#allocation44_spill] sm:$0xff] %v5480_v1  ;;  %7834 = vst [vmem:[#allocation5_spill] sm:$0xff] %v5483_v39  ;;  %v965_v16 = vmul.f32 0.00390625, %v798_v54  ;;  %1304 = vadd.xlane.f32.xlu0 %v1303_v10  ;;  %v1167_v34 = vmul.f32 %v5480_v1, %v5480_v1  ;;  %v1168_v56 = vmul.f32 %v5483_v39, %v5483_v39 }
 0x18c   :  { %v904_v1 = vadd.f32 %v5491_v12, %v5487_v29  ;;  %v5515_v39 = vadd.f32 %v5133_v51, %v4663_v18  ;;  %v5531_v51 = vadd.f32 %v5151_v25, %v4660_v17  ;;  %v7846_v25 = vld [vmem:[#allocation11_spill] sm:$0xff] }
 0x18d   :  { %v5502_v20 = vsub.f32 %v7836_v26, %v965_v16  ;;  %v5505_v5 = vsub.f32 %v7838_v9, %v965_v16  ;;  %902 = vadd.xlane.f32.xlu1 %v901_v32  ;;  %v1306_v54 = vadd.f32 %v1168_v56, %v1167_v34  ;;  %v5521_v34 = vpop.f32.mrf.mxu1  ;;  %v7843_v26 = vld [vmem:[#allocation10_spill] sm:$0xff] }
 0x18e   :  { %v801_v10 = vpop.xlane.xlu1 %800  ;;  %7840 = vst [vmem:[#allocation71_spill] sm:$0xff] %v5515_v39 }
 0x18f   :  { %7837 = vst [vmem:[#allocation7_spill] sm:$0xff] %v5502_v20  ;;  %7839 = vst [vmem:[#allocation8_spill] sm:$0xff] %v5505_v5  ;;  %v966_v61 = vmul.f32 0.00390625, %v801_v10  ;;  %1307 = vadd.xlane.f32.xlu0 %v1306_v54  ;;  %v1169_v16 = vmul.f32 %v5502_v20, %v5502_v20  ;;  %v1170_v32 = vmul.f32 %v5505_v5, %v5505_v5 }
 0x190   :  { %v5535_v54 = vadd.f32 %v5169_v36, %v4663_v18 }
 0x191   :  { %v5524_v56 = vsub.f32 %v7841_v44, %v966_v61  ;;  %v5527_v9 = vsub.f32 %v7843_v26, %v966_v61  ;;  %905 = vadd.xlane.f32.xlu1 %v904_v1  ;;  %v1309_v12 = vadd.f32 %v1170_v32, %v1169_v16  ;;  %v907_v44 = vadd.f32 %v5515_v39, %v5509_v31  ;;  %v5543_v16 = vpop.f32.mrf.mxu1  ;;  %v7848_v26 = vld [vmem:[#allocation12_spill] sm:$0xff] }
 0x192   :  { %7845 = vst [vmem:[#allocation72_spill] sm:$0xff] %v5535_v54  ;;  %v804_v10 = vpop.xlane.xlu0 %803 }
 0x193   :  { %7842 = vst [vmem:[#allocation9_spill] sm:$0xff] %v5524_v56  ;;  %7844 = vst [vmem:[#allocation10_spill] sm:$0xff] %v5527_v9  ;;  %v967_v20 = vmul.f32 0.00390625, %v804_v10  ;;  %1310 = vadd.xlane.f32.xlu0 %v1309_v12  ;;  %v1171_v61 = vmul.f32 %v5524_v56, %v5524_v56  ;;  %v1172_v1 = vmul.f32 %v5527_v9, %v5527_v9 }
 0x194   :  { %v5553_v12 = vadd.f32 %v5197_v45, %v4660_v17  ;;  %v910_v56 = vadd.f32 %v5535_v54, %v5531_v51  ;;  %v5559_v9 = vadd.f32 %v5225_v43, %v4663_v18  ;;  %v7851_v45 = vld [vmem:[#allocation13_spill] sm:$0xff]  ;;  %v5575_v43 = vadd.f32 %v5253_v4, %v4660_v17  ;;  %v7856_v4 = vld [vmem:[#allocation15_spill] sm:$0xff] }
 0x195   :  { %v5546_v32 = vsub.f32 %v7846_v25, %v967_v20  ;;  %v5549_v36 = vsub.f32 %v7848_v26, %v967_v20  ;;  %908 = vadd.xlane.f32.xlu1 %v907_v44  ;;  %v1312_v10 = vadd.f32 %v1172_v1, %v1171_v61  ;;  %v5565_v61 = vpop.f32.mrf.mxu1  ;;  %v7853_v25 = vld [vmem:[#allocation14_spill] sm:$0xff] }
 0x196   :  { %v807_v5 = vpop.xlane.xlu1 %806  ;;  %7850 = vst [vmem:[#allocation73_spill] sm:$0xff] %v5559_v9 }
 0x197   :  { %7847 = vst [vmem:[#allocation11_spill] sm:$0xff] %v5546_v32  ;;  %7849 = vst [vmem:[#allocation12_spill] sm:$0xff] %v5549_v36  ;;  %v968_v39 = vmul.f32 0.00390625, %v807_v5  ;;  %1313 = vadd.xlane.f32.xlu0 %v1312_v10  ;;  %v1173_v20 = vmul.f32 %v5546_v32, %v5546_v32  ;;  %v1174_v44 = vmul.f32 %v5549_v36, %v5549_v36 }
 0x198   :  { %v5579_v5 = vadd.f32 %v5281_v49, %v4663_v18 }
 0x199   :  { %v5568_v1 = vsub.f32 %v7851_v45, %v968_v39  ;;  %v5571_v26 = vsub.f32 %v7853_v25, %v968_v39  ;;  %911 = vadd.xlane.f32.xlu1 %v910_v56  ;;  %v1315_v54 = vadd.f32 %v1174_v44, %v1173_v20  ;;  %v913_v45 = vadd.f32 %v5559_v9, %v5553_v12  ;;  %v5587_v20 = vpop.f32.mrf.mxu1  ;;  %v7858_v25 = vld [vmem:[#allocation16_spill] sm:$0xff] }
 0x19a   :  { %7855 = vst [vmem:[#allocation74_spill] sm:$0xff] %v5579_v5  ;;  %v810_v10 = vpop.xlane.xlu0 %809 }
 0x19b   :  { %7852 = vst [vmem:[#allocation13_spill] sm:$0xff] %v5568_v1  ;;  %7854 = vst [vmem:[#allocation14_spill] sm:$0xff] %v5571_v26  ;;  %v969_v32 = vmul.f32 0.00390625, %v810_v10  ;;  %1316 = vadd.xlane.f32.xlu0 %v1315_v54  ;;  %v1175_v39 = vmul.f32 %v5568_v1, %v5568_v1  ;;  %v1176_v56 = vmul.f32 %v5571_v26, %v5571_v26 }
 0x19c   :  { %v5597_v54 = vadd.f32 %v5309_v3, %v4660_v17  ;;  %v916_v1 = vadd.f32 %v5579_v5, %v5575_v43  ;;  %v5603_v26 = vadd.f32 %v5337_v14, %v4663_v18  ;;  %v7861_v3 = vld [vmem:[#allocation17_spill] sm:$0xff]  ;;  %v5619_v14 = vadd.f32 %v5365_v62, %v4660_v17 }
 0x19d   :  { %v5590_v44 = vsub.f32 %v7856_v4, %v969_v32  ;;  %v5593_v49 = vsub.f32 %v7858_v25, %v969_v32  ;;  %914 = vadd.xlane.f32.xlu1 %v913_v45  ;;  %v1318_v10 = vadd.f32 %v1176_v56, %v1175_v39  ;;  %v5609_v39 = vpop.f32.mrf.mxu1  ;;  %v7863_v4 = vld [vmem:[#allocation18_spill] sm:$0xff] }
 0x19e   :  { %v813_v36 = vpop.xlane.xlu1 %812  ;;  %7860 = vst [vmem:[#allocation75_spill] sm:$0xff] %v5603_v26 }
 0x19f   :  { %7857 = vst [vmem:[#allocation15_spill] sm:$0xff] %v5590_v44  ;;  %7859 = vst [vmem:[#allocation16_spill] sm:$0xff] %v5593_v49  ;;  %v970_v9 = vmul.f32 0.00390625, %v813_v36  ;;  %1319 = vadd.xlane.f32.xlu0 %v1318_v10  ;;  %v1177_v32 = vmul.f32 %v5590_v44, %v5590_v44  ;;  %v1178_v45 = vmul.f32 %v5593_v49, %v5593_v49 }
 0x1a0   :  { %v5623_v36 = vadd.f32 %v5393_v47, %v4663_v18 }
 0x1a1   :  { %v5612_v56 = vsub.f32 %v7861_v3, %v970_v9  ;;  %v5615_v25 = vsub.f32 %v7863_v4, %v970_v9  ;;  %917 = vadd.xlane.f32.xlu1 %v916_v1  ;;  %v1321_v5 = vadd.f32 %v1178_v45, %v1177_v32  ;;  %v919_v3 = vadd.f32 %v5603_v26, %v5597_v54  ;;  %v733_v32 = vpop.f32.mrf.mxu1  ;;  %v7866_v45 = vld [vmem:[#allocation19_spill] sm:$0xff]  ;;  %v7868_v4 = vld [vmem:[#allocation20_spill] sm:$0xff] }
 0x1a2   :  { %7865 = vst [vmem:[#allocation76_spill] sm:$0xff] %v5623_v36  ;;  %v816_v10 = vpop.xlane.xlu0 %815 }
 0x1a3   :  { %7862 = vst [vmem:[#allocation17_spill] sm:$0xff] %v5612_v56  ;;  %7864 = vst [vmem:[#allocation18_spill] sm:$0xff] %v5615_v25  ;;  %v971_v44 = vmul.f32 0.00390625, %v816_v10  ;;  %1322 = vadd.xlane.f32.xlu0 %v1321_v5  ;;  %v1179_v9 = vmul.f32 %v5612_v56, %v5612_v56  ;;  %v1180_v1 = vmul.f32 %v5615_v25, %v5615_v25 }
 0x1a4   :  { %v5639_v5 = vadd.f32 %v5421_v2, %v4660_v17  ;;  %v922_v56 = vadd.f32 %v5623_v36, %v5619_v14  ;;  %v5645_v25 = vadd.f32 %v5449_v8, %v4663_v18  ;;  %v5659_v8 = vadd.f32 %v5477_v37, %v4660_v17 }
 0x1a5   :  { %v5632_v62 = vsub.f32 %v7866_v45, %v971_v44  ;;  %v5635_v49 = vsub.f32 %v7868_v4, %v971_v44  ;;  %920 = vadd.xlane.f32.xlu1 %v919_v3  ;;  %v1324_v47 = vadd.f32 %v1180_v1, %v1179_v9  ;;  %v737_v9 = vpop.f32.mrf.mxu1  ;;  %v7871_v1 = vld [vmem:[#allocation21_spill] sm:$0xff]  ;;  %v7873_v45 = vld [vmem:[#allocation22_spill] sm:$0xff] }
 0x1a6   :  { %v819_v10 = vpop.xlane.xlu1 %818  ;;  %7870 = vst [vmem:[#allocation77_spill] sm:$0xff] %v5645_v25 }
 0x1a7   :  { %7867 = vst [vmem:[#allocation19_spill] sm:$0xff] %v5632_v62  ;;  %7869 = vst [vmem:[#allocation20_spill] sm:$0xff] %v5635_v49  ;;  %v972_v26 = vmul.f32 0.00390625, %v819_v10  ;;  %1325 = vadd.xlane.f32.xlu0 %v1324_v47  ;;  %v1181_v44 = vmul.f32 %v5632_v62, %v5632_v62  ;;  %v1182_v3 = vmul.f32 %v5635_v49, %v5635_v49 }
 0x1a8   :  { %v5663_v47 = vadd.f32 %v5499_v19, %v4663_v18 }
 0x1a9   :  { %v5652_v2 = vsub.f32 %v7871_v1, %v972_v26  ;;  %v5655_v4 = vsub.f32 %v7873_v45, %v972_v26  ;;  %923 = vadd.xlane.f32.xlu1 %v922_v56  ;;  %v1327_v36 = vadd.f32 %v1182_v3, %v1181_v44  ;;  %v925_v1 = vadd.f32 %v5645_v25, %v5639_v5  ;;  %v739_v44 = vpop.f32.mrf.mxu1  ;;  %v7876_v3 = vld [vmem:[#allocation23_spill] sm:$0xff]  ;;  %v7878_v45 = vld [vmem:[#allocation24_spill] sm:$0xff] }
 0x1aa   :  { %7875 = vst [vmem:[#allocation78_spill] sm:$0xff] %v5663_v47  ;;  %v822_v10 = vpop.xlane.xlu1 %821 }
 0x1ab   :  { %7872 = vst [vmem:[#allocation21_spill] sm:$0xff] %v5652_v2  ;;  %7874 = vst [vmem:[#allocation22_spill] sm:$0xff] %v5655_v4  ;;  %v973_v62 = vmul.f32 0.00390625, %v822_v10  ;;  %1328 = vadd.xlane.f32.xlu0 %v1327_v36  ;;  %v1183_v26 = vmul.f32 %v5652_v2, %v5652_v2  ;;  %v1184_v56 = vmul.f32 %v5655_v4, %v5655_v4 }
 0x1ac   :  { %v5679_v36 = vadd.f32 %v5521_v34, %v4660_v17  ;;  %v928_v2 = vadd.f32 %v5663_v47, %v5659_v8  ;;  %v5685_v4 = vadd.f32 %v5543_v16, %v4663_v18  ;;  %v5699_v16 = vadd.f32 %v5565_v61, %v4660_v17 }
 0x1ad   :  { %v5672_v37 = vsub.f32 %v7876_v3, %v973_v62  ;;  %v5675_v49 = vsub.f32 %v7878_v45, %v973_v62  ;;  %926 = vadd.xlane.f32.xlu1 %v925_v1  ;;  %v1330_v19 = vadd.f32 %v1184_v56, %v1183_v26  ;;  %v743_v26 = vpop.f32.mrf.mxu1  ;;  %v7881_v56 = vld [vmem:[#allocation25_spill] sm:$0xff]  ;;  %v7883_v3 = vld [vmem:[#allocation26_spill] sm:$0xff] }
 0x1ae   :  { %v825_v10 = vpop.xlane.xlu1 %824  ;;  %7880 = vst [vmem:[#allocation79_spill] sm:$0xff] %v5685_v4 }
 0x1af   :  { %7877 = vst [vmem:[#allocation23_spill] sm:$0xff] %v5672_v37  ;;  %7879 = vst [vmem:[#allocation24_spill] sm:$0xff] %v5675_v49  ;;  %v974_v25 = vmul.f32 0.00390625, %v825_v10  ;;  %1331 = vadd.xlane.f32.xlu0 %v1330_v19  ;;  %v1185_v62 = vmul.f32 %v5672_v37, %v5672_v37  ;;  %v1186_v1 = vmul.f32 %v5675_v49, %v5675_v49 }
 0x1b0   :  { %v5703_v19 = vadd.f32 %v5587_v20, %v4663_v18 }
 0x1b1   :  { %v5692_v34 = vsub.f32 %v7881_v56, %v974_v25  ;;  %v5695_v45 = vsub.f32 %v7883_v3, %v974_v25  ;;  %929 = vadd.xlane.f32.xlu1 %v928_v2  ;;  %v1333_v47 = vadd.f32 %v1186_v1, %v1185_v62  ;;  %v931_v56 = vadd.f32 %v5685_v4, %v5679_v36  ;;  %v745_v62 = vpop.f32.mrf.mxu1  ;;  %v7886_v1 = vld [vmem:[#allocation27_spill] sm:$0xff]  ;;  %v7888_v3 = vld [vmem:[#allocation28_spill] sm:$0xff] }
 0x1b2   :  { %7885 = vst [vmem:[#allocation80_spill] sm:$0xff] %v5703_v19  ;;  %v828_v10 = vpop.xlane.xlu1 %827  ;;  %v5724_v4 = vadd.f32 %v733_v32, %v4663_v18  ;;  %v5737_v32 = vadd.f32 %v737_v9, %v4660_v17  ;;  %v7898_v9 = vld [vmem:[#allocation32_spill] sm:$0xff] }
 0x1b3   :  { %7882 = vst [vmem:[#allocation25_spill] sm:$0xff] %v5692_v34  ;;  %7884 = vst [vmem:[#allocation26_spill] sm:$0xff] %v5695_v45  ;;  %v975_v37 = vmul.f32 0.00390625, %v828_v10  ;;  %1334 = vadd.xlane.f32.xlu0 %v1333_v47  ;;  %v1187_v25 = vmul.f32 %v5692_v34, %v5692_v34  ;;  %v1188_v2 = vmul.f32 %v5695_v45, %v5695_v45 }
 0x1b4   :  { %v5719_v47 = vadd.f32 %v5609_v39, %v4660_v17  ;;  %v934_v34 = vadd.f32 %v5703_v19, %v5699_v16  ;;  %7890 = vst [vmem:[#allocation81_spill] sm:$0xff] %v5724_v4  ;;  %v7893_v39 = vld [vmem:[#allocation30_spill] sm:$0xff] }
 0x1b5   :  { %v5712_v61 = vsub.f32 %v7886_v1, %v975_v37  ;;  %v5715_v49 = vsub.f32 %v7888_v3, %v975_v37  ;;  %932 = vadd.xlane.f32.xlu1 %v931_v56  ;;  %v1336_v20 = vadd.f32 %v1188_v2, %v1187_v25  ;;  %v749_v56 = vpop.f32.mrf.mxu1  ;;  %v7891_v25 = vld [vmem:[#allocation29_spill] sm:$0xff] }
 0x1b6   :  { %v831_v10 = vpop.xlane.xlu1 %830 }
 0x1b7   :  { %7887 = vst [vmem:[#allocation27_spill] sm:$0xff] %v5712_v61  ;;  %7889 = vst [vmem:[#allocation28_spill] sm:$0xff] %v5715_v49  ;;  %v976_v45 = vmul.f32 0.00390625, %v831_v10  ;;  %1337 = vadd.xlane.f32.xlu0 %v1336_v20  ;;  %v1189_v1 = vmul.f32 %v5712_v61, %v5712_v61  ;;  %v1190_v37 = vmul.f32 %v5715_v49, %v5715_v49 }
 0x1b8   :  { %v5740_v20 = vadd.f32 %v739_v44, %v4663_v18  ;;  %v937_v61 = vadd.f32 %v5724_v4, %v5719_v47 }
 0x1b9   :  { %v5731_v2 = vsub.f32 %v7891_v25, %v976_v45  ;;  %v5734_v3 = vsub.f32 %v7893_v39, %v976_v45  ;;  %935 = vadd.xlane.f32.xlu1 %v934_v34  ;;  %v1339_v19 = vadd.f32 %v1190_v37, %v1189_v1  ;;  %v751_v34 = vpop.f32.mrf.mxu1  ;;  %v7896_v1 = vld [vmem:[#allocation31_spill] sm:$0xff] }
 0x1ba   :  { %7895 = vst [vmem:[#allocation82_spill] sm:$0xff] %v5740_v20  ;;  %v834_v10 = vpop.xlane.xlu1 %833  ;;  %v940_v4 = vadd.f32 %v5740_v20, %v5737_v32 }
 0x1bb   :  { %7892 = vst [vmem:[#allocation29_spill] sm:$0xff] %v5731_v2  ;;  %7894 = vst [vmem:[#allocation30_spill] sm:$0xff] %v5734_v3  ;;  %v977_v49 = vmul.f32 0.00390625, %v834_v10  ;;  %1340 = vadd.xlane.f32.xlu0 %v1339_v19  ;;  %v1191_v25 = vmul.f32 %v5731_v2, %v5731_v2  ;;  %v1192_v45 = vmul.f32 %v5734_v3, %v5734_v3 }
 0x1bc   :  { %v5757_v19 = vadd.f32 %v743_v26, %v4660_v17  ;;  %v5760_v2 = vadd.f32 %v745_v62, %v4663_v18  ;;  %v5773_v62 = vadd.f32 %v749_v56, %v4660_v17  ;;  %v7907_v56 = vld [vmem:[#allocation36_spill] sm:$0xff] }
 0x1bd   :  { %v5749_v37 = vsub.f32 %v7896_v1, %v977_v49  ;;  %v5752_v39 = vsub.f32 %v7898_v9, %v977_v49  ;;  %938 = vadd.xlane.f32.xlu1 %v937_v61  ;;  %v1342_v44 = vadd.f32 %v1192_v45, %v1191_v25  ;;  %v755_v61 = vpop.f32.mrf.mxu1  ;;  %v7901_v25 = vld [vmem:[#allocation33_spill] sm:$0xff]  ;;  %v7903_v9 = vld [vmem:[#allocation34_spill] sm:$0xff] }
 0x1be   :  { %v837_v10 = vpop.xlane.xlu1 %836  ;;  %7900 = vst [vmem:[#allocation83_spill] sm:$0xff] %v5760_v2 }
 0x1bf   :  { %7897 = vst [vmem:[#allocation31_spill] sm:$0xff] %v5749_v37  ;;  %7899 = vst [vmem:[#allocation32_spill] sm:$0xff] %v5752_v39  ;;  %v978_v3 = vmul.f32 0.00390625, %v837_v10  ;;  %1343 = vadd.xlane.f32.xlu0 %v1342_v44  ;;  %v1193_v1 = vmul.f32 %v5749_v37, %v5749_v37  ;;  %v1194_v49 = vmul.f32 %v5752_v39, %v5752_v39 }
 0x1c0   :  { %v5776_v44 = vadd.f32 %v751_v34, %v4663_v18  ;;  %v943_v37 = vadd.f32 %v5760_v2, %v5757_v19 }
 0x1c1   :  { %v5767_v45 = vsub.f32 %v7901_v25, %v978_v3  ;;  %v5770_v20 = vsub.f32 %v7903_v9, %v978_v3  ;;  %941 = vadd.xlane.f32.xlu1 %v940_v4  ;;  %v1345_v26 = vadd.f32 %v1194_v49, %v1193_v1  ;;  %v757_v4 = vpop.f32.mrf.mxu1  ;;  %v7905_v1 = vld [vmem:[#allocation35_spill] sm:$0xff] }
 0x1c2   :  { %v840_v10 = vpop.xlane.xlu1 %839  ;;  %v946_v2 = vadd.f32 %v5776_v44, %v5773_v62 }
 0x1c3   :  { %7902 = vst [vmem:[#allocation33_spill] sm:$0xff] %v5767_v45  ;;  %7904 = vst [vmem:[#allocation34_spill] sm:$0xff] %v5770_v20  ;;  %v979_v39 = vmul.f32 0.00390625, %v840_v10  ;;  %1346 = vadd.xlane.f32.xlu0 %v1345_v26  ;;  %v1195_v25 = vmul.f32 %v5767_v45, %v5767_v45  ;;  %v1196_v3 = vmul.f32 %v5770_v20, %v5770_v20 }
 0x1c4   :  { %v5793_v26 = vadd.f32 %v755_v61, %v4660_v17  ;;  %v5796_v45 = vadd.f32 %v757_v4, %v4663_v18 }
 0x1c5   :  { %v5785_v49 = vsub.f32 %v7905_v1, %v979_v39  ;;  %v5788_v9 = vsub.f32 %v7907_v56, %v979_v39  ;;  %944 = vadd.xlane.f32.xlu1 %v943_v37  ;;  %v1348_v34 = vadd.f32 %v1196_v3, %v1195_v25  ;;  %v7910_v37 = vld [vmem:[#allocation37_spill] sm:$0xff]  ;;  %v7912_v3 = vld [vmem:[#allocation38_spill] sm:$0xff] }
 0x1c6   :  { %v843_v10 = vpop.xlane.xlu1 %842  ;;  %7909 = vst [vmem:[#allocation84_spill] sm:$0xff] %v5796_v45  ;;  %v949_v18 = vadd.f32 %v5796_v45, %v5793_v26 }
 0x1c7   :  { %7906 = vst [vmem:[#allocation35_spill] sm:$0xff] %v5785_v49  ;;  %7908 = vst [vmem:[#allocation36_spill] sm:$0xff] %v5788_v9  ;;  %v980_v20 = vmul.f32 0.00390625, %v843_v10  ;;  %1349 = vadd.xlane.f32.xlu0 %v1348_v34  ;;  %v1197_v1 = vmul.f32 %v5785_v49, %v5785_v49  ;;  %v1198_v39 = vmul.f32 %v5788_v9, %v5788_v9  ;;  %v7914_v49 = vld [vmem:[#allocation39_spill] sm:$0xff]  ;;  %v7916_v9 = vld [vmem:[#allocation40_spill] sm:$0xff] }
 0x1c9   :  { %v5803_v25 = vsub.f32 %v7910_v37, %v980_v20  ;;  %v5806_v56 = vsub.f32 %v7912_v3, %v980_v20  ;;  %947 = vadd.xlane.f32.xlu1 %v946_v2  ;;  %v1351_v17 = vadd.f32 %v1198_v39, %v1197_v1 }
 0x1ca   :  { %v846_v61 = vpop.xlane.xlu1 %845 }
 0x1cb   :  { %7911 = vst [vmem:[#allocation37_spill] sm:$0xff] %v5803_v25  ;;  %7913 = vst [vmem:[#allocation38_spill] sm:$0xff] %v5806_v56  ;;  %v981_v4 = vmul.f32 0.00390625, %v846_v61  ;;  %1352 = vadd.xlane.f32.xlu0 %v1351_v17  ;;  %v1199_v34 = vmul.f32 %v5803_v25, %v5803_v25  ;;  %v1200_v10 = vmul.f32 %v5806_v56, %v5806_v56  ;;  %v7917_v61 = vld [vmem:[#allocation42_spill] sm:$0xff]  ;;  %v7919_v56 = vld [vmem:[#allocation43_spill] sm:$0xff] }
 0x1cd   :  { %v5815_v37 = vsub.f32 %v7914_v49, %v981_v4  ;;  %v5818_v20 = vsub.f32 %v7916_v9, %v981_v4  ;;  %950 = vadd.xlane.f32.xlu1 %v949_v18  ;;  %v1354_v2 = vadd.f32 %v1200_v10, %v1199_v34 }
 0x1ce   :  { %v849_v1 = vpop.xlane.xlu1 %848 }
 0x1cf   :  { %7915 = vst [vmem:[#allocation39_spill] sm:$0xff] %v5815_v37  ;;  %v982_v39 = vmul.f32 0.00390625, %v849_v1  ;;  %1355 = vadd.xlane.f32.xlu0 %v1354_v2  ;;  %v1201_v3 = vmul.f32 %v5815_v37, %v5815_v37  ;;  %v1202_v17 = vmul.f32 %v5818_v20, %v5818_v20  ;;  %v7921_v2 = vld [vmem:[#allocation45_spill] sm:$0xff] }
 0x1d1   :  { %v5825_v25 = vsub.f32 %v7917_v61, %v982_v39  ;;  %v5828_v49 = vsub.f32 %v7919_v56, %v982_v39  ;;  %v1357_v45 = vadd.f32 %v1202_v17, %v1201_v3  ;;  %v7922_v17 = vld [vmem:[#allocation46_spill] sm:$0xff] }
 0x1d2   :  { %v852_v9 = vpop.xlane.xlu1 %851 }
 0x1d3   :  { %7918 = vst [vmem:[#allocation40_spill] sm:$0xff] %v5825_v25  ;;  %v983_v4 = vmul.f32 0.00390625, %v852_v9  ;;  %1358 = vadd.xlane.f32.xlu0 %v1357_v45  ;;  %v1203_v18 = vmul.f32 %v5825_v25, %v5825_v25  ;;  %v1204_v34 = vmul.f32 %v5828_v49, %v5828_v49 }
 0x1d5   :  { %v5835_v10 = vsub.f32 %v5060_v24, %v983_v4  ;;  %v5838_v1 = vsub.f32 %v7921_v2, %v983_v4  ;;  %v1360_v61 = vadd.f32 %v1204_v34, %v1203_v18  ;;  %v7923_v34 = vld [vmem:[#allocation47_spill] sm:$0xff] }
 0x1d6   :  { %v855_v37 = vpop.xlane.xlu1 %854 }
 0x1d7   :  { %7920 = vst [vmem:[#allocation42_spill] sm:$0xff] %v5835_v10  ;;  %v984_v56 = vmul.f32 0.00390625, %v855_v37  ;;  %1361 = vadd.xlane.f32.xlu0 %v1360_v61  ;;  %v1205_v39 = vmul.f32 %v5835_v10, %v5835_v10  ;;  %v1206_v45 = vmul.f32 %v5838_v1, %v5838_v1  ;;  %v7925_v61 = vld [vmem:[#allocation48_spill] sm:$0xff] }
 0x1d9   :  { %v5845_v3 = vsub.f32 %v5076_v6, %v984_v56  ;;  %v5848_v9 = vsub.f32 %v7922_v17, %v984_v56  ;;  %v1363_v24 = vadd.f32 %v1206_v45, %v1205_v39  ;;  %v2873_v56 = vld [vmem:[%s7592_s5 + $0x78] sm:$0xff] }
 0x1da   :  { %v858_v25 = vpop.xlane.xlu1 %857  ;;  %2898 = vmatpush1.msra.mxu0 %v2873_v56  ;;  %v2872_v56 = vld [vmem:[%s7592_s5 + $0x70] sm:$0xff] }
 0x1db   :  { %v985_v4 = vmul.f32 0.00390625, %v858_v25  ;;  %1364 = vadd.xlane.f32.xlu0 %v1363_v24  ;;  %v1207_v37 = vmul.f32 %v5845_v3, %v5845_v3  ;;  %v1208_v18 = vmul.f32 %v5848_v9, %v5848_v9  ;;  %v7927_v24 = vmov 0.0  }
 0x1dc   :  { %2899 = vmatprep.subr.mxu0 %v7927_v24 }
 0x1dd   :  { %v5855_v2 = vsub.f32 %v7923_v34, %v985_v4  ;;  %v5858_v10 = vsub.f32 %v7925_v61, %v985_v4  ;;  %v1366_v6 = vadd.f32 %v1208_v18, %v1207_v37  ;;  %v7928_v34 = vld [vmem:[#allocation49_spill] sm:$0xff]  ;;  %v7930_v37 = vld [vmem:[#allocation50_spill] sm:$0xff]  ;;  %2900 = vmatpush1.msra.mxu0 %v2872_v56  ;;  %v2871_v56 = vld [vmem:[%s7592_s5 + $0x68] sm:$0xff] }
 0x1de   :  { %v861_v39 = vpop.xlane.xlu1 %860  ;;  %2901 = vmatprep.subr.mxu0 %v7927_v24 }
 0x1df   :  { %7924 = vst [vmem:[#allocation43_spill] sm:$0xff] %v5855_v2  ;;  %7926 = vst [vmem:[#allocation45_spill] sm:$0xff] %v5858_v10  ;;  %v986_v25 = vmul.f32 0.00390625, %v861_v39  ;;  %1367 = vadd.xlane.f32.xlu0 %v1366_v6  ;;  %v1209_v45 = vmul.f32 %v5855_v2, %v5855_v2  ;;  %v1210_v17 = vmul.f32 %v5858_v10, %v5858_v10  ;;  %2902 = vmatpush1.msra.mxu0 %v2871_v56 }
 0x1e0   :  { %2903 = vmatprep.subr.mxu0 %v7927_v24 }
 0x1e1   :  { %v5869_v4 = vsub.f32 %v7928_v34, %v986_v25  ;;  %v5872_v18 = vsub.f32 %v7930_v37, %v986_v25  ;;  %v1369_v61 = vadd.f32 %v1210_v17, %v1209_v45  ;;  %v7932_v34 = vld [vmem:[#allocation51_spill] sm:$0xff]  ;;  %v7934_v45 = vld [vmem:[#allocation52_spill] sm:$0xff] }
 0x1e2   :  { %v864_v6 = vpop.xlane.xlu1 %863 }
 0x1e3   :  { %7929 = vst [vmem:[#allocation46_spill] sm:$0xff] %v5869_v4  ;;  %7931 = vst [vmem:[#allocation47_spill] sm:$0xff] %v5872_v18  ;;  %v987_v39 = vmul.f32 0.00390625, %v864_v6  ;;  %1370 = vadd.xlane.f32.xlu0 %v1369_v61  ;;  %v1211_v2 = vmul.f32 %v5869_v4, %v5869_v4  ;;  %v1212_v10 = vmul.f32 %v5872_v18, %v5872_v18 }
 0x1e5   :  { %v5883_v25 = vsub.f32 %v7932_v34, %v987_v39  ;;  %v5886_v17 = vsub.f32 %v7934_v45, %v987_v39  ;;  %v1372_v37 = vadd.f32 %v1212_v10, %v1211_v2  ;;  %v7937_v10 = vld [vmem:[#allocation53_spill] sm:$0xff]  ;;  %v2870_v45 = vld [vmem:[%s7592_s5 + $0x60] sm:$0xff] }
 0x1e6   :  { %v867_v61 = vpop.xlane.xlu1 %866  ;;  %2904 = vmatpush1.msra.mxu0 %v2870_v45 }
 0x1e7   :  { %7933 = vst [vmem:[#allocation48_spill] sm:$0xff] %v5883_v25  ;;  %7935 = vst [vmem:[#allocation49_spill] sm:$0xff] %v5886_v17  ;;  %v988_v6 = vmul.f32 0.00390625, %v867_v61  ;;  %1373 = vadd.xlane.f32.xlu0 %v1372_v37  ;;  %v1213_v4 = vmul.f32 %v5883_v25, %v5883_v25  ;;  %v1214_v18 = vmul.f32 %v5886_v17, %v5886_v17  ;;  %2905 = vmatprep.subr.mxu0 %v7927_v24 }
 0x1e9   :  { %v5897_v39 = vsub.f32 %v5143_v46, %v988_v6  ;;  %v5900_v2 = vsub.f32 %v7937_v10, %v988_v6  ;;  %v1375_v34 = vadd.f32 %v1214_v18, %v1213_v4  ;;  %v7940_v4 = vld [vmem:[#allocation54_spill] sm:$0xff] }
 0x1ea   :  { %v870_v37 = vpop.xlane.xlu1 %869 }
 0x1eb   :  { %7936 = vst [vmem:[#allocation50_spill] sm:$0xff] %v5897_v39  ;;  %7938 = vst [vmem:[#allocation51_spill] sm:$0xff] %v5900_v2  ;;  %v989_v56 = vmul.f32 0.00390625, %v870_v37  ;;  %1376 = vadd.xlane.f32.xlu0 %v1375_v34  ;;  %v1215_v61 = vmul.f32 %v5897_v39, %v5897_v39  ;;  %v1216_v25 = vmul.f32 %v5900_v2, %v5900_v2  ;;  %v2869_v34 = vld [vmem:[%s7592_s5 + $0x58] sm:$0xff] }
 0x1ec   :  { %v1275_v46 = vpop.xlane.xlu0 %1274  ;;  %2906 = vmatpush1.msra.mxu0 %v2869_v34 }
 0x1ed   :  { %v5911_v6 = vsub.f32 %v5161_v57, %v989_v56  ;;  %v5914_v18 = vsub.f32 %v7940_v4, %v989_v56  ;;  %v1465_v10 = vmul.f32 0.00390625, %v1275_v46  ;;  %v1378_v17 = vadd.f32 %v1216_v25, %v1215_v61  ;;  %2907 = vmatprep.subr.mxu0 %v7927_v24 }
 0x1ee   :  { %v873_v45 = vpop.xlane.xlu1 %872 }
 0x1ef   :  { %7939 = vst [vmem:[#allocation52_spill] sm:$0xff] %v5911_v6  ;;  %7941 = vst [vmem:[#allocation53_spill] sm:$0xff] %v5914_v18  ;;  %v1529_v37 = vadd.f32 1e-05, %v1465_v10  ;;  %v990_v39 = vmul.f32 0.00390625, %v873_v45  ;;  %1379 = vadd.xlane.f32.xlu0 %v1378_v17  ;;  %v1217_v2 = vmul.f32 %v5911_v6, %v5911_v6  ;;  %v1218_v57 = vmul.f32 %v5914_v18, %v5914_v18  ;;  %v2868_v17 = vld [vmem:[%s7592_s5 + $0x50] sm:$0xff] }
 0x1f0   :  { %v1278_v56 = vpop.xlane.xlu0 %1277  ;;  %2908 = vmatpush1.msra.mxu0 %v2868_v17  ;;  %v7946_v17 = vld [vmem:[#allocation2_spill] sm:$0xff] }
 0x1f1   :  { %3876 = vrsqrt.f32 %v1529_v37  ;;  %v5925_v25 = vsub.f32 %v5185_v50, %v990_v39  ;;  %v5928_v61 = vsub.f32 %v5191_v22, %v990_v39  ;;  %v1466_v46 = vmul.f32 0.00390625, %v1278_v56  ;;  %2909 = vmatprep.subr.mxu0 %v7927_v24 }
 0x1f2   :  { %v876_v4 = vpop.xlane.xlu1 %875  ;;  %v1381_v10 = vadd.f32 %v1218_v57, %v1217_v2  ;;  %v2867_v57 = vld [vmem:[%s7592_s5 + $0x48] sm:$0xff] }
 0x1f3   :  { %7942 = vst [vmem:[#allocation54_spill] sm:$0xff] %v5925_v25  ;;  %7943 = vst [vmem:[#allocation85_spill] sm:$0xff] %v5928_v61  ;;  %v1530_v34 = vadd.f32 1e-05, %v1466_v46  ;;  %v991_v45 = vmul.f32 0.00390625, %v876_v4  ;;  %v1219_v6 = vmul.f32 %v5925_v25, %v5925_v25  ;;  %v1220_v50 = vmul.f32 %v5928_v61, %v5928_v61  ;;  %2910 = vmatpush1.msra.mxu0 %v2867_v57 }
 0x1f4   :  { %1382 = vadd.xlane.f32.xlu0 %v1381_v10  ;;  %v1281_v22 = vpop.xlane.xlu0 %1280  ;;  %v5948_v4 = vsub.s32 1, %v7946_v17  ;;  %v1791_v10 = vsub.s32 5, %v7946_v17  ;;  %2911 = vmatprep.subr.mxu0 %v7927_v24 }
 0x1f5   :  { %3878 = vrsqrt.f32 %v1530_v34  ;;  %v5939_v39 = vsub.f32 %v5213_v7, %v991_v45  ;;  %v5942_v37 = vsub.f32 %v5217_v27, %v991_v45  ;;  %v1467_v2 = vmul.f32 0.00390625, %v1281_v22 }
 0x1f6   :  { %v879_v56 = vpop.xlane.xlu1 %878  ;;  %v1384_v46 = vadd.f32 %v1220_v50, %v1219_v6  ;;  %7947 = vst [vmem:[#allocation2_spill] sm:$0xff] %v5948_v4  ;;  %v1933_v6 = vsub.s32 2, %v7946_v17  ;;  %v1937_v50 = vsub.s32 6, %v7946_v17 }
 0x1f7   :  { %7944 = vst [vmem:[#allocation86_spill] sm:$0xff] %v5939_v39  ;;  %7945 = vst [vmem:[#allocation87_spill] sm:$0xff] %v5942_v37  ;;  %v1531_v34 = vadd.f32 1e-05, %v1467_v2  ;;  %v992_v25 = vmul.f32 0.00390625, %v879_v56  ;;  %v1221_v7 = vmul.f32 %v5939_v39, %v5939_v39  ;;  %v1222_v27 = vmul.f32 %v5942_v37, %v5942_v37  ;;  %v2866_v56 = vld [vmem:[%s7592_s5 + $0x40] sm:$0xff] }
 0x1f8   :  { %1385 = vadd.xlane.f32.xlu0 %v1384_v46  ;;  %v1284_v45 = vpop.xlane.xlu0 %1283  ;;  %v4260_v46 = vld [vmem:[%s7590_s2] sm:$0x77]  ;;  %2912 = vmatpush1.msra.mxu0 %v2866_v56 }
 0x1f9   :  { %3880 = vrsqrt.f32 %v1531_v34  ;;  %v5959_v22 = vsub.f32 %v5241_v52, %v992_v25  ;;  %v5962_v2 = vsub.f32 %v5247_v35, %v992_v25  ;;  %v1468_v57 = vmul.f32 0.00390625, %v1284_v45  ;;  %2913 = vmatprep.subr.mxu0 %v7927_v24 }
 0x1fa   :  { %v882_v39 = vpop.xlane.xlu1 %881  ;;  %v1387_v37 = vadd.f32 %v1222_v27, %v1221_v7  ;;  %v1792_v61 = vrot.slane %v4260_v46, %v1791_v10  ;;  %v1788_v17 = vrot.slane %v4260_v46, %v5948_v4  ;;  %v1934_v27 = vrot.slane %v4260_v46, %v1933_v6 }
 0x1fb   :  { %7948 = vst [vmem:[#allocation88_spill] sm:$0xff] %v5959_v22  ;;  %7949 = vst [vmem:[#allocation89_spill] sm:$0xff] %v5962_v2  ;;  %v1223_v52 = vmul.f32 %v5959_v22, %v5959_v22  ;;  %v1224_v35 = vmul.f32 %v5962_v2, %v5962_v2  ;;  %v1532_v25 = vadd.f32 1e-05, %v1468_v57  ;;  %v993_v34 = vmul.f32 0.00390625, %v882_v39  ;;  %v2865_v22 = vld [vmem:[%s7592_s5 + $0x38] sm:$0xff] }
 0x1fc   :  { %1388 = vadd.xlane.f32.xlu0 %v1387_v37  ;;  %v1287_v7 = vpop.xlane.xlu0 %1286  ;;  %v1938_v45 = vrot.slane %v4260_v46, %v1937_v50  ;;  %v5986_v37 = vrot.slane %v1792_v61, %v5948_v4  ;;  %v5989_v50 = vrot.slane %v1788_v17, %v5948_v4  ;;  %2914 = vmatpush1.msra.mxu0 %v2865_v22 }
 0x1fd   :  { %3882 = vrsqrt.f32 %v1532_v25  ;;  %v5977_v10 = vsub.f32 %v5269_v28, %v993_v34  ;;  %v5980_v56 = vsub.f32 %v5273_v41, %v993_v34  ;;  %v1469_v18 = vmul.f32 0.00390625, %v1287_v7  ;;  %2915 = vmatprep.subr.mxu0 %v7927_v24 }
 0x1fe   :  { %v3877_v57 = vpop.eup %3876  ;;  %v885_v39 = vpop.xlane.xlu1 %884  ;;  %v1390_v2 = vadd.f32 %v1224_v35, %v1223_v52  ;;  %v5997_v61 = vrot.slane %v1938_v45, %v1933_v6  ;;  %v7951_v35 = vld [vmem:[#allocation55_spill] sm:$0xff]  ;;  %v6000_v7 = vrot.slane %v1934_v27, %v1933_v6 }
 0x1ff   :  { %7950 = vst [vmem:[#allocation90_spill] sm:$0xff] %v5977_v10  ;;  %v1225_v28 = vmul.f32 %v5977_v10, %v5977_v10  ;;  %v1226_v41 = vmul.f32 %v5980_v56, %v5980_v56  ;;  %v1533_v46 = vadd.f32 1e-05, %v1469_v18  ;;  %v994_v25 = vmul.f32 0.00390625, %v885_v39 }
 0x200   :  { %1391 = vadd.xlane.f32.xlu0 %v1390_v2  ;;  %v1290_v34 = vpop.xlane.xlu0 %1289  ;;  %v1658_v52 = vmul.f32 %v3877_v57, %v5175_v33  ;;  %v1657_v17 = vmul.f32 %v3877_v57, %v7951_v35  ;;  %v2864_v2 = vld [vmem:[%s7592_s5 + $0x30] sm:$0xff] }
 0x201   :  { %v6003_v22 = vsub.f32 %v5297_v0, %v994_v25  ;;  %v6006_v4 = vsub.f32 %v5303_v48, %v994_v25  ;;  %v1470_v18 = vmul.f32 0.00390625, %v1290_v34  ;;  %3884 = vrsqrt.f32 %v1533_v46  ;;  %2916 = vmatpush1.msra.mxu0 %v2864_v2  ;;  %v7953_v34 = vld [vmem:[#allocation56_spill] sm:$0xff]  ;;  %v2863_v2 = vld [vmem:[%s7592_s5 + $0x28] sm:$0xff] }
 0x202   :  { %v3879_v39 = vpop.eup %3878  ;;  %v888_v33 = vpop.xlane.xlu1 %887  ;;  %v1393_v45 = vadd.f32 %v1226_v41, %v1225_v28  ;;  %v1804_v10 = vmul.f32 %v5986_v37, %v1658_v52  ;;  %v1803_v6 = vmul.f32 %v5989_v50, %v1657_v17  ;;  %2917 = vmatprep.subr.mxu0 %v7927_v24 }
 0x203   :  { %7952 = vst [vmem:[#allocation55_spill] sm:$0xff] %v6003_v22  ;;  %v1227_v0 = vmul.f32 %v6003_v22, %v6003_v22  ;;  %v1228_v48 = vmul.f32 %v6006_v4, %v6006_v4  ;;  %v1534_v27 = vadd.f32 1e-05, %v1470_v18  ;;  %v995_v57 = vmul.f32 0.00390625, %v888_v33  ;;  %2918 = vmatpush1.msra.mxu0 %v2863_v2 }
 0x204   :  { %1394 = vadd.xlane.f32.xlu0 %v1393_v45  ;;  %v1293_v25 = vpop.xlane.xlu0 %1292  ;;  %v1950_v46 = vadd.f32 %v5997_v61, %v1804_v10  ;;  %v1949_v28 = vadd.f32 %v6000_v7, %v1803_v6  ;;  %v1660_v41 = vmul.f32 %v3879_v39, %v5203_v58  ;;  %v1659_v52 = vmul.f32 %v3879_v39, %v7953_v34 }
 0x205   :  { %v6023_v35 = vsub.f32 %v5325_v42, %v995_v57  ;;  %v6026_v17 = vsub.f32 %v5329_v53, %v995_v57  ;;  %v1471_v18 = vmul.f32 0.00390625, %v1293_v25  ;;  %v1396_v10 = vadd.f32 %v1228_v48, %v1227_v0  ;;  %2919 = vmatprep.subr.mxu0 %v7927_v24 }
 0x206   :  { %v3881_v33 = vpop.eup %3880  ;;  %v891_v45 = vpop.xlane.xlu1 %890  ;;  %v2078_v22 = vmax.f32 %v1950_v46, 0.0  ;;  %v2077_v6 = vmax.f32 %v1949_v28, 0.0  ;;  %v1806_v58 = vmul.f32 %v5986_v37, %v1660_v41  ;;  %3886 = vrsqrt.f32 %v1534_v27  ;;  %v2862_v27 = vld [vmem:[%s7592_s5 + $0x20] sm:$0xff] }
 0x207   :  { %v1229_v42 = vmul.f32 %v6023_v35, %v6023_v35  ;;  %v1230_v53 = vmul.f32 %v6026_v17, %v6026_v17  ;;  %v1535_v39 = vadd.f32 1e-05, %v1471_v18  ;;  %v996_v57 = vmul.f32 0.00390625, %v891_v45  ;;  %2920 = vmatpush1.msra.mxu0 %v2862_v27 }
 0x208   :  { %1397 = vadd.xlane.f32.xlu0 %v1396_v10  ;;  %2345 = vmatprep.mubr.f32.mxu1 %v2078_v22  ;;  %v1296_v25 = vpop.xlane.xlu0 %1295  ;;  %v1952_v0 = vadd.f32 %v5997_v61, %v1806_v58  ;;  %v1805_v48 = vmul.f32 %v5989_v50, %v1659_v52  ;;  %v1662_v46 = vmul.f32 %v3881_v33, %v5231_v55 }
 0x209   :  { %3888 = vrsqrt.f32 %v1535_v39  ;;  %v6041_v28 = vsub.f32 %v5353_v23, %v996_v57  ;;  %v6044_v41 = vsub.f32 %v5359_v60, %v996_v57  ;;  %2346 = vmatmul.mubr.f32.vlgmr.msra.gmra.mxu1 %v2077_v6  ;;  %v1399_v18 = vadd.f32 %v1230_v53, %v1229_v42  ;;  %2921 = vmatprep.subr.mxu0 %v7927_v24  ;;  %v7954_v53 = vld [vmem:[#allocation57_spill] sm:$0xff] }
 0x20a   :  { %v3883_v22 = vpop.eup %3882  ;;  %v894_v34 = vpop.xlane.xlu1 %893  ;;  %v2080_v2 = vmax.f32 %v1952_v0, 0.0  ;;  %v1951_v52 = vadd.f32 %v6000_v7, %v1805_v48  ;;  %v1808_v55 = vmul.f32 %v5986_v37, %v1662_v46  ;;  %v1472_v45 = vmul.f32 0.00390625, %v1296_v25  ;;  %v2861_v25 = vld [vmem:[%s7592_s5 + $0x18] sm:$0xff] }
 0x20b   :  { %v1231_v23 = vmul.f32 %v6041_v28, %v6041_v28  ;;  %v1232_v60 = vmul.f32 %v6044_v41, %v6044_v41  ;;  %v997_v10 = vmul.f32 0.00390625, %v894_v34  ;;  %v1661_v39 = vmul.f32 %v3881_v33, %v7954_v53  ;;  %2922 = vmatpush1.msra.mxu0 %v2861_v25 }
 0x20c   :  { %1400 = vadd.xlane.f32.xlu0 %v1399_v18  ;;  %2351 = vmatprep.mubr.f32.mxu1 %v2080_v2  ;;  %v2079_v6 = vmax.f32 %v1951_v52, 0.0  ;;  %v1299_v58 = vpop.xlane.xlu0 %1298  ;;  %v1954_v42 = vadd.f32 %v5997_v61, %v1808_v55  ;;  %v1664_v57 = vmul.f32 %v3883_v22, %v5259_v30  ;;  %v1536_v55 = vadd.f32 1e-05, %v1472_v45  ;;  %v2860_v45 = vld [vmem:[%s7592_s5 + $0x10] sm:$0xff] }
 0x20d   :  { %v6060_v0 = vsub.f32 %v5375_v40, %v997_v10  ;;  %v6063_v48 = vsub.f32 %v5379_v38, %v997_v10  ;;  %v1402_v27 = vadd.f32 %v1232_v60, %v1231_v23  ;;  %v1807_v18 = vmul.f32 %v5989_v50, %v1661_v39  ;;  %2923 = vmatprep.subr.mxu0 %v7927_v24 }
 0x20e   :  { %2352 = vmatmul.mubr.f32.gmra.mxu1 %v2079_v6  ;;  %v897_v46 = vpop.xlane.xlu1 %896  ;;  %v2082_v34 = vmax.f32 %v1954_v42, 0.0  ;;  %v1810_v33 = vmul.f32 %v5986_v37, %v1664_v57  ;;  %v3885_v30 = vpop.eup %3884  ;;  %v1473_v2 = vmul.f32 0.00390625, %v1299_v58  ;;  %v7955_v6 = vld [vmem:[#allocation58_spill] sm:$0xff]  ;;  %2924 = vmatpush1.msra.mxu0 %v2860_v45  ;;  %3890 = vrsqrt.f32 %v1536_v55  ;;  %v2859_v55 = vld [vmem:[%s7592_s5 + $0x8] sm:$0xff] }
 0x20f   :  { %v1233_v40 = vmul.f32 %v6060_v0, %v6060_v0  ;;  %v1234_v38 = vmul.f32 %v6063_v48, %v6063_v48  ;;  %v998_v52 = vmul.f32 0.00390625, %v897_v46  ;;  %v1953_v23 = vadd.f32 %v6000_v7, %v1807_v18  ;;  %2925 = vmatprep.subr.mxu0 %v7927_v24 }
 0x210   :  { %1403 = vadd.xlane.f32.xlu0 %v1402_v27  ;;  %2357 = vmatprep.mubr.f32.mxu1 %v2082_v34  ;;  %v1302_v60 = vpop.xlane.xlu0 %1301  ;;  %v1956_v10 = vadd.f32 %v5997_v61, %v1810_v33  ;;  %v1663_v42 = vmul.f32 %v3883_v22, %v7955_v6  ;;  %v1537_v18 = vadd.f32 1e-05, %v1473_v2 }
 0x211   :  { %v6079_v53 = vsub.f32 %v5403_v11, %v998_v52  ;;  %v6082_v39 = vsub.f32 %v5409_v13, %v998_v52  ;;  %v1474_v58 = vmul.f32 0.00390625, %v1302_v60  ;;  %v2081_v57 = vmax.f32 %v1953_v23, 0.0  ;;  %v7956_v52 = vld [vmem:[#allocation59_spill] sm:$0xff]  ;;  %2926 = vmatpush1.msra.mxu0 %v2859_v55 }
 0x212   :  { %v900_v25 = vpop.xlane.xlu1 %899  ;;  %v1405_v46 = vadd.f32 %v1234_v38, %v1233_v40  ;;  %v2084_v27 = vmax.f32 %v1956_v10, 0.0  ;;  %v1809_v34 = vmul.f32 %v5989_v50, %v1663_v42  ;;  %v1666_v38 = vmul.f32 %v3885_v30, %v5287_v15  ;;  %2927 = vmatprep.subr.mxu0 %v7927_v24 }
 0x213   :  { %v1235_v11 = vmul.f32 %v6079_v53, %v6079_v53  ;;  %v1236_v13 = vmul.f32 %v6082_v39, %v6082_v39  ;;  %v999_v22 = vmul.f32 0.00390625, %v900_v25  ;;  %2358 = vmatmul.mubr.f32.gmra.mxu1 %v2081_v57  ;;  %v1665_v23 = vmul.f32 %v3885_v30, %v7956_v52  ;;  %v3887_v2 = vpop.eup %3886  ;;  %v2858_v52 = vld [vmem:[%s7592_s5] sm:$0xff] }
 0x214   :  { %1406 = vadd.xlane.f32.xlu0 %v1405_v46  ;;  %v1955_v33 = vadd.f32 %v6000_v7, %v1809_v34  ;;  %v1305_v40 = vpop.xlane.xlu0 %1304  ;;  %v1538_v60 = vadd.f32 1e-05, %v1474_v58  ;;  %2363 = vmatprep.mubr.f32.mxu1 %v2084_v27  ;;  %v1812_v15 = vmul.f32 %v5986_v37, %v1666_v38  ;;  %3892 = vrsqrt.f32 %v1537_v18 }
 0x215   :  { %v6097_v10 = vsub.f32 %v5431_v63, %v999_v22  ;;  %v6100_v6 = vsub.f32 %v5435_v21, %v999_v22  ;;  %v1408_v25 = vadd.f32 %v1236_v13, %v1235_v11  ;;  %v1811_v30 = vmul.f32 %v5989_v50, %v1665_v23  ;;  %v7957_v13 = vld [vmem:[#allocation61_spill] sm:$0xff]  ;;  %2928 = vmatpush1.msra.mxu0 %v2858_v52 }
 0x216   :  { %v3889_v42 = vpop.eup %3888  ;;  %v2083_v45 = vmax.f32 %v1955_v33, 0.0  ;;  %v903_v57 = vpop.xlane.xlu1 %902  ;;  %v1475_v46 = vmul.f32 0.00390625, %v1305_v40  ;;  %v1958_v27 = vadd.f32 %v5997_v61, %v1812_v15  ;;  %v1668_v22 = vmul.f32 %v3887_v2, %v7957_v13  ;;  %v7958_v33 = vld [vmem:[#allocation41_spill] sm:$0xff]  ;;  %2929 = vmatprep.subr.mxu0 %v7927_v24 }
 0x217   :  { %v1237_v63 = vmul.f32 %v6097_v10, %v6097_v10  ;;  %v1238_v21 = vmul.f32 %v6100_v6, %v6100_v6  ;;  %v1000_v58 = vmul.f32 0.00390625, %v903_v57  ;;  %1409 = vadd.xlane.f32.xlu1 %v1408_v25  ;;  %v1957_v34 = vadd.f32 %v6000_v7, %v1811_v30 }
 0x218   :  { %2364 = vmatmul.mubr.f32.gmra.mxu1 %v2083_v45  ;;  %v1308_v11 = vpop.xlane.xlu0 %1307  ;;  %3894 = vrsqrt.f32 %v1538_v60  ;;  %v2086_v40 = vmax.f32 %v1958_v27, 0.0  ;;  %v1814_v57 = vmul.f32 %v5986_v37, %v1668_v22  ;;  %v1539_v30 = vadd.f32 1e-05, %v1475_v46  ;;  %v7959_v27 = vld [vmem:[#allocation60_spill] sm:$0xff]  ;;  %v2889_v46 = vld [vmem:[%s7592_s5 + $0xf8] sm:$0xff] }
 0x219   :  { %v6116_v18 = vsub.f32 %v5459_v59, %v1000_v58  ;;  %v6119_v38 = vsub.f32 %v7958_v33, %v1000_v58  ;;  %v2085_v23 = vmax.f32 %v1957_v34, 0.0  ;;  %v1411_v45 = vadd.f32 %v1238_v21, %v1237_v63  ;;  %v7960_v34 = vld [vmem:[#allocation63_spill] sm:$0xff]  ;;  %v7961_v33 = vld [vmem:[#allocation6_spill] sm:$0xff]  ;;  %2930 = vmatpush2.msra.mxu0 %v2889_v46 }
 0x21a   :  { %v906_v55 = vpop.xlane.xlu1 %905  ;;  %v1476_v25 = vmul.f32 0.00390625, %v1308_v11  ;;  %2369 = vmatprep.mubr.f32.mxu1 %v2086_v40  ;;  %v1960_v58 = vadd.f32 %v5997_v61, %v1814_v57  ;;  %v1667_v63 = vmul.f32 %v3887_v2, %v7959_v27  ;;  %v1670_v13 = vmul.f32 %v3889_v42, %v7960_v34  ;;  %2931 = vmatprep.subr.mxu0 %v7927_v24 }
 0x21b   :  { %v1239_v60 = vmul.f32 %v6116_v18, %v6116_v18  ;;  %v1240_v59 = vmul.f32 %v6119_v38, %v6119_v38  ;;  %v1001_v15 = vmul.f32 0.00390625, %v906_v55  ;;  %1412 = vadd.xlane.f32.xlu0 %v1411_v45  ;;  %3896 = vrsqrt.f32 %v1539_v30  ;;  %v2888_v30 = vld [vmem:[%s7592_s5 + $0xf0] sm:$0xff] }
 0x21c   :  { %v1311_v21 = vpop.xlane.xlu0 %1310  ;;  %2370 = vmatmul.mubr.f32.gmra.mxu1 %v2085_v23  ;;  %v2088_v40 = vmax.f32 %v1960_v58, 0.0  ;;  %v1813_v55 = vmul.f32 %v5989_v50, %v1667_v63  ;;  %v1816_v57 = vmul.f32 %v5986_v37, %v1670_v13  ;;  %v1540_v23 = vadd.f32 1e-05, %v1476_v25  ;;  %v3891_v25 = vpop.eup %3890  ;;  %2932 = vmatpush2.msra.mxu0 %v2888_v30  ;;  %v7969_v30 = vld [vmem:[#allocation72_spill] sm:$0xff] }
 0x21d   :  { %v6134_v22 = vsub.f32 %v5487_v29, %v1001_v15  ;;  %v6137_v52 = vsub.f32 %v7961_v33, %v1001_v15  ;;  %v1477_v11 = vmul.f32 0.00390625, %v1311_v21  ;;  %v1414_v2 = vadd.f32 %v1240_v59, %v1239_v60  ;;  %v7962_v59 = vld [vmem:[#allocation62_spill] sm:$0xff]  ;;  %v7964_v33 = vld [vmem:[#allocation71_spill] sm:$0xff]  ;;  %2933 = vmatprep.subr.mxu0 %v7927_v24 }
 0x21e   :  { %v909_v45 = vpop.xlane.xlu1 %908  ;;  %2375 = vmatprep.mubr.f32.mxu1 %v2088_v40  ;;  %v1959_v58 = vadd.f32 %v6000_v7, %v1813_v55  ;;  %v1962_v60 = vadd.f32 %v5997_v61, %v1816_v57  ;;  %v1669_v63 = vmul.f32 %v3889_v42, %v7962_v59  ;;  %3898 = vrsqrt.f32 %v1540_v23 }
 0x21f   :  { %v1241_v29 = vmul.f32 %v6134_v22, %v6134_v22  ;;  %v1242_v15 = vmul.f32 %v6137_v52, %v6137_v52  ;;  %v1002_v27 = vmul.f32 0.00390625, %v909_v45  ;;  %1415 = vadd.xlane.f32.xlu1 %v1414_v2  ;;  %v1541_v34 = vadd.f32 1e-05, %v1477_v11 }
 0x220   :  { %v1314_v21 = vpop.xlane.xlu0 %1313  ;;  %v2087_v40 = vmax.f32 %v1959_v58, 0.0  ;;  %v2090_v55 = vmax.f32 %v1962_v60, 0.0  ;;  %v1815_v2 = vmul.f32 %v5989_v50, %v1669_v63  ;;  %v7966_v63 = vld [vmem:[#allocation65_spill] sm:$0xff] }
 0x221   :  { %v6153_v13 = vsub.f32 %v5509_v31, %v1002_v27  ;;  %v6156_v46 = vsub.f32 %v7964_v33, %v1002_v27  ;;  %v1478_v45 = vmul.f32 0.00390625, %v1314_v21  ;;  %v1417_v42 = vadd.f32 %v1242_v15, %v1241_v29  ;;  %v3893_v59 = vpop.eup %3892  ;;  %v7967_v29 = vld [vmem:[#allocation64_spill] sm:$0xff] }
 0x222   :  { %v912_v57 = vpop.xlane.xlu1 %911  ;;  %2376 = vmatmul.mubr.f32.gmra.mxu1 %v2087_v40  ;;  %v1961_v58 = vadd.f32 %v6000_v7, %v1815_v2  ;;  %v1672_v21 = vmul.f32 %v3891_v25, %v7966_v63  ;;  %v1671_v15 = vmul.f32 %v3891_v25, %v7967_v29  ;;  %3900 = vrsqrt.f32 %v1541_v34  ;;  %v2887_v40 = vld [vmem:[%s7592_s5 + $0xe8] sm:$0xff] }
 0x223   :  { %7963 = vst [vmem:[#allocation56_spill] sm:$0xff] %v6153_v13  ;;  %7965 = vst [vmem:[#allocation57_spill] sm:$0xff] %v6156_v46  ;;  %v1243_v31 = vmul.f32 %v6153_v13, %v6153_v13  ;;  %v1244_v11 = vmul.f32 %v6156_v46, %v6156_v46  ;;  %v1003_v27 = vmul.f32 0.00390625, %v912_v57  ;;  %v1542_v60 = vadd.f32 1e-05, %v1478_v45  ;;  %1418 = vadd.xlane.f32.xlu0 %v1417_v42 }
 0x224   :  { %v1317_v23 = vpop.xlane.xlu0 %1316  ;;  %2381 = vmatprep.mubr.f32.mxu1 %v2090_v55  ;;  %v2089_v2 = vmax.f32 %v1961_v58, 0.0  ;;  %v1818_v42 = vmul.f32 %v5986_v37, %v1672_v21  ;;  %v1817_v25 = vmul.f32 %v5989_v50, %v1671_v15  ;;  %2934 = vmatpush2.msra.mxu0 %v2887_v40  ;;  %v7971_v15 = vld [vmem:[#allocation67_spill] sm:$0xff] }
 0x225   :  { %v6171_v33 = vsub.f32 %v5531_v51, %v1003_v27  ;;  %v6174_v57 = vsub.f32 %v7969_v30, %v1003_v27  ;;  %v1479_v13 = vmul.f32 0.00390625, %v1317_v23  ;;  %v3895_v45 = vpop.eup %3894  ;;  %v1420_v34 = vadd.f32 %v1244_v11, %v1243_v31  ;;  %2935 = vmatprep.subr.mxu0 %v7927_v24  ;;  %v7973_v30 = vld [vmem:[#allocation73_spill] sm:$0xff] }
 0x226   :  { %v915_v63 = vpop.xlane.xlu1 %914  ;;  %2382 = vmatmul.mubr.f32.gmra.mxu1 %v2089_v2  ;;  %3902 = vrsqrt.f32 %v1542_v60  ;;  %v1964_v58 = vadd.f32 %v5997_v61, %v1818_v42  ;;  %v1963_v21 = vadd.f32 %v6000_v7, %v1817_v25  ;;  %v1674_v31 = vmul.f32 %v3893_v59, %v7971_v15  ;;  %v2886_v60 = vld [vmem:[%s7592_s5 + $0xe0] sm:$0xff] }
 0x227   :  { %7968 = vst [vmem:[#allocation58_spill] sm:$0xff] %v6171_v33  ;;  %7970 = vst [vmem:[#allocation59_spill] sm:$0xff] %v6174_v57  ;;  %v1245_v51 = vmul.f32 %v6171_v33, %v6171_v33  ;;  %v1246_v55 = vmul.f32 %v6174_v57, %v6174_v57  ;;  %v1543_v27 = vadd.f32 1e-05, %v1479_v13  ;;  %v1004_v29 = vmul.f32 0.00390625, %v915_v63  ;;  %1421 = vadd.xlane.f32.xlu1 %v1420_v34  ;;  %v7975_v13 = vld [vmem:[#allocation66_spill] sm:$0xff] }
 0x228   :  { %v1320_v11 = vpop.xlane.xlu0 %1319  ;;  %v1673_v63 = vmul.f32 %v3893_v59, %v7975_v13  ;;  %v2092_v2 = vmax.f32 %v1964_v58, 0.0  ;;  %v2091_v42 = vmax.f32 %v1963_v21, 0.0  ;;  %v1820_v25 = vmul.f32 %v5986_v37, %v1674_v31  ;;  %2936 = vmatpush2.msra.mxu0 %v2886_v60  ;;  %v3897_v33 = vpop.eup %3896  ;;  %v7979_v57 = vld [vmem:[#allocation68_spill] sm:$0xff] }
 0x229   :  { %3904 = vrsqrt.f32 %v1543_v27  ;;  %v6190_v23 = vsub.f32 %v5553_v12, %v1004_v29  ;;  %v6193_v40 = vsub.f32 %v7973_v30, %v1004_v29  ;;  %v1480_v34 = vmul.f32 0.00390625, %v1320_v11  ;;  %v2885_v12 = vld [vmem:[%s7592_s5 + $0xd8] sm:$0xff]  ;;  %2937 = vmatprep.subr.mxu0 %v7927_v24 }
 0x22a   :  { %v918_v15 = vpop.xlane.xlu1 %917  ;;  %v1819_v29 = vmul.f32 %v5989_v50, %v1673_v63  ;;  %2387 = vmatprep.mubr.f32.mxu1 %v2092_v2  ;;  %v1966_v58 = vadd.f32 %v5997_v61, %v1820_v25  ;;  %v1423_v31 = vadd.f32 %v1246_v55, %v1245_v51  ;;  %v7976_v11 = vld [vmem:[#allocation69_spill] sm:$0xff]  ;;  %2938 = vmatpush2.msra.mxu0 %v2885_v12  ;;  %v7978_v63 = vld [vmem:[#allocation74_spill] sm:$0xff] }
 0x22b   :  { %7972 = vst [vmem:[#allocation61_spill] sm:$0xff] %v6190_v23  ;;  %7974 = vst [vmem:[#allocation41_spill] sm:$0xff] %v6193_v40  ;;  %v1247_v27 = vmul.f32 %v6190_v23, %v6190_v23  ;;  %v1248_v59 = vmul.f32 %v6193_v40, %v6193_v40  ;;  %v1005_v30 = vmul.f32 0.00390625, %v918_v15  ;;  %v1544_v21 = vadd.f32 1e-05, %v1480_v34  ;;  %2388 = vmatmul.mubr.f32.gmra.mxu1 %v2091_v42 }
 0x22c   :  { %v1676_v13 = vmul.f32 %v3895_v45, %v7976_v11  ;;  %v1323_v60 = vpop.xlane.xlu0 %1322  ;;  %v1965_v23 = vadd.f32 %v6000_v7, %v1819_v29  ;;  %v1675_v2 = vmul.f32 %v3895_v45, %v7979_v57  ;;  %v2094_v46 = vmax.f32 %v1966_v58, 0.0  ;;  %1424 = vadd.xlane.f32.xlu0 %v1423_v31  ;;  %2939 = vmatprep.subr.mxu0 %v7927_v24  ;;  %v3899_v29 = vpop.eup %3898 }
 0x22d   :  { %v6213_v40 = vsub.f32 %v5575_v43, %v1005_v30  ;;  %v6216_v15 = vsub.f32 %v7978_v63, %v1005_v30  ;;  %3906 = vrsqrt.f32 %v1544_v21  ;;  %v1481_v55 = vmul.f32 0.00390625, %v1323_v60 }
 0x22e   :  { %v1822_v51 = vmul.f32 %v5986_v37, %v1676_v13  ;;  %v921_v25 = vpop.xlane.xlu1 %920  ;;  %v2093_v42 = vmax.f32 %v1965_v23, 0.0  ;;  %v1821_v12 = vmul.f32 %v5989_v50, %v1675_v2  ;;  %2393 = vmatprep.mubr.f32.mxu1 %v2094_v46  ;;  %v1426_v58 = vadd.f32 %v1248_v59, %v1247_v27  ;;  %v7980_v23 = vld [vmem:[#allocation4_spill] sm:$0xff]  ;;  %v7981_v13 = vld [vmem:[#allocation70_spill] sm:$0xff]  ;;  %v7983_v27 = vld [vmem:[#allocation75_spill] sm:$0xff] }
 0x22f   :  { %7977 = vst [vmem:[#allocation60_spill] sm:$0xff] %v6213_v40  ;;  %v1249_v34 = vmul.f32 %v6213_v40, %v6213_v40  ;;  %v1250_v43 = vmul.f32 %v6216_v15, %v6216_v15  ;;  %v1545_v45 = vadd.f32 1e-05, %v1481_v55  ;;  %v1006_v30 = vmul.f32 0.00390625, %v921_v25  ;;  %v2884_v2 = vld [vmem:[%s7592_s5 + $0xd0] sm:$0xff]  ;;  %v3901_v40 = vpop.eup %3900 }
 0x230   :  { %v1968_v57 = vadd.f32 %v5997_v61, %v1822_v51  ;;  %v1326_v21 = vpop.xlane.xlu0 %1325  ;;  %2394 = vmatmul.mubr.f32.gmra.mxu1 %v2093_v42  ;;  %v1967_v31 = vadd.f32 %v6000_v7, %v1821_v12  ;;  %v1678_v11 = vmul.f32 %v3897_v33, %v7980_v23  ;;  %v1677_v60 = vmul.f32 %v3897_v33, %v7981_v13  ;;  %v2883_v33 = vld [vmem:[%s7592_s5 + $0xc8] sm:$0xff]  ;;  %v7985_v13 = vld [vmem:[#allocation5_spill] sm:$0xff] }
 0x231   :  { %v1482_v63 = vmul.f32 0.00390625, %v1326_v21  ;;  %3908 = vrsqrt.f32 %v1545_v45  ;;  %v6234_v51 = vsub.f32 %v5597_v54, %v1006_v30  ;;  %v6237_v59 = vsub.f32 %v7983_v27, %v1006_v30  ;;  %1427 = vadd.xlane.f32.xlu1 %v1426_v58  ;;  %2940 = vmatpush2.msra.mxu0 %v2884_v2 }
 0x232   :  { %v2096_v46 = vmax.f32 %v1968_v57, 0.0  ;;  %v924_v55 = vpop.xlane.xlu1 %923  ;;  %v2095_v25 = vmax.f32 %v1967_v31, 0.0  ;;  %v1824_v42 = vmul.f32 %v5986_v37, %v1678_v11  ;;  %v1823_v12 = vmul.f32 %v5989_v50, %v1677_v60  ;;  %2941 = vmatprep.subr.mxu0 %v7927_v24 }
 0x233   :  { %7982 = vst [vmem:[#allocation63_spill] sm:$0xff] %v6234_v51  ;;  %7984 = vst [vmem:[#allocation6_spill] sm:$0xff] %v6237_v59  ;;  %v1546_v57 = vadd.f32 1e-05, %v1482_v63  ;;  %v1251_v54 = vmul.f32 %v6234_v51, %v6234_v51  ;;  %v1252_v45 = vmul.f32 %v6237_v59, %v6237_v59  ;;  %v1007_v30 = vmul.f32 0.00390625, %v924_v55  ;;  %2942 = vmatpush2.msra.mxu0 %v2883_v33  ;;  %v3903_v23 = vpop.eup %3902 }
 0x234   :  { %2399 = vmatprep.mubr.f32.mxu1 %v2096_v46  ;;  %v1429_v58 = vadd.f32 %v1250_v43, %v1249_v34  ;;  %v1329_v21 = vpop.xlane.xlu0 %1328  ;;  %v1970_v31 = vadd.f32 %v5997_v61, %v1824_v42  ;;  %v1969_v11 = vadd.f32 %v6000_v7, %v1823_v12  ;;  %v1680_v60 = vmul.f32 %v3899_v29, %v7985_v13  ;;  %v7987_v46 = vld [vmem:[#allocation76_spill] sm:$0xff] }
 0x235   :  { %2400 = vmatmul.mubr.f32.gmra.mxu1 %v2095_v25  ;;  %3910 = vrsqrt.f32 %v1546_v57  ;;  %2943 = vmatprep.subr.mxu0 %v7927_v24  ;;  %v6256_v2 = vsub.f32 %v5619_v14, %v1007_v30  ;;  %v6259_v34 = vsub.f32 %v7987_v46, %v1007_v30  ;;  %v7989_v43 = vld [vmem:[#allocation44_spill] sm:$0xff]  ;;  %v1483_v55 = vmul.f32 0.00390625, %v1329_v21  ;;  %v7991_v21 = vld [vmem:[#allocation77_spill] sm:$0xff] }
 0x236   :  { %v6253_v63 = vpop.eup %3904  ;;  %1430 = vadd.xlane.f32.xlu0 %v1429_v58  ;;  %v1679_v27 = vmul.f32 %v3899_v29, %v7989_v43  ;;  %v927_v33 = vpop.xlane.xlu1 %926  ;;  %v2098_v25 = vmax.f32 %v1970_v31, 0.0  ;;  %v2097_v42 = vmax.f32 %v1969_v11, 0.0  ;;  %v1826_v12 = vmul.f32 %v5986_v37, %v1680_v60  ;;  %v2882_v60 = vld [vmem:[%s7592_s5 + $0xc0] sm:$0xff] }
 0x237   :  { %7986 = vst [vmem:[#allocation62_spill] sm:$0xff] %v6256_v2  ;;  %7988 = vst [vmem:[#allocation71_spill] sm:$0xff] %v6259_v34  ;;  %v1008_v57 = vmul.f32 0.00390625, %v927_v33  ;;  %v1253_v13 = vmul.f32 %v6256_v2, %v6256_v2  ;;  %v1254_v14 = vmul.f32 %v6259_v34, %v6259_v34  ;;  %v1547_v30 = vadd.f32 1e-05, %v1483_v55  ;;  %v7993_v33 = vld [vmem:[#allocation7_spill] sm:$0xff]  ;;  %2944 = vmatpush2.msra.mxu0 %v2882_v60 }
 0x238   :  { %v1825_v51 = vmul.f32 %v5989_v50, %v1679_v27  ;;  %v1332_v46 = vpop.xlane.xlu0 %1331  ;;  %2405 = vmatprep.mubr.f32.mxu1 %v2098_v25  ;;  %v1972_v29 = vadd.f32 %v5997_v61, %v1826_v12  ;;  %v1432_v11 = vadd.f32 %v1252_v45, %v1251_v54  ;;  %v7992_v27 = vld [vmem:[#allocation8_spill] sm:$0xff]  ;;  %v1681_v25 = vmul.f32 %v3901_v40, %v7993_v33  ;;  %v7994_v2 = vld [vmem:[#allocation10_spill] sm:$0xff]  ;;  %v7995_v34 = vld [vmem:[#allocation9_spill] sm:$0xff] }
 0x239   :  { %v6270_v58 = vsub.f32 %v5639_v5, %v1008_v57  ;;  %v6273_v31 = vsub.f32 %v7991_v21, %v1008_v57  ;;  %2406 = vmatmul.mubr.f32.gmra.mxu1 %v2097_v42  ;;  %3912 = vrsqrt.f32 %v1547_v30  ;;  %v1682_v55 = vmul.f32 %v3901_v40, %v7992_v27  ;;  %v2881_v5 = vld [vmem:[%s7592_s5 + $0xb8] sm:$0xff]  ;;  %2945 = vmatprep.subr.mxu0 %v7927_v24 }
 0x23a   :  { %v1971_v43 = vadd.f32 %v6000_v7, %v1825_v51  ;;  %v930_v12 = vpop.xlane.xlu1 %929  ;;  %v6284_v57 = vpop.eup %3906  ;;  %v2100_v54 = vmax.f32 %v1972_v29, 0.0  ;;  %1433 = vadd.xlane.f32.xlu1 %v1432_v11  ;;  %v1484_v42 = vmul.f32 0.00390625, %v1332_v46  ;;  %v1827_v21 = vmul.f32 %v5989_v50, %v1681_v25  ;;  %2946 = vmatpush2.msra.mxu0 %v2881_v5 }
 0x23b   :  { %7990 = vst [vmem:[#allocation65_spill] sm:$0xff] %v6270_v58  ;;  %v1255_v45 = vmul.f32 %v6270_v58, %v6270_v58  ;;  %v1256_v51 = vmul.f32 %v6273_v31, %v6273_v31  ;;  %v1828_v30 = vmul.f32 %v5986_v37, %v1682_v55  ;;  %v1009_v60 = vmul.f32 0.00390625, %v930_v12  ;;  %2947 = vmatprep.subr.mxu0 %v7927_v24  ;;  %v7996_v55 = vld [vmem:[#allocation78_spill] sm:$0xff] }
 0x23c   :  { %v2099_v40 = vmax.f32 %v1971_v43, 0.0  ;;  %v1335_v27 = vpop.xlane.xlu0 %1334  ;;  %2411 = vmatprep.mubr.f32.mxu1 %v2100_v54  ;;  %v1548_v29 = vadd.f32 1e-05, %v1484_v42  ;;  %v1435_v33 = vadd.f32 %v1254_v14, %v1253_v13  ;;  %v1684_v58 = vmul.f32 %v3903_v23, %v7994_v2 }
 0x23d   :  { %v1683_v59 = vmul.f32 %v3903_v23, %v7995_v34  ;;  %v1974_v46 = vadd.f32 %v5997_v61, %v1828_v30  ;;  %v1973_v11 = vadd.f32 %v6000_v7, %v1827_v21  ;;  %v6299_v43 = vsub.f32 %v5659_v8, %v1009_v60 }
 0x23e   :  { %2412 = vmatmul.mubr.f32.gmra.mxu1 %v2099_v40  ;;  %v6302_v25 = vsub.f32 %v7996_v55, %v1009_v60  ;;  %v933_v12 = vpop.xlane.xlu1 %932  ;;  %v6304_v5 = vpop.eup %3908  ;;  %3914 = vrsqrt.f32 %v1548_v29  ;;  %1436 = vadd.xlane.f32.xlu0 %v1435_v33  ;;  %v1830_v23 = vmul.f32 %v5986_v37, %v1684_v58  ;;  %v1485_v34 = vmul.f32 0.00390625, %v1335_v27  ;;  %v7997_v29 = vld [vmem:[#allocation12_spill] sm:$0xff] }
 0x23f   :  { %v1829_v2 = vmul.f32 %v5989_v50, %v1683_v59  ;;  %v2102_v13 = vmax.f32 %v1974_v46, 0.0  ;;  %v2101_v14 = vmax.f32 %v1973_v11, 0.0  ;;  %v1257_v54 = vmul.f32 %v6299_v43, %v6299_v43  ;;  %v2880_v59 = vld [vmem:[%s7592_s5 + $0xb0] sm:$0xff]  ;;  %v7998_v46 = vld [vmem:[#allocation11_spill] sm:$0xff] }
 0x240   :  { %v1258_v8 = vmul.f32 %v6302_v25, %v6302_v25  ;;  %v1338_v42 = vpop.xlane.xlu0 %1337  ;;  %v1976_v40 = vadd.f32 %v5997_v61, %v1830_v23  ;;  %v1549_v21 = vadd.f32 1e-05, %v1485_v34  ;;  %v1010_v60 = vmul.f32 0.00390625, %v933_v12  ;;  %2948 = vmatpush2.msra.mxu0 %v2880_v59  ;;  %v2879_v12 = vld [vmem:[%s7592_s5 + $0xa8] sm:$0xff] }
 0x241   :  { %v1975_v30 = vadd.f32 %v6000_v7, %v1829_v2  ;;  %2417 = vmatprep.mubr.f32.mxu1 %v2102_v13  ;;  %v1438_v27 = vadd.f32 %v1256_v51, %v1255_v45  ;;  %v1686_v33 = vmul.f32 %v6253_v63, %v7997_v29  ;;  %v1685_v11 = vmul.f32 %v6253_v63, %v7998_v46  ;;  %v7999_v45 = vld [vmem:[#allocation79_spill] sm:$0xff] }
 0x242   :  { %v6317_v58 = vpop.eup %3910  ;;  %v1486_v55 = vmul.f32 0.00390625, %v1338_v42  ;;  %v936_v23 = vpop.xlane.xlu1 %935  ;;  %2418 = vmatmul.mubr.f32.gmra.mxu1 %v2101_v14  ;;  %v2104_v2 = vmax.f32 %v1976_v40, 0.0  ;;  %3916 = vrsqrt.f32 %v1549_v21  ;;  %v6327_v13 = vsub.f32 %v5679_v36, %v1010_v60  ;;  %2949 = vmatprep.subr.mxu0 %v7927_v24 }
 0x243   :  { %v2103_v34 = vmax.f32 %v1975_v30, 0.0  ;;  %v6331_v51 = vsub.f32 %v7999_v45, %v1010_v60  ;;  %1439 = vadd.xlane.f32.xlu1 %v1438_v27  ;;  %v1832_v63 = vmul.f32 %v5986_v37, %v1686_v33  ;;  %v1831_v42 = vmul.f32 %v5989_v50, %v1685_v11  ;;  %2950 = vmatpush2.msra.mxu0 %v2879_v12  ;;  %v8000_v30 = vld [vmem:[#allocation14_spill] sm:$0xff] }
 0x244   :  { %v1550_v59 = vadd.f32 1e-05, %v1486_v55  ;;  %v1341_v29 = vpop.xlane.xlu0 %1340  ;;  %2423 = vmatprep.mubr.f32.mxu1 %v2104_v2  ;;  %v1259_v14 = vmul.f32 %v6327_v13, %v6327_v13  ;;  %v1011_v40 = vmul.f32 0.00390625, %v936_v23  ;;  %v1441_v36 = vadd.f32 %v1258_v8, %v1257_v54  ;;  %2951 = vmatprep.subr.mxu0 %v7927_v24  ;;  %v8002_v54 = vld [vmem:[#allocation80_spill] sm:$0xff] }
 0x245   :  { %v1688_v21 = vmul.f32 %v6284_v57, %v8000_v30  ;;  %v1260_v60 = vmul.f32 %v6331_v51, %v6331_v51  ;;  %v1978_v27 = vadd.f32 %v5997_v61, %v1832_v63  ;;  %v1977_v33 = vadd.f32 %v6000_v7, %v1831_v42  ;;  %v8004_v63 = vld [vmem:[#allocation13_spill] sm:$0xff] }
 0x246   :  { %3918 = vrsqrt.f32 %v1550_v59  ;;  %v939_v46 = vpop.xlane.xlu1 %938  ;;  %v6344_v11 = vpop.eup %3912  ;;  %2424 = vmatmul.mubr.f32.gmra.mxu1 %v2103_v34  ;;  %v6347_v55 = vsub.f32 %v5699_v16, %v1011_v40  ;;  %v6350_v8 = vsub.f32 %v8002_v54, %v1011_v40  ;;  %1442 = vadd.xlane.f32.xlu0 %v1441_v36  ;;  %v1487_v12 = vmul.f32 0.00390625, %v1341_v29  ;;  %v2878_v29 = vld [vmem:[%s7592_s5 + $0xa0] sm:$0xff] }
 0x247   :  { %v1834_v23 = vmul.f32 %v5986_v37, %v1688_v21  ;;  %v2106_v2 = vmax.f32 %v1978_v27, 0.0  ;;  %v2105_v45 = vmax.f32 %v1977_v33, 0.0  ;;  %v1687_v42 = vmul.f32 %v6284_v57, %v8004_v63  ;;  %v8006_v21 = vld [vmem:[#allocation81_spill] sm:$0xff]  ;;  %v8007_v63 = vld [vmem:[#allocation16_spill] sm:$0xff]  ;;  %2952 = vmatpush2.msra.mxu0 %v2878_v29 }
 0x248   :  { %8001 = vst [vmem:[#allocation64_spill] sm:$0xff] %v6347_v55  ;;  %8003 = vst [vmem:[#allocation72_spill] sm:$0xff] %v6350_v8  ;;  %v1012_v59 = vmul.f32 0.00390625, %v939_v46  ;;  %v1344_v30 = vpop.xlane.xlu0 %1343  ;;  %v1261_v34 = vmul.f32 %v6347_v55, %v6347_v55  ;;  %v1262_v16 = vmul.f32 %v6350_v8, %v6350_v8  ;;  %v1551_v54 = vadd.f32 1e-05, %v1487_v12  ;;  %v8008_v55 = vld [vmem:[#allocation15_spill] sm:$0xff]  ;;  %2953 = vmatprep.subr.mxu0 %v7927_v24 }
 0x249   :  { %v1980_v40 = vadd.f32 %v5997_v61, %v1834_v23  ;;  %2429 = vmatprep.mubr.f32.mxu1 %v2106_v2  ;;  %v1833_v36 = vmul.f32 %v5989_v50, %v1687_v42  ;;  %v1444_v33 = vadd.f32 %v1260_v60, %v1259_v14  ;;  %v2877_v23 = vld [vmem:[%s7592_s5 + $0x98] sm:$0xff]  ;;  %v1690_v2 = vmul.f32 %v6304_v5, %v8007_v63  ;;  %v8009_v63 = vld [vmem:[#allocation18_spill] sm:$0xff] }
 0x24a   :  { %v6365_v57 = vsub.f32 %v5719_v47, %v1012_v59  ;;  %v6368_v27 = vsub.f32 %v8006_v21, %v1012_v59  ;;  %v942_v46 = vpop.xlane.xlu1 %941  ;;  %2430 = vmatmul.mubr.f32.gmra.mxu1 %v2105_v45  ;;  %3920 = vrsqrt.f32 %v1551_v54  ;;  %v1689_v42 = vmul.f32 %v6304_v5, %v8008_v55  ;;  %2954 = vmatpush2.msra.mxu0 %v2877_v23  ;;  %v8010_v8 = vld [vmem:[#allocation17_spill] sm:$0xff] }
 0x24b   :  { %v2108_v12 = vmax.f32 %v1980_v40, 0.0  ;;  %v6377_v47 = vpop.eup %3914  ;;  %v1979_v59 = vadd.f32 %v6000_v7, %v1833_v36  ;;  %1445 = vadd.xlane.f32.xlu1 %v1444_v33  ;;  %v1488_v45 = vmul.f32 0.00390625, %v1344_v30  ;;  %v1836_v54 = vmul.f32 %v5986_v37, %v1690_v2  ;;  %2955 = vmatprep.subr.mxu0 %v7927_v24 }
 0x24c   :  { %8005 = vst [vmem:[#allocation67_spill] sm:$0xff] %v6365_v57  ;;  %v1263_v14 = vmul.f32 %v6365_v57, %v6365_v57  ;;  %v1264_v60 = vmul.f32 %v6368_v27, %v6368_v27  ;;  %v1347_v40 = vpop.xlane.xlu0 %1346  ;;  %v1835_v5 = vmul.f32 %v5989_v50, %v1689_v42  ;;  %v1013_v55 = vmul.f32 0.00390625, %v942_v46 }
 0x24d   :  { %2435 = vmatprep.mubr.f32.mxu1 %v2108_v12  ;;  %v1447_v29 = vadd.f32 %v1262_v16, %v1261_v34  ;;  %v2107_v36 = vmax.f32 %v1979_v59, 0.0  ;;  %v1552_v21 = vadd.f32 1e-05, %v1488_v45  ;;  %v1692_v57 = vmul.f32 %v6317_v58, %v8009_v63  ;;  %v8012_v34 = vld [vmem:[#allocation82_spill] sm:$0xff]  ;;  %v2875_v63 = vld [vmem:[%s7592_s5 + $0x88] sm:$0xff] }
 0x24e   :  { %v1691_v33 = vmul.f32 %v6317_v58, %v8010_v8  ;;  %v945_v30 = vpop.xlane.xlu1 %944  ;;  %v1982_v12 = vadd.f32 %v5997_v61, %v1836_v54  ;;  %v1981_v2 = vadd.f32 %v6000_v7, %v1835_v5  ;;  %v6395_v42 = vsub.f32 %v5737_v32, %v1013_v55 }
 0x24f   :  { %v6398_v16 = vsub.f32 %v8012_v34, %v1013_v55  ;;  %1448 = vadd.xlane.f32.xlu0 %v1447_v29  ;;  %v6400_v46 = vpop.eup %3916  ;;  %2436 = vmatmul.mubr.f32.gmra.mxu1 %v2107_v36  ;;  %3922 = vrsqrt.f32 %v1552_v21  ;;  %v1838_v58 = vmul.f32 %v5986_v37, %v1692_v57  ;;  %v1489_v23 = vmul.f32 0.00390625, %v1347_v40  ;;  %v2876_v55 = vld [vmem:[%s7592_s5 + $0x90] sm:$0xff] }
 0x250   :  { %8011 = vst [vmem:[#allocation73_spill] sm:$0xff] %v6395_v42  ;;  %v1837_v8 = vmul.f32 %v5989_v50, %v1691_v33  ;;  %v1350_v59 = vpop.xlane.xlu0 %1349  ;;  %v2110_v45 = vmax.f32 %v1982_v12, 0.0  ;;  %v2109_v54 = vmax.f32 %v1981_v2, 0.0  ;;  %v1265_v32 = vmul.f32 %v6395_v42, %v6395_v42  ;;  %2956 = vmatpush2.msra.mxu0 %v2876_v55  ;;  %v8014_v2 = vld [vmem:[#allocation20_spill] sm:$0xff]  ;;  %v8015_v42 = vld [vmem:[#allocation19_spill] sm:$0xff] }
 0x251   :  { %8013 = vst [vmem:[#allocation66_spill] sm:$0xff] %v6398_v16  ;;  %v1266_v5 = vmul.f32 %v6398_v16, %v6398_v16  ;;  %v1984_v29 = vadd.f32 %v5997_v61, %v1838_v58  ;;  %v1553_v36 = vadd.f32 1e-05, %v1489_v23  ;;  %v1014_v21 = vmul.f32 0.00390625, %v945_v30  ;;  %2957 = vmatprep.subr.mxu0 %v7927_v24 }
 0x252   :  { %v1983_v57 = vadd.f32 %v6000_v7, %v1837_v8  ;;  %v948_v40 = vpop.xlane.xlu1 %947  ;;  %2441 = vmatprep.mubr.f32.mxu1 %v2110_v45  ;;  %v1450_v12 = vadd.f32 %v1264_v60, %v1263_v14  ;;  %v1694_v34 = vmul.f32 %v6344_v11, %v8014_v2  ;;  %v1693_v58 = vmul.f32 %v6344_v11, %v8015_v42  ;;  %v8016_v45 = vld [vmem:[#allocation83_spill] sm:$0xff] }
 0x253   :  { %v6416_v33 = vpop.eup %3918  ;;  %v1490_v16 = vmul.f32 0.00390625, %v1350_v59  ;;  %2442 = vmatmul.mubr.f32.gmra.mxu1 %v2109_v54  ;;  %v2112_v30 = vmax.f32 %v1984_v29, 0.0  ;;  %3924 = vrsqrt.f32 %v1553_v36  ;;  %v6424_v23 = vsub.f32 %v5757_v19, %v1014_v21  ;;  %2958 = vmatpush2.msra.mxu0 %v2875_v63  ;;  %v8017_v29 = vld [vmem:[#allocation22_spill] sm:$0xff] }
 0x254   :  { %v2111_v8 = vmax.f32 %v1983_v57, 0.0  ;;  %v1353_v55 = vpop.xlane.xlu0 %1352  ;;  %v6427_v14 = vsub.f32 %v8016_v45, %v1014_v21  ;;  %1451 = vadd.xlane.f32.xlu1 %v1450_v12  ;;  %v1840_v60 = vmul.f32 %v5986_v37, %v1694_v34  ;;  %v1839_v11 = vmul.f32 %v5989_v50, %v1693_v58  ;;  %2959 = vmatprep.subr.mxu0 %v7927_v24 }
 0x255   :  { %v1554_v42 = vadd.f32 1e-05, %v1490_v16  ;;  %2447 = vmatprep.mubr.f32.mxu1 %v2112_v30  ;;  %v1267_v59 = vmul.f32 %v6424_v23, %v6424_v23  ;;  %v1015_v54 = vmul.f32 0.00390625, %v948_v40  ;;  %v1453_v19 = vadd.f32 %v1266_v5, %v1265_v32  ;;  %v8018_v30 = vld [vmem:[#allocation21_spill] sm:$0xff] }
 0x256   :  { %v1696_v57 = vmul.f32 %v6377_v47, %v8017_v29  ;;  %v951_v36 = vpop.xlane.xlu1 %950  ;;  %v1268_v21 = vmul.f32 %v6427_v14, %v6427_v14  ;;  %v1986_v63 = vadd.f32 %v5997_v61, %v1840_v60  ;;  %v1985_v12 = vadd.f32 %v6000_v7, %v1839_v11 }
 0x257   :  { %3926 = vrsqrt.f32 %v1554_v42  ;;  %v3921_v16 = vpop.eup %3920  ;;  %2448 = vmatmul.mubr.f32.gmra.mxu1 %v2111_v8  ;;  %v6441_v24 = vsub.f32 %v5773_v62, %v1015_v54  ;;  %v6444_v40 = vsub.f32 %v5776_v44, %v1015_v54  ;;  %1454 = vadd.xlane.f32.xlu0 %v1453_v19  ;;  %v1491_v5 = vmul.f32 0.00390625, %v1353_v55  ;;  %v2874_v8 = vld [vmem:[%s7592_s5 + $0x80] sm:$0xff]  ;;  %v8019_v54 = vld [vmem:[#allocation84_spill] sm:$0xff] }
 0x258   :  { %v1842_v32 = vmul.f32 %v5986_v37, %v1696_v57  ;;  %v1356_v2 = vpop.xlane.xlu0 %1355  ;;  %v2114_v34 = vmax.f32 %v1986_v63, 0.0  ;;  %v2113_v58 = vmax.f32 %v1985_v12, 0.0  ;;  %v1695_v45 = vmul.f32 %v6377_v47, %v8018_v30  ;;  %2960 = vmatpush2.msra.mxu0 %v2874_v8  ;;  %v8021_v12 = vld [vmem:[#allocation23_spill] sm:$0xff]  ;;  %v8022_v8 = vld [vmem:[#allocation26_spill] sm:$0xff] }
 0x259   :  { %v1016_v60 = vmul.f32 0.00390625, %v951_v36  ;;  %v1269_v62 = vmul.f32 %v6441_v24, %v6441_v24  ;;  %v1270_v44 = vmul.f32 %v6444_v40, %v6444_v40  ;;  %v1555_v55 = vadd.f32 1e-05, %v1491_v5  ;;  %v8020_v36 = vld [vmem:[#allocation24_spill] sm:$0xff] }
 0x25a   :  { %v1988_v11 = vadd.f32 %v5997_v61, %v1842_v32  ;;  %2453 = vmatprep.mubr.f32.mxu1 %v2114_v34  ;;  %v1841_v42 = vmul.f32 %v5989_v50, %v1695_v45  ;;  %v1456_v29 = vadd.f32 %v1268_v21, %v1267_v59  ;;  %v1698_v63 = vmul.f32 %v6400_v46, %v8020_v36 }
 0x25b   :  { %v6459_v47 = vsub.f32 %v5793_v26, %v1016_v60  ;;  %v6462_v19 = vsub.f32 %v8019_v54, %v1016_v60  ;;  %2454 = vmatmul.mubr.f32.gmra.mxu1 %v2113_v58  ;;  %3928 = vrsqrt.f32 %v1555_v55  ;;  %v1697_v32 = vmul.f32 %v6400_v46, %v8021_v12 }
 0x25c   :  { %v2116_v57 = vmax.f32 %v1988_v11, 0.0  ;;  %v1359_v5 = vpop.xlane.xlu0 %1358  ;;  %v3923_v34 = vpop.eup %3922  ;;  %v1987_v30 = vadd.f32 %v6000_v7, %v1841_v42  ;;  %1457 = vadd.xlane.f32.xlu1 %v1456_v29  ;;  %v1492_v59 = vmul.f32 0.00390625, %v1356_v2  ;;  %v1844_v21 = vmul.f32 %v5986_v37, %v1698_v63  ;;  %v8023_v42 = vld [vmem:[#allocation25_spill] sm:$0xff] }
 0x25d   :  { %v1271_v26 = vmul.f32 %v6459_v47, %v6459_v47  ;;  %v1272_v45 = vmul.f32 %v6462_v19, %v6462_v19  ;;  %v1843_v58 = vmul.f32 %v5989_v50, %v1697_v32  ;;  %v1459_v60 = vadd.f32 %v1270_v44, %v1269_v62 }
 0x25e   :  { %2459 = vmatprep.mubr.f32.mxu1 %v2116_v57  ;;  %v1700_v46 = vmul.f32 %v6416_v33, %v8022_v8  ;;  %v2115_v11 = vmax.f32 %v1987_v30, 0.0  ;;  %v1556_v55 = vadd.f32 1e-05, %v1492_v59  ;;  %v1699_v54 = vmul.f32 %v6416_v33, %v8023_v42  ;;  %v8024_v30 = vld [vmem:[#allocation28_spill] sm:$0xff]  ;;  %v8026_v42 = vld [vmem:[#allocation30_spill] sm:$0xff] }
 0x25f   :  { %v1493_v36 = vmul.f32 0.00390625, %v1359_v5  ;;  %v1990_v12 = vadd.f32 %v5997_v61, %v1844_v21  ;;  %v1989_v29 = vadd.f32 %v6000_v7, %v1843_v58  ;;  %1460 = vadd.xlane.f32.xlu0 %v1459_v60  ;;  %v1462_v57 = vadd.f32 %v1272_v45, %v1271_v26  ;;  %v8025_v21 = vld [vmem:[#allocation27_spill] sm:$0xff] }
 0x260   :  { %v1846_v2 = vmul.f32 %v5986_v37, %v1700_v46  ;;  %v1362_v63 = vpop.xlane.xlu0 %1361  ;;  %v3925_v32 = vpop.eup %3924  ;;  %2460 = vmatmul.mubr.f32.gmra.mxu1 %v2115_v11  ;;  %3930 = vrsqrt.f32 %v1556_v55  ;;  %v1845_v62 = vmul.f32 %v5989_v50, %v1699_v54  ;;  %v1702_v59 = vmul.f32 %v3921_v16, %v8024_v30 }
 0x261   :  { %v1557_v44 = vadd.f32 1e-05, %v1493_v36  ;;  %v2118_v8 = vmax.f32 %v1990_v12, 0.0  ;;  %v2117_v33 = vmax.f32 %v1989_v29, 0.0  ;;  %1463 = vadd.xlane.f32.xlu1 %v1462_v57  ;;  %v1701_v58 = vmul.f32 %v3921_v16, %v8025_v21  ;;  %v8027_v36 = vld [vmem:[#allocation29_spill] sm:$0xff] }
 0x262   :  { %v1992_v5 = vadd.f32 %v5997_v61, %v1846_v2  ;;  %v1991_v60 = vadd.f32 %v6000_v7, %v1845_v62  ;;  %v1848_v26 = vmul.f32 %v5986_v37, %v1702_v59  ;;  %v1494_v45 = vmul.f32 0.00390625, %v1362_v63  ;;  %v8028_v59 = vld [vmem:[#allocation32_spill] sm:$0xff] }
 0x263   :  { %3932 = vrsqrt.f32 %v1557_v44  ;;  %2465 = vmatprep.mubr.f32.mxu1 %v2118_v8  ;;  %v1847_v55 = vmul.f32 %v5989_v50, %v1701_v58  ;;  %v1704_v54 = vmul.f32 %v3923_v34, %v8026_v42  ;;  %v1703_v12 = vmul.f32 %v3923_v34, %v8027_v36  ;;  %v8029_v34 = vld [vmem:[#allocation31_spill] sm:$0xff]  ;;  %v8030_v36 = vld [vmem:[#allocation34_spill] sm:$0xff] }
 0x264   :  { %v3927_v46 = vpop.eup %3926  ;;  %v2120_v11 = vmax.f32 %v1992_v5, 0.0  ;;  %v1365_v29 = vpop.xlane.xlu0 %1364  ;;  %2466 = vmatmul.mubr.f32.gmra.mxu1 %v2117_v33  ;;  %v2119_v2 = vmax.f32 %v1991_v60, 0.0  ;;  %v1994_v16 = vadd.f32 %v5997_v61, %v1848_v26  ;;  %v1558_v57 = vadd.f32 1e-05, %v1494_v45 }
 0x265   :  { %v1495_v62 = vmul.f32 0.00390625, %v1365_v29  ;;  %v1993_v44 = vadd.f32 %v6000_v7, %v1847_v55  ;;  %v1850_v63 = vmul.f32 %v5986_v37, %v1704_v54  ;;  %v1849_v30 = vmul.f32 %v5989_v50, %v1703_v12 }
 0x266   :  { %2471 = vmatprep.mubr.f32.mxu1 %v2120_v11  ;;  %v1706_v8 = vmul.f32 %v3925_v32, %v8028_v59  ;;  %v2122_v5 = vmax.f32 %v1994_v16, 0.0  ;;  %3934 = vrsqrt.f32 %v1558_v57  ;;  %v1705_v58 = vmul.f32 %v3925_v32, %v8029_v34  ;;  %v8031_v16 = vld [vmem:[#allocation33_spill] sm:$0xff] }
 0x267   :  { %v1559_v21 = vadd.f32 1e-05, %v1495_v62  ;;  %v2121_v33 = vmax.f32 %v1993_v44, 0.0  ;;  %v1996_v60 = vadd.f32 %v5997_v61, %v1850_v63  ;;  %v1995_v26 = vadd.f32 %v6000_v7, %v1849_v30  ;;  %v8032_v63 = vld [vmem:[#allocation36_spill] sm:$0xff] }
 0x268   :  { %v1852_v45 = vmul.f32 %v5986_v37, %v1706_v8  ;;  %v1368_v11 = vpop.xlane.xlu0 %1367  ;;  %v3929_v55 = vpop.eup %3928  ;;  %2472 = vmatmul.mubr.f32.gmra.mxu1 %v2119_v2  ;;  %v1851_v42 = vmul.f32 %v5989_v50, %v1705_v58  ;;  %v1708_v12 = vmul.f32 %v3927_v46, %v8030_v36  ;;  %v1707_v57 = vmul.f32 %v3927_v46, %v8031_v16  ;;  %v8033_v8 = vld [vmem:[#allocation35_spill] sm:$0xff]  ;;  %v8034_v36 = vld [vmem:[#allocation38_spill] sm:$0xff] }
 0x269   :  { %3936 = vrsqrt.f32 %v1559_v21  ;;  %v1496_v54 = vmul.f32 0.00390625, %v1368_v11  ;;  %2477 = vmatprep.mubr.f32.mxu1 %v2122_v5  ;;  %v2124_v29 = vmax.f32 %v1996_v60, 0.0  ;;  %v1710_v30 = vmul.f32 %v3929_v55, %v8032_v63 }
 0x26a   :  { %v1998_v32 = vadd.f32 %v5997_v61, %v1852_v45  ;;  %v1854_v44 = vmul.f32 %v5986_v37, %v1708_v12  ;;  %v1709_v2 = vmul.f32 %v3929_v55, %v8033_v8  ;;  %v2123_v21 = vmax.f32 %v1995_v26, 0.0  ;;  %v8035_v55 = vld [vmem:[#allocation37_spill] sm:$0xff] }
 0x26b   :  { %v1560_v62 = vadd.f32 1e-05, %v1496_v54  ;;  %v1997_v34 = vadd.f32 %v6000_v7, %v1851_v42  ;;  %v1853_v58 = vmul.f32 %v5989_v50, %v1707_v57  ;;  %v1856_v11 = vmul.f32 %v5986_v37, %v1710_v30 }
 0x26c   :  { %v1371_v59 = vpop.xlane.xlu0 %1370  ;;  %2478 = vmatmul.mubr.f32.gmra.mxu1 %v2121_v33  ;;  %v2126_v45 = vmax.f32 %v1998_v32, 0.0  ;;  %v2000_v46 = vadd.f32 %v5997_v61, %v1854_v44  ;;  %v1855_v33 = vmul.f32 %v5989_v50, %v1709_v2 }
 0x26d   :  { %v1497_v5 = vmul.f32 0.00390625, %v1371_v59  ;;  %v3931_v60 = vpop.eup %3930  ;;  %2483 = vmatprep.mubr.f32.mxu1 %v2124_v29  ;;  %3938 = vrsqrt.f32 %v1560_v62  ;;  %v2125_v57 = vmax.f32 %v1997_v34, 0.0  ;;  %v1999_v63 = vadd.f32 %v6000_v7, %v1853_v58  ;;  %v8036_v34 = vld [vmem:[#allocation39_spill] sm:$0xff] }
 0x26e   :  { %v1712_v12 = vmul.f32 %v3931_v60, %v8034_v36  ;;  %v1711_v42 = vmul.f32 %v3931_v60, %v8035_v55  ;;  %v2128_v32 = vmax.f32 %v2000_v46, 0.0  ;;  %v2002_v62 = vadd.f32 %v5997_v61, %v1856_v11 }
 0x26f   :  { %v1561_v54 = vadd.f32 1e-05, %v1497_v5  ;;  %v2001_v2 = vadd.f32 %v6000_v7, %v1855_v33  ;;  %v2127_v58 = vmax.f32 %v1999_v63, 0.0  ;;  %v8037_v63 = vld [vmem:[#allocation40_spill] sm:$0xff] }
 0x270   :  { %v3933_v16 = vpop.eup %3932  ;;  %v1374_v26 = vpop.xlane.xlu0 %1373  ;;  %2484 = vmatmul.mubr.f32.gmra.mxu1 %v2123_v21  ;;  %v1858_v44 = vmul.f32 %v5986_v37, %v1712_v12  ;;  %v1857_v5 = vmul.f32 %v5989_v50, %v1711_v42 }
 0x271   :  { %3940 = vrsqrt.f32 %v1561_v54  ;;  %v1498_v29 = vmul.f32 0.00390625, %v1374_v26  ;;  %2489 = vmatprep.mubr.f32.mxu1 %v2126_v45  ;;  %v1714_v30 = vmul.f32 %v3933_v16, %v5818_v20  ;;  %v1713_v60 = vmul.f32 %v3933_v16, %v8036_v34 }
 0x272   :  { %v2130_v54 = vmax.f32 %v2002_v62, 0.0  ;;  %v2004_v20 = vadd.f32 %v5997_v61, %v1858_v44  ;;  %v2129_v33 = vmax.f32 %v2001_v2, 0.0  ;;  %v2003_v26 = vadd.f32 %v6000_v7, %v1857_v5  ;;  %v8038_v2 = vld [vmem:[#allocation42_spill] sm:$0xff] }
 0x273   :  { %v1562_v59 = vadd.f32 1e-05, %v1498_v29  ;;  %v3935_v8 = vpop.eup %3934  ;;  %v1860_v46 = vmul.f32 %v5986_v37, %v1714_v30  ;;  %v1859_v55 = vmul.f32 %v5989_v50, %v1713_v60 }
 0x274   :  { %v1377_v21 = vpop.xlane.xlu0 %1376  ;;  %2490 = vmatmul.mubr.f32.gmra.mxu1 %v2125_v57  ;;  %v1716_v36 = vmul.f32 %v3935_v8, %v5828_v49  ;;  %v1715_v29 = vmul.f32 %v3935_v8, %v8037_v63  ;;  %v2132_v62 = vmax.f32 %v2004_v20, 0.0 }
 0x275   :  { %3942 = vrsqrt.f32 %v1562_v59  ;;  %v1499_v45 = vmul.f32 0.00390625, %v1377_v21  ;;  %2495 = vmatprep.mubr.f32.mxu1 %v2128_v32  ;;  %v2006_v42 = vadd.f32 %v5997_v61, %v1860_v46  ;;  %v2005_v59 = vadd.f32 %v6000_v7, %v1859_v55 }
 0x276   :  { %v3937_v11 = vpop.eup %3936  ;;  %v1862_v49 = vmul.f32 %v5986_v37, %v1716_v36  ;;  %v2131_v21 = vmax.f32 %v2003_v26, 0.0  ;;  %v1861_v60 = vmul.f32 %v5989_v50, %v1715_v29 }
 0x277   :  { %v1563_v12 = vadd.f32 1e-05, %v1499_v45  ;;  %v1718_v32 = vmul.f32 %v3937_v11, %v5838_v1  ;;  %v1717_v5 = vmul.f32 %v3937_v11, %v8038_v2  ;;  %v2134_v34 = vmax.f32 %v2006_v42, 0.0 }
 0x278   :  { %v1380_v16 = vpop.xlane.xlu0 %1379  ;;  %2496 = vmatmul.mubr.f32.gmra.mxu1 %v2127_v58  ;;  %v2008_v45 = vadd.f32 %v5997_v61, %v1862_v49  ;;  %v2133_v20 = vmax.f32 %v2005_v59, 0.0  ;;  %v8040_v49 = vld [vmem:[#allocation43_spill] sm:$0xff] }
 0x279   :  { %v1500_v57 = vmul.f32 0.00390625, %v1380_v16  ;;  %2501 = vmatprep.mubr.f32.mxu1 %v2130_v54  ;;  %3944 = vrsqrt.f32 %v1563_v12  ;;  %v1864_v8 = vmul.f32 %v5986_v37, %v1718_v32  ;;  %v1863_v11 = vmul.f32 %v5989_v50, %v1717_v5  ;;  %v8039_v16 = vld [vmem:[#allocation45_spill] sm:$0xff] }
 0x27a   :  { %v3939_v44 = vpop.eup %3938  ;;  %v2007_v12 = vadd.f32 %v6000_v7, %v1861_v60  ;;  %v2136_v63 = vmax.f32 %v2008_v45, 0.0 }
 0x27b   :  { %v1564_v30 = vadd.f32 1e-05, %v1500_v57  ;;  %v1720_v54 = vmul.f32 %v3939_v44, %v5848_v9  ;;  %v1719_v55 = vmul.f32 %v3939_v44, %v5845_v3  ;;  %v2009_v32 = vadd.f32 %v6000_v7, %v1863_v11  ;;  %v8041_v44 = vld [vmem:[#allocation47_spill] sm:$0xff] }
 0x27c   :  { %2502 = vmatmul.mubr.f32.gmra.mxu1 %v2129_v33  ;;  %v2010_v33 = vadd.f32 %v5997_v61, %v1864_v8  ;;  %v2135_v59 = vmax.f32 %v2007_v12, 0.0  ;;  %v8042_v12 = vld [vmem:[#allocation46_spill] sm:$0xff] }
 0x27d   :  { %v1383_v58 = vpop.xlane.xlu0 %1382  ;;  %2507 = vmatprep.mubr.f32.mxu1 %v2132_v62  ;;  %3946 = vrsqrt.f32 %v1564_v30  ;;  %v1866_v9 = vmul.f32 %v5986_v37, %v1720_v54  ;;  %v1865_v2 = vmul.f32 %v5989_v50, %v1719_v55  ;;  %v2137_v45 = vmax.f32 %v2009_v32, 0.0  ;;  %v8044_v32 = vld [vmem:[#allocation48_spill] sm:$0xff] }
 0x27e   :  { %v3941_v1 = vpop.eup %3940  ;;  %v1501_v46 = vmul.f32 0.00390625, %v1383_v58 }
 0x27f   :  { %v1722_v42 = vmul.f32 %v3941_v1, %v8039_v16  ;;  %v1721_v30 = vmul.f32 %v3941_v1, %v8040_v49  ;;  %v2012_v60 = vadd.f32 %v5997_v61, %v1866_v9  ;;  %v2011_v54 = vadd.f32 %v6000_v7, %v1865_v2  ;;  %v8043_v16 = vld [vmem:[#allocation49_spill] sm:$0xff] }
 0x280   :  { %v1565_v36 = vadd.f32 1e-05, %v1501_v46  ;;  %2508 = vmatmul.mubr.f32.gmra.mxu1 %v2131_v21 }
 0x281   :  { %v1386_v26 = vpop.xlane.xlu0 %1385  ;;  %2513 = vmatprep.mubr.f32.mxu1 %v2134_v34  ;;  %v1868_v3 = vmul.f32 %v5986_v37, %v1722_v42  ;;  %v2138_v34 = vmax.f32 %v2010_v33, 0.0  ;;  %v1867_v1 = vmul.f32 %v5989_v50, %v1721_v30  ;;  %v2140_v33 = vmax.f32 %v2012_v60, 0.0 }
 0x282   :  { %v3943_v57 = vpop.eup %3942  ;;  %3948 = vrsqrt.f32 %v1565_v36  ;;  %v1502_v29 = vmul.f32 0.00390625, %v1386_v26  ;;  %v2139_v49 = vmax.f32 %v2011_v54, 0.0  ;;  %v8046_v54 = vld [vmem:[#allocation50_spill] sm:$0xff] }
 0x283   :  { %v1724_v21 = vmul.f32 %v3943_v57, %v8041_v44  ;;  %v1723_v26 = vmul.f32 %v3943_v57, %v8042_v12  ;;  %v8045_v44 = vld [vmem:[#allocation51_spill] sm:$0xff] }
 0x284   :  { %v1566_v62 = vadd.f32 1e-05, %v1502_v29  ;;  %2514 = vmatmul.mubr.f32.gmra.mxu1 %v2133_v20  ;;  %v2014_v20 = vadd.f32 %v5997_v61, %v1868_v3  ;;  %v2013_v29 = vadd.f32 %v6000_v7, %v1867_v1 }
 0x285   :  { %v1389_v5 = vpop.xlane.xlu0 %1388  ;;  %2519 = vmatprep.mubr.f32.mxu1 %v2136_v63  ;;  %v1870_v11 = vmul.f32 %v5986_v37, %v1724_v21  ;;  %v1869_v2 = vmul.f32 %v5989_v50, %v1723_v26 }
 0x286   :  { %3950 = vrsqrt.f32 %v1566_v62  ;;  %v1503_v58 = vmul.f32 0.00390625, %v1389_v5  ;;  %v3945_v8 = vpop.eup %3944  ;;  %v2142_v30 = vmax.f32 %v2014_v20, 0.0  ;;  %v2141_v60 = vmax.f32 %v2013_v29, 0.0  ;;  %v8048_v29 = vld [vmem:[#allocation52_spill] sm:$0xff] }
 0x287   :  { %v1726_v42 = vmul.f32 %v3945_v8, %v8043_v16  ;;  %v1725_v62 = vmul.f32 %v3945_v8, %v8044_v32 }
 0x288   :  { %v1567_v46 = vadd.f32 1e-05, %v1503_v58  ;;  %2520 = vmatmul.mubr.f32.gmra.mxu1 %v2135_v59  ;;  %v2016_v59 = vadd.f32 %v5997_v61, %v1870_v11 }
 0x289   :  { %v1392_v36 = vpop.xlane.xlu0 %1391  ;;  %2525 = vmatprep.mubr.f32.mxu1 %v2138_v34  ;;  %v1872_v3 = vmul.f32 %v5986_v37, %v1726_v42  ;;  %v1871_v8 = vmul.f32 %v5989_v50, %v1725_v62 }
 0x28a   :  { %3952 = vrsqrt.f32 %v1567_v46  ;;  %v1504_v55 = vmul.f32 0.00390625, %v1392_v36  ;;  %v3947_v63 = vpop.eup %3946  ;;  %v2015_v46 = vadd.f32 %v6000_v7, %v1869_v2  ;;  %v8047_v36 = vld [vmem:[#allocation53_spill] sm:$0xff] }
 0x28b   :  { %v1728_v21 = vmul.f32 %v3947_v63, %v8045_v44  ;;  %v1727_v20 = vmul.f32 %v3947_v63, %v8046_v54  ;;  %v2018_v12 = vadd.f32 %v5997_v61, %v1872_v3  ;;  %v2017_v16 = vadd.f32 %v6000_v7, %v1871_v8 }
 0x28c   :  { %v1568_v9 = vadd.f32 1e-05, %v1504_v55  ;;  %2526 = vmatmul.mubr.f32.gmra.mxu1 %v2137_v45  ;;  %v2144_v45 = vmax.f32 %v2016_v59, 0.0  ;;  %v2143_v32 = vmax.f32 %v2015_v46, 0.0 }
 0x28d   :  { %v1395_v57 = vpop.xlane.xlu0 %1394  ;;  %2531 = vmatprep.mubr.f32.mxu1 %v2140_v33  ;;  %v1874_v33 = vmul.f32 %v5986_v37, %v1728_v21  ;;  %v1873_v62 = vmul.f32 %v5989_v50, %v1727_v20  ;;  %v2146_v2 = vmax.f32 %v2018_v12, 0.0  ;;  %v2145_v44 = vmax.f32 %v2017_v16, 0.0  ;;  %v8052_v16 = vld [vmem:[#allocation86_spill] sm:$0xff] }
 0x28e   :  { %3954 = vrsqrt.f32 %v1568_v9  ;;  %v1505_v5 = vmul.f32 0.00390625, %v1395_v57 }
 0x28f   :  { %v3949_v34 = vpop.eup %3948  ;;  %v2020_v57 = vadd.f32 %v5997_v61, %v1874_v33 }
 0x290   :  { %v1569_v58 = vadd.f32 1e-05, %v1505_v5  ;;  %2532 = vmatmul.mubr.f32.gmra.mxu1 %v2139_v49  ;;  %v1730_v11 = vmul.f32 %v3949_v34, %v8047_v36  ;;  %v1729_v9 = vmul.f32 %v3949_v34, %v8048_v29  ;;  %v8051_v36 = vld [vmem:[#allocation87_spill] sm:$0xff] }
 0x291   :  { %v1398_v1 = vpop.xlane.xlu0 %1397  ;;  %2537 = vmatprep.mubr.f32.mxu1 %v2142_v30  ;;  %v8049_v30 = vld [vmem:[#allocation85_spill] sm:$0xff]  ;;  %v2148_v54 = vmax.f32 %v2020_v57, 0.0 }
 0x292   :  { %3956 = vrsqrt.f32 %v1569_v58  ;;  %v1506_v26 = vmul.f32 0.00390625, %v1398_v1  ;;  %v1876_v49 = vmul.f32 %v5986_v37, %v1730_v11  ;;  %v1875_v34 = vmul.f32 %v5989_v50, %v1729_v9  ;;  %v8050_v1 = vld [vmem:[#allocation54_spill] sm:$0xff] }
 0x293   :  { %v3951_v55 = vpop.eup %3950 }
 0x294   :  { %v1570_v42 = vadd.f32 1e-05, %v1506_v26  ;;  %2538 = vmatmul.mubr.f32.gmra.mxu1 %v2141_v60  ;;  %v1732_v59 = vmul.f32 %v3951_v55, %v8049_v30  ;;  %v2019_v60 = vadd.f32 %v6000_v7, %v1873_v62  ;;  %v2022_v58 = vadd.f32 %v5997_v61, %v1876_v49  ;;  %v8053_v30 = vld [vmem:[#allocation89_spill] sm:$0xff] }
 0x295   :  { %v1401_v63 = vpop.xlane.xlu0 %1400  ;;  %2543 = vmatprep.mubr.f32.mxu1 %v2144_v45  ;;  %v1731_v45 = vmul.f32 %v3951_v55, %v8050_v1  ;;  %v2021_v26 = vadd.f32 %v6000_v7, %v1875_v34 }
 0x296   :  { %3958 = vrsqrt.f32 %v1570_v42  ;;  %v1507_v5 = vmul.f32 0.00390625, %v1401_v63  ;;  %v1878_v46 = vmul.f32 %v5986_v37, %v1732_v59  ;;  %v2147_v29 = vmax.f32 %v2019_v60, 0.0  ;;  %v8054_v60 = vld [vmem:[#allocation88_spill] sm:$0xff] }
 0x297   :  { %v3953_v3 = vpop.eup %3952  ;;  %v2150_v9 = vmax.f32 %v2022_v58, 0.0  ;;  %v1877_v62 = vmul.f32 %v5989_v50, %v1731_v45  ;;  %v2149_v57 = vmax.f32 %v2021_v26, 0.0 }
 0x298   :  { %v1571_v21 = vadd.f32 1e-05, %v1507_v5  ;;  %2544 = vmatmul.mubr.f32.gmra.mxu1 %v2143_v32  ;;  %v1734_v11 = vmul.f32 %v3953_v3, %v8051_v36  ;;  %v1733_v42 = vmul.f32 %v3953_v3, %v8052_v16  ;;  %v2024_v32 = vadd.f32 %v5997_v61, %v1878_v46 }
 0x299   :  { %v1404_v8 = vpop.xlane.xlu0 %1403  ;;  %2549 = vmatprep.mubr.f32.mxu1 %v2146_v2 }
 0x29a   :  { %3960 = vrsqrt.f32 %v1571_v21  ;;  %v1508_v20 = vmul.f32 0.00390625, %v1404_v8  ;;  %v1880_v49 = vmul.f32 %v5986_v37, %v1734_v11  ;;  %v1879_v3 = vmul.f32 %v5989_v50, %v1733_v42  ;;  %v8055_v11 = vld [vmem:[#allocation90_spill] sm:$0xff] }
 0x29b   :  { %v3955_v12 = vpop.eup %3954  ;;  %v2023_v21 = vadd.f32 %v6000_v7, %v1877_v62 }
 0x29c   :  { %v1572_v33 = vadd.f32 1e-05, %v1508_v20  ;;  %2550 = vmatmul.mubr.f32.gmra.mxu1 %v2145_v44  ;;  %v1736_v59 = vmul.f32 %v3955_v12, %v8053_v30  ;;  %v2152_v44 = vmax.f32 %v2024_v32, 0.0  ;;  %v1735_v58 = vmul.f32 %v3955_v12, %v8054_v60 }
 0x29d   :  { %v1407_v55 = vpop.xlane.xlu0 %1406  ;;  %2555 = vmatprep.mubr.f32.mxu1 %v2148_v54  ;;  %v2026_v46 = vadd.f32 %v5997_v61, %v1880_v49  ;;  %v2025_v36 = vadd.f32 %v6000_v7, %v1879_v3 }
 0x29e   :  { %3962 = vrsqrt.f32 %v1572_v33  ;;  %v1509_v63 = vmul.f32 0.00390625, %v1407_v55  ;;  %v1882_v45 = vmul.f32 %v5986_v37, %v1736_v59  ;;  %v2151_v33 = vmax.f32 %v2023_v21, 0.0 }
 0x29f   :  { %v3957_v2 = vpop.eup %3956  ;;  %v1881_v16 = vmul.f32 %v5989_v50, %v1735_v58  ;;  %v2153_v55 = vmax.f32 %v2025_v36, 0.0 }
 0x2a0   :  { %v1573_v5 = vadd.f32 1e-05, %v1509_v63  ;;  %2556 = vmatmul.mubr.f32.gmra.mxu1 %v2147_v29  ;;  %v1410_v34 = vpop.xlane.xlu1 %1409  ;;  %v1738_v8 = vmul.f32 %v3957_v2, %v5980_v56  ;;  %v1737_v26 = vmul.f32 %v3957_v2, %v8055_v11  ;;  %v2154_v29 = vmax.f32 %v2026_v46, 0.0 }
 0x2a1   :  { %2561 = vmatprep.mubr.f32.mxu1 %v2150_v9  ;;  %v1510_v1 = vmul.f32 0.00390625, %v1410_v34  ;;  %v2028_v9 = vadd.f32 %v5997_v61, %v1882_v45  ;;  %v2027_v30 = vadd.f32 %v6000_v7, %v1881_v16 }
 0x2a2   :  { %3964 = vrsqrt.f32 %v1573_v5  ;;  %v1884_v56 = vmul.f32 %v5986_v37, %v1738_v8  ;;  %v1883_v49 = vmul.f32 %v5989_v50, %v1737_v26 }
 0x2a3   :  { %v3959_v54 = vpop.eup %3958  ;;  %v1574_v20 = vadd.f32 1e-05, %v1510_v1  ;;  %v2156_v3 = vmax.f32 %v2028_v9, 0.0  ;;  %v2155_v46 = vmax.f32 %v2027_v30, 0.0 }
 0x2a4   :  { %2562 = vmatmul.mubr.f32.gmra.mxu1 %v2149_v57  ;;  %v1413_v12 = vpop.xlane.xlu0 %1412  ;;  %v1740_v42 = vmul.f32 %v3959_v54, %v6006_v4  ;;  %v2030_v59 = vadd.f32 %v5997_v61, %v1884_v56  ;;  %v8056_v4 = vld [vmem:[#allocation55_spill] sm:$0xff]  ;;  %v2029_v58 = vadd.f32 %v6000_v7, %v1883_v49 }
 0x2a5   :  { %2567 = vmatprep.mubr.f32.mxu1 %v2152_v44  ;;  %3966 = vrsqrt.f32 %v1574_v20  ;;  %v1511_v32 = vmul.f32 0.00390625, %v1413_v12  ;;  %v1739_v5 = vmul.f32 %v3959_v54, %v8056_v4 }
 0x2a6   :  { %v1886_v57 = vmul.f32 %v5986_v37, %v1740_v42  ;;  %v2158_v1 = vmax.f32 %v2030_v59, 0.0 }
 0x2a7   :  { %v3961_v62 = vpop.eup %3960  ;;  %v1575_v63 = vadd.f32 1e-05, %v1511_v32  ;;  %v1885_v20 = vmul.f32 %v5989_v50, %v1739_v5 }
 0x2a8   :  { %2568 = vmatmul.mubr.f32.gmra.mxu1 %v2151_v33  ;;  %v1416_v2 = vpop.xlane.xlu1 %1415  ;;  %v1742_v21 = vmul.f32 %v3961_v62, %v6026_v17  ;;  %v1741_v8 = vmul.f32 %v3961_v62, %v6023_v35  ;;  %v2032_v45 = vadd.f32 %v5997_v61, %v1886_v57  ;;  %v2157_v33 = vmax.f32 %v2029_v58, 0.0 }
 0x2a9   :  { %2573 = vmatprep.mubr.f32.mxu1 %v2154_v29  ;;  %3968 = vrsqrt.f32 %v1575_v63  ;;  %v1512_v44 = vmul.f32 0.00390625, %v1416_v2  ;;  %v2031_v56 = vadd.f32 %v6000_v7, %v1885_v20 }
 0x2aa   :  { %v1888_v11 = vmul.f32 %v5986_v37, %v1742_v21  ;;  %v1887_v35 = vmul.f32 %v5989_v50, %v1741_v8  ;;  %v2160_v12 = vmax.f32 %v2032_v45, 0.0 }
 0x2ab   :  { %v3963_v34 = vpop.eup %3962  ;;  %v1576_v60 = vadd.f32 1e-05, %v1512_v44  ;;  %v2159_v30 = vmax.f32 %v2031_v56, 0.0 }
 0x2ac   :  { %2574 = vmatmul.mubr.f32.gmra.mxu1 %v2153_v55  ;;  %v1419_v54 = vpop.xlane.xlu0 %1418  ;;  %v1744_v17 = vmul.f32 %v3963_v34, %v6044_v41  ;;  %v1743_v29 = vmul.f32 %v3963_v34, %v6041_v28  ;;  %v2034_v32 = vadd.f32 %v5997_v61, %v1888_v11  ;;  %v2033_v49 = vadd.f32 %v6000_v7, %v1887_v35 }
 0x2ad   :  { %2579 = vmatprep.mubr.f32.mxu1 %v2156_v3  ;;  %3970 = vrsqrt.f32 %v1576_v60  ;;  %v1513_v36 = vmul.f32 0.00390625, %v1419_v54 }
 0x2ae   :  { %v1890_v41 = vmul.f32 %v5986_v37, %v1744_v17  ;;  %v1889_v59 = vmul.f32 %v5989_v50, %v1743_v29  ;;  %v2161_v44 = vmax.f32 %v2033_v49, 0.0 }
 0x2af   :  { %v3965_v26 = vpop.eup %3964  ;;  %v1577_v16 = vadd.f32 1e-05, %v1513_v36 }
 0x2b0   :  { %2580 = vmatmul.mubr.f32.gmra.mxu1 %v2155_v46  ;;  %v1422_v42 = vpop.xlane.xlu1 %1421  ;;  %v1746_v9 = vmul.f32 %v3965_v26, %v6063_v48  ;;  %v1745_v28 = vmul.f32 %v3965_v26, %v6060_v0  ;;  %v2162_v48 = vmax.f32 %v2034_v32, 0.0  ;;  %v2036_v57 = vadd.f32 %v5997_v61, %v1890_v41 }
 0x2b1   :  { %2585 = vmatprep.mubr.f32.mxu1 %v2158_v1  ;;  %3972 = vrsqrt.f32 %v1577_v16  ;;  %v1514_v62 = vmul.f32 0.00390625, %v1422_v42  ;;  %v2035_v34 = vadd.f32 %v6000_v7, %v1889_v59 }
 0x2b2   :  { %v3967_v55 = vpop.eup %3966  ;;  %v1892_v2 = vmul.f32 %v5986_v37, %v1746_v9  ;;  %v1891_v58 = vmul.f32 %v5989_v50, %v1745_v28  ;;  %v2164_v8 = vmax.f32 %v2036_v57, 0.0 }
 0x2b3   :  { %v1578_v63 = vadd.f32 1e-05, %v1514_v62  ;;  %v1748_v4 = vmul.f32 %v3967_v55, %v6082_v39  ;;  %v1747_v0 = vmul.f32 %v3967_v55, %v6079_v53  ;;  %v2163_v11 = vmax.f32 %v2035_v34, 0.0  ;;  %v8058_v34 = vld [vmem:[#allocation3_spill] sm:$0xff] }
 0x2b4   :  { %2586 = vmatmul.mubr.f32.gmra.mxu1 %v2157_v33  ;;  %v2038_v60 = vadd.f32 %v5997_v61, %v1892_v2  ;;  %v2037_v26 = vadd.f32 %v6000_v7, %v1891_v58  ;;  %v2269_v2 = vld [vmem:[%s7593_s4] sm:$0x3] }
 0x2b5   :  { %2591 = vmatprep.mubr.f32.mxu1 %v2160_v12  ;;  %3974 = vrsqrt.f32 %v1578_v63  ;;  %v1425_v3 = vpop.xlane.xlu0 %1424  ;;  %v1894_v1 = vmul.f32 %v5986_v37, %v1748_v4  ;;  %v1893_v53 = vmul.f32 %v5989_v50, %v1747_v0 }
 0x2b6   :  { %v3969_v5 = vpop.eup %3968  ;;  %v1515_v21 = vmul.f32 0.00390625, %v1425_v3  ;;  %v2166_v17 = vmax.f32 %v2038_v60, 0.0  ;;  %v2165_v9 = vmax.f32 %v2037_v26, 0.0  ;;  %v8057_v3 = vld [vmem:[#allocation57_spill] sm:$0xff]  ;;  %v6648_v60 = vrot.slane %v2269_v2, %v8058_v34 }
 0x2b7   :  { %v1750_v39 = vmul.f32 %v3969_v5, %v6100_v6  ;;  %v1749_v36 = vmul.f32 %v3969_v5, %v6097_v10  ;;  %v2040_v16 = vadd.f32 %v5997_v61, %v1894_v1  ;;  %v2039_v32 = vadd.f32 %v6000_v7, %v1893_v53  ;;  %v8061_v53 = vld [vmem:[#allocation59_spill] sm:$0xff] }
 0x2b8   :  { %2592 = vmatmul.mubr.f32.gmra.mxu1 %v2159_v30  ;;  %v1579_v46 = vadd.f32 1e-05, %v1515_v21 }
 0x2b9   :  { %2597 = vmatprep.mubr.f32.mxu1 %v2162_v48  ;;  %v1896_v35 = vmul.f32 %v5986_v37, %v1750_v39  ;;  %v1895_v10 = vmul.f32 %v5989_v50, %v1749_v36  ;;  %v2168_v41 = vmax.f32 %v2040_v16, 0.0  ;;  %v2167_v28 = vmax.f32 %v2039_v32, 0.0  ;;  %v8060_v36 = vld [vmem:[#allocation56_spill] sm:$0xff] }
 0x2ba   :  { %v3971_v45 = vpop.eup %3970  ;;  %v1428_v20 = vpop.xlane.xlu1 %1427  ;;  %3976 = vrsqrt.f32 %v1579_v46  ;;  %v8059_v46 = vld [vmem:[#allocation2_spill] sm:$0xff] }
 0x2bb   :  { %v1516_v54 = vmul.f32 0.00390625, %v1428_v20  ;;  %v1752_v6 = vmul.f32 %v3971_v45, %v6119_v38  ;;  %v1751_v29 = vmul.f32 %v3971_v45, %v6116_v18  ;;  %v2042_v63 = vadd.f32 %v5997_v61, %v1896_v35 }
 0x2bc   :  { %2598 = vmatmul.mubr.f32.gmra.mxu1 %v2161_v44  ;;  %v2041_v59 = vadd.f32 %v6000_v7, %v1895_v10  ;;  %v6653_v1 = vrot.slane %v2269_v2, %v8059_v46  ;;  %v8063_v2 = vld [vmem:[#allocation41_spill] sm:$0xff] }
 0x2bd   :  { %2603 = vmatprep.mubr.f32.mxu1 %v2164_v8  ;;  %v1580_v33 = vadd.f32 1e-05, %v1516_v54  ;;  %v1898_v38 = vmul.f32 %v5986_v37, %v1752_v6  ;;  %v1897_v18 = vmul.f32 %v5989_v50, %v1751_v29  ;;  %v2170_v4 = vmax.f32 %v2042_v63, 0.0 }
 0x2be   :  { %v3973_v12 = vpop.eup %3972  ;;  %v2169_v58 = vmax.f32 %v2041_v59, 0.0 }
 0x2bf   :  { %v1431_v56 = vpop.xlane.xlu0 %1430  ;;  %3978 = vrsqrt.f32 %v1580_v33  ;;  %v1754_v62 = vmul.f32 %v3973_v12, %v6137_v52  ;;  %v1753_v52 = vmul.f32 %v3973_v12, %v6134_v22  ;;  %v2044_v5 = vadd.f32 %v5997_v61, %v1898_v38  ;;  %v8062_v12 = vld [vmem:[#allocation58_spill] sm:$0xff] }
 0x2c0   :  { %v1517_v42 = vmul.f32 0.00390625, %v1431_v56  ;;  %2604 = vmatmul.mubr.f32.gmra.mxu1 %v2163_v11  ;;  %v2043_v0 = vadd.f32 %v6000_v7, %v1897_v18 }
 0x2c1   :  { %2609 = vmatprep.mubr.f32.mxu1 %v2166_v17  ;;  %v1900_v57 = vmul.f32 %v5986_v37, %v1754_v62  ;;  %v1899_v22 = vmul.f32 %v5989_v50, %v1753_v52  ;;  %v2172_v17 = vmax.f32 %v2044_v5, 0.0 }
 0x2c2   :  { %v1581_v55 = vadd.f32 1e-05, %v1517_v42  ;;  %v3975_v49 = vpop.eup %3974 }
 0x2c3   :  { %v1434_v30 = vpop.xlane.xlu1 %1433  ;;  %v1756_v44 = vmul.f32 %v3975_v49, %v8057_v3  ;;  %v2046_v20 = vadd.f32 %v5997_v61, %v1900_v57  ;;  %v1755_v11 = vmul.f32 %v3975_v49, %v8060_v36  ;;  %v2045_v42 = vadd.f32 %v6000_v7, %v1899_v22  ;;  %v8064_v3 = vld [vmem:[#allocation61_spill] sm:$0xff] }
 0x2c4   :  { %3980 = vrsqrt.f32 %v1581_v55  ;;  %2610 = vmatmul.mubr.f32.gmra.mxu1 %v2165_v9  ;;  %v1518_v48 = vmul.f32 0.00390625, %v1434_v30  ;;  %v2171_v9 = vmax.f32 %v2043_v0, 0.0 }
 0x2c5   :  { %2615 = vmatprep.mubr.f32.mxu1 %v2168_v41  ;;  %v1902_v26 = vmul.f32 %v5986_v37, %v1756_v44  ;;  %v2174_v32 = vmax.f32 %v2046_v20, 0.0  ;;  %v1901_v41 = vmul.f32 %v5989_v50, %v1755_v11 }
 0x2c6   :  { %v1582_v21 = vadd.f32 1e-05, %v1518_v48  ;;  %v2173_v48 = vmax.f32 %v2045_v42, 0.0 }
 0x2c7   :  { %v1437_v8 = vpop.xlane.xlu0 %1436  ;;  %v3977_v39 = vpop.eup %3976  ;;  %v2048_v38 = vadd.f32 %v5997_v61, %v1902_v26  ;;  %v2047_v34 = vadd.f32 %v6000_v7, %v1901_v41  ;;  %v8065_v26 = vld [vmem:[#allocation60_spill] sm:$0xff] }
 0x2c8   :  { %2616 = vmatmul.mubr.f32.gmra.mxu1 %v2167_v28  ;;  %3982 = vrsqrt.f32 %v1582_v21  ;;  %v1519_v45 = vmul.f32 0.00390625, %v1437_v8  ;;  %v1758_v33 = vmul.f32 %v3977_v39, %v8061_v53  ;;  %v1757_v56 = vmul.f32 %v3977_v39, %v8062_v12 }
 0x2c9   :  { %v2347_v54 = vpop.f32.mrf.mxu1  ;;  %2621 = vmatprep.mubr.f32.mxu1 %v2170_v4  ;;  %v2176_v22 = vmax.f32 %v2048_v38, 0.0 }
 0x2ca   :  { %v1583_v16 = vadd.f32 1e-05, %v1519_v45  ;;  %v2348_v35 = vadd.f32 %v2347_v54, %v6648_v60  ;;  %v1904_v30 = vmul.f32 %v5986_v37, %v1758_v33  ;;  %v1903_v18 = vmul.f32 %v5989_v50, %v1757_v56 }
 0x2cb   :  { %v2349_v6 = vpop.f32.mrf.mxu1  ;;  %v2175_v33 = vmax.f32 %v2047_v34, 0.0 }
 0x2cc   :  { %v2350_v10 = vadd.f32 %v2349_v6, %v6653_v1  ;;  %v3979_v29 = vpop.eup %3978  ;;  %2622 = vmatmul.mubr.f32.gmra.mxu1 %v2169_v58  ;;  %3984 = vrsqrt.f32 %v1583_v16  ;;  %v1440_v62 = vpop.xlane.xlu1 %1439  ;;  %v2730_v59 = vmax.f32 %v2348_v35, 0.0  ;;  %v2050_v46 = vadd.f32 %v5997_v61, %v1904_v30  ;;  %v8067_v30 = vld [vmem:[#allocation63_spill] sm:$0xff] }
 0x2cd   :  { %2627 = vmatprep.mubr.f32.mxu1 %v2172_v17  ;;  %v1520_v55 = vmul.f32 0.00390625, %v1440_v62  ;;  %v1760_v52 = vmul.f32 %v3979_v29, %v8063_v2  ;;  %v1759_v44 = vmul.f32 %v3979_v29, %v8064_v3  ;;  %v2049_v54 = vadd.f32 %v6000_v7, %v1903_v18 }
 0x2ce   :  { %v2731_v63 = vmax.f32 %v2350_v10, 0.0  ;;  %v2353_v49 = vpop.f32.mrf.mxu1 }
 0x2cf   :  { %v1584_v28 = vadd.f32 1e-05, %v1520_v55  ;;  %v2354_v57 = vadd.f32 %v2353_v49, %v6648_v60  ;;  %v1443_v4 = vpop.xlane.xlu0 %1442  ;;  %v1906_v8 = vmul.f32 %v5986_v37, %v1760_v52  ;;  %v1905_v17 = vmul.f32 %v5989_v50, %v1759_v44 }
 0x2d0   :  { %v2355_v5 = vpop.f32.mrf.mxu1  ;;  %2961 = vmatprep.mubr.f32.mxu0 %v2731_v63  ;;  %2628 = vmatmul.mubr.f32.gmra.mxu1 %v2171_v9  ;;  %v1521_v58 = vmul.f32 0.00390625, %v1443_v4  ;;  %v2177_v29 = vmax.f32 %v2049_v54, 0.0 }
 0x2d1   :  { %v3981_v21 = vpop.eup %3980  ;;  %v2356_v0 = vadd.f32 %v2355_v5, %v6653_v1  ;;  %2962 = vmatmul.mubr.f32.vlgmr.msra.gmra.mxu0 %v2730_v59  ;;  %2633 = vmatprep.mubr.f32.mxu1 %v2174_v32  ;;  %3986 = vrsqrt.f32 %v1584_v28  ;;  %v2732_v36 = vmax.f32 %v2354_v57, 0.0  ;;  %v2052_v35 = vadd.f32 %v5997_v61, %v1906_v8  ;;  %v8066_v32 = vld [vmem:[#allocation6_spill] sm:$0xff] }
 0x2d2   :  { %v1762_v39 = vmul.f32 %v3981_v21, %v6216_v15  ;;  %v1585_v45 = vadd.f32 1e-05, %v1521_v58  ;;  %v1761_v53 = vmul.f32 %v3981_v21, %v8065_v26  ;;  %v2178_v15 = vmax.f32 %v2050_v46, 0.0 }
 0x2d3   :  { %v2733_v20 = vmax.f32 %v2356_v0, 0.0  ;;  %v2359_v11 = vpop.f32.mrf.mxu1  ;;  %v2051_v63 = vadd.f32 %v6000_v7, %v1905_v17  ;;  %v2180_v2 = vmax.f32 %v2052_v35, 0.0  ;;  %v8068_v0 = vld [vmem:[#allocation71_spill] sm:$0xff] }
 0x2d4   :  { %2634 = vmatmul.mubr.f32.gmra.mxu1 %v2173_v48  ;;  %3988 = vrsqrt.f32 %v1585_v45  ;;  %v1446_v16 = vpop.xlane.xlu1 %1445  ;;  %v2360_v56 = vadd.f32 %v2359_v11, %v6648_v60  ;;  %v1908_v10 = vmul.f32 %v5986_v37, %v1762_v39  ;;  %v1907_v49 = vmul.f32 %v5989_v50, %v1761_v53 }
 0x2d5   :  { %2966 = vmatprep.mubr.f32.mxu0 %v2733_v20  ;;  %v3983_v6 = vpop.eup %3982  ;;  %2639 = vmatprep.mubr.f32.mxu1 %v2176_v22  ;;  %v1522_v12 = vmul.f32 0.00390625, %v1446_v16  ;;  %v2361_v42 = vpop.f32.mrf.mxu1  ;;  %v8069_v22 = vld [vmem:[#allocation62_spill] sm:$0xff]  ;;  %v2179_v39 = vmax.f32 %v2051_v63, 0.0 }
 0x2d6   :  { %2967 = vmatmul.mubr.f32.gmra.mxu0 %v2732_v36  ;;  %v2362_v9 = vadd.f32 %v2361_v42, %v6653_v1  ;;  %v1764_v62 = vmul.f32 %v3983_v6, %v8066_v32  ;;  %v1763_v59 = vmul.f32 %v3983_v6, %v8067_v30  ;;  %v2734_v57 = vmax.f32 %v2360_v56, 0.0  ;;  %v8070_v32 = vld [vmem:[#allocation65_spill] sm:$0xff] }
 0x2d7   :  { %v1586_v41 = vadd.f32 1e-05, %v1522_v12  ;;  %v2054_v3 = vadd.f32 %v5997_v61, %v1908_v10  ;;  %v2053_v34 = vadd.f32 %v6000_v7, %v1907_v49 }
 0x2d8   :  { %v2365_v55 = vpop.f32.mrf.mxu1  ;;  %v1449_v38 = vpop.xlane.xlu0 %1448  ;;  %2640 = vmatmul.mubr.f32.gmra.mxu1 %v2175_v33  ;;  %v2735_v18 = vmax.f32 %v2362_v9, 0.0  ;;  %v1910_v28 = vmul.f32 %v5986_v37, %v1764_v62  ;;  %v1909_v58 = vmul.f32 %v5989_v50, %v1763_v59 }
 0x2d9   :  { %v1523_v52 = vmul.f32 0.00390625, %v1449_v38  ;;  %v3985_v48 = vpop.eup %3984  ;;  %2645 = vmatprep.mubr.f32.mxu1 %v2178_v15  ;;  %3990 = vrsqrt.f32 %v1586_v41  ;;  %v2366_v4 = vadd.f32 %v2365_v55, %v6648_v60  ;;  %v2182_v11 = vmax.f32 %v2054_v3, 0.0 }
 0x2da   :  { %v2367_v5 = vpop.f32.mrf.mxu1  ;;  %2971 = vmatprep.mubr.f32.mxu0 %v2735_v18  ;;  %v1766_v8 = vmul.f32 %v3985_v48, %v8068_v0  ;;  %v1765_v46 = vmul.f32 %v3985_v48, %v8069_v22  ;;  %v2056_v54 = vadd.f32 %v5997_v61, %v1910_v28  ;;  %v2181_v6 = vmax.f32 %v2053_v34, 0.0 }
 0x2db   :  { %v1587_v44 = vadd.f32 1e-05, %v1523_v52  ;;  %v2368_v21 = vadd.f32 %v2367_v5, %v6653_v1  ;;  %2972 = vmatmul.mubr.f32.gmra.mxu0 %v2734_v57  ;;  %v2736_v36 = vmax.f32 %v2366_v4, 0.0  ;;  %v2055_v12 = vadd.f32 %v6000_v7, %v1909_v58 }
 0x2dc   :  { %2646 = vmatmul.mubr.f32.gmra.mxu1 %v2177_v29  ;;  %v2371_v20 = vpop.f32.mrf.mxu1  ;;  %v1912_v53 = vmul.f32 %v5986_v37, %v1766_v8  ;;  %v1911_v56 = vmul.f32 %v5989_v50, %v1765_v46  ;;  %v2184_v10 = vmax.f32 %v2056_v54, 0.0 }
 0x2dd   :  { %3992 = vrsqrt.f32 %v1587_v44  ;;  %v2737_v45 = vmax.f32 %v2368_v21, 0.0  ;;  %2651 = vmatprep.mubr.f32.mxu1 %v2180_v2  ;;  %v1452_v17 = vpop.xlane.xlu1 %1451  ;;  %v2372_v26 = vadd.f32 %v2371_v20, %v6648_v60  ;;  %v2183_v57 = vmax.f32 %v2055_v12, 0.0 }
 0x2de   :  { %v3987_v33 = vpop.eup %3986  ;;  %v1524_v16 = vmul.f32 0.00390625, %v1452_v17  ;;  %v2373_v35 = vpop.f32.mrf.mxu1  ;;  %v2058_v49 = vadd.f32 %v5997_v61, %v1912_v53 }
 0x2df   :  { %2976 = vmatprep.mubr.f32.mxu0 %v2737_v45  ;;  %v2374_v15 = vadd.f32 %v2373_v35, %v6653_v1  ;;  %v1768_v9 = vmul.f32 %v3987_v33, %v6273_v31  ;;  %v1767_v62 = vmul.f32 %v3987_v33, %v8070_v32  ;;  %v2738_v55 = vmax.f32 %v2372_v26, 0.0 }
 0x2e0   :  { %2977 = vmatmul.mubr.f32.gmra.mxu0 %v2736_v36  ;;  %2652 = vmatmul.mubr.f32.gmra.mxu1 %v2179_v39  ;;  %v1588_v42 = vadd.f32 1e-05, %v1524_v16  ;;  %v1455_v29 = vpop.xlane.xlu0 %1454  ;;  %v2057_v31 = vadd.f32 %v6000_v7, %v1911_v56  ;;  %v2186_v5 = vmax.f32 %v2058_v49, 0.0 }
 0x2e1   :  { %v3989_v41 = vpop.eup %3988  ;;  %2657 = vmatprep.mubr.f32.mxu1 %v2182_v11  ;;  %v2739_v63 = vmax.f32 %v2374_v15, 0.0  ;;  %v1525_v38 = vmul.f32 0.00390625, %v1455_v29  ;;  %v1914_v30 = vmul.f32 %v5986_v37, %v1768_v9  ;;  %v1913_v59 = vmul.f32 %v5989_v50, %v1767_v62 }
 0x2e2   :  { %3994 = vrsqrt.f32 %v1588_v42  ;;  %v1770_v18 = vmul.f32 %v3989_v41, %v6302_v25  ;;  %v2377_v2 = vpop.f32.mrf.mxu1  ;;  %v1769_v28 = vmul.f32 %v3989_v41, %v6299_v43  ;;  %v2185_v22 = vmax.f32 %v2057_v31, 0.0  ;;  %v8071_v42 = vld [vmem:[#allocation72_spill] sm:$0xff] }
 0x2e3   :  { %v1589_v52 = vadd.f32 1e-05, %v1525_v38  ;;  %2981 = vmatprep.mubr.f32.mxu0 %v2739_v63  ;;  %v2378_v48 = vadd.f32 %v2377_v2, %v6648_v60  ;;  %v2060_v44 = vadd.f32 %v5997_v61, %v1914_v30  ;;  %v2059_v43 = vadd.f32 %v6000_v7, %v1913_v59  ;;  %v8072_v41 = vld [vmem:[#allocation64_spill] sm:$0xff] }
 0x2e4   :  { %2658 = vmatmul.mubr.f32.gmra.mxu1 %v2181_v6  ;;  %2982 = vmatmul.mubr.f32.gmra.mxu0 %v2738_v55  ;;  %v2379_v4 = vpop.f32.mrf.mxu1  ;;  %v1916_v25 = vmul.f32 %v5986_v37, %v1770_v18  ;;  %v1915_v46 = vmul.f32 %v5989_v50, %v1769_v28 }
 0x2e5   :  { %2663 = vmatprep.mubr.f32.mxu1 %v2184_v10  ;;  %3996 = vrsqrt.f32 %v1589_v52  ;;  %v1458_v3 = vpop.xlane.xlu1 %1457  ;;  %v2380_v34 = vadd.f32 %v2379_v4, %v6653_v1  ;;  %v2740_v0 = vmax.f32 %v2378_v48, 0.0  ;;  %v2188_v33 = vmax.f32 %v2060_v44, 0.0 }
 0x2e6   :  { %v3991_v21 = vpop.eup %3990  ;;  %v1526_v58 = vmul.f32 0.00390625, %v1458_v3  ;;  %v2383_v8 = vpop.f32.mrf.mxu1  ;;  %v2062_v36 = vadd.f32 %v5997_v61, %v1916_v25  ;;  %v2187_v6 = vmax.f32 %v2059_v43, 0.0 }
 0x2e7   :  { %v1772_v39 = vmul.f32 %v3991_v21, %v6331_v51  ;;  %v2741_v45 = vmax.f32 %v2380_v34, 0.0  ;;  %v1771_v11 = vmul.f32 %v3991_v21, %v6327_v13  ;;  %v2384_v26 = vadd.f32 %v2383_v8, %v6648_v60 }
 0x2e8   :  { %2664 = vmatmul.mubr.f32.gmra.mxu1 %v2183_v57  ;;  %v1590_v20 = vadd.f32 1e-05, %v1526_v58  ;;  %v1461_v54 = vpop.xlane.xlu0 %1460  ;;  %v2385_v53 = vpop.f32.mrf.mxu1  ;;  %v2061_v13 = vadd.f32 %v6000_v7, %v1915_v46  ;;  %v2190_v32 = vmax.f32 %v2062_v36, 0.0  ;;  %v8075_v36 = vld [vmem:[#allocation73_spill] sm:$0xff] }
 0x2e9   :  { %2669 = vmatprep.mubr.f32.mxu1 %v2186_v5  ;;  %v1527_v16 = vmul.f32 0.00390625, %v1461_v54  ;;  %v1918_v35 = vmul.f32 %v5986_v37, %v1772_v39  ;;  %v2386_v51 = vadd.f32 %v2385_v53, %v6653_v1  ;;  %2986 = vmatprep.mubr.f32.mxu0 %v2741_v45  ;;  %v1917_v62 = vmul.f32 %v5989_v50, %v1771_v11  ;;  %v8073_v5 = vld [vmem:[#allocation67_spill] sm:$0xff] }
 0x2ea   :  { %v3993_v17 = vpop.eup %3992  ;;  %3998 = vrsqrt.f32 %v1590_v20  ;;  %v1464_v15 = vpop.xlane.xlu1 %1463  ;;  %2987 = vmatmul.mubr.f32.gmra.mxu0 %v2740_v0  ;;  %v2742_v63 = vmax.f32 %v2384_v26, 0.0  ;;  %v2189_v31 = vmax.f32 %v2061_v13, 0.0 }
 0x2eb   :  { %v1591_v12 = vadd.f32 1e-05, %v1527_v16  ;;  %v1528_v56 = vmul.f32 0.00390625, %v1464_v15  ;;  %v1774_v10 = vmul.f32 %v3993_v17, %v8071_v42  ;;  %v2743_v29 = vmax.f32 %v2386_v51, 0.0  ;;  %v2389_v9 = vpop.f32.mrf.mxu1 }
 0x2ec   :  { %2670 = vmatmul.mubr.f32.gmra.mxu1 %v2185_v22  ;;  %v1773_v55 = vmul.f32 %v3993_v17, %v8072_v41  ;;  %v2064_v49 = vadd.f32 %v5997_v61, %v1918_v35  ;;  %v2390_v30 = vadd.f32 %v2389_v9, %v6648_v60  ;;  %v2063_v48 = vadd.f32 %v6000_v7, %v1917_v62 }
 0x2ed   :  { %2675 = vmatprep.mubr.f32.mxu1 %v2188_v33  ;;  %4000 = vrsqrt.f32 %v1591_v12  ;;  %v1592_v38 = vadd.f32 1e-05, %v1528_v56  ;;  %v2391_v59 = vpop.f32.mrf.mxu1  ;;  %2991 = vmatprep.mubr.f32.mxu0 %v2743_v29  ;;  %v1920_v18 = vmul.f32 %v5986_v37, %v1774_v10 }
 0x2ee   :  { %v2392_v52 = vadd.f32 %v2391_v59, %v6653_v1  ;;  %2992 = vmatmul.mubr.f32.gmra.mxu0 %v2742_v63  ;;  %v1919_v57 = vmul.f32 %v5989_v50, %v1773_v55  ;;  %v2192_v25 = vmax.f32 %v2064_v49, 0.0  ;;  %v2744_v58 = vmax.f32 %v2390_v30, 0.0 }
 0x2ef   :  { %v3995_v2 = vpop.eup %3994  ;;  %4002 = vrsqrt.f32 %v1592_v38  ;;  %v2066_v21 = vadd.f32 %v5997_v61, %v1920_v18  ;;  %v2191_v20 = vmax.f32 %v2063_v48, 0.0 }
 0x2f0   :  { %2676 = vmatmul.mubr.f32.gmra.mxu1 %v2187_v6  ;;  %v2395_v28 = vpop.f32.mrf.mxu1  ;;  %v1776_v4 = vmul.f32 %v3995_v2, %v6368_v27  ;;  %v1775_v3 = vmul.f32 %v3995_v2, %v8073_v5  ;;  %v2745_v44 = vmax.f32 %v2392_v52, 0.0  ;;  %v8074_v27 = vld [vmem:[#allocation66_spill] sm:$0xff]  ;;  %v2065_v54 = vadd.f32 %v6000_v7, %v1919_v57 }
 0x2f1   :  { %2681 = vmatprep.mubr.f32.mxu1 %v2190_v32  ;;  %v2396_v43 = vadd.f32 %v2395_v28, %v6648_v60  ;;  %v2194_v26 = vmax.f32 %v2066_v21, 0.0 }
 0x2f2   :  { %v3997_v34 = vpop.eup %3996  ;;  %v2397_v0 = vpop.f32.mrf.mxu1  ;;  %v1922_v8 = vmul.f32 %v5986_v37, %v1776_v4  ;;  %2996 = vmatprep.mubr.f32.mxu0 %v2745_v44  ;;  %v1921_v46 = vmul.f32 %v5989_v50, %v1775_v3  ;;  %v2193_v56 = vmax.f32 %v2065_v54, 0.0 }
 0x2f3   :  { %v2398_v22 = vadd.f32 %v2397_v0, %v6653_v1  ;;  %v1778_v39 = vmul.f32 %v3997_v34, %v8074_v27  ;;  %2997 = vmatmul.mubr.f32.gmra.mxu0 %v2744_v58  ;;  %v1777_v11 = vmul.f32 %v3997_v34, %v8075_v36  ;;  %v2746_v16 = vmax.f32 %v2396_v43, 0.0 }
 0x2f4   :  { %2682 = vmatmul.mubr.f32.gmra.mxu1 %v2189_v31  ;;  %v2068_v53 = vadd.f32 %v5997_v61, %v1922_v8  ;;  %v2067_v12 = vadd.f32 %v6000_v7, %v1921_v46 }
 0x2f5   :  { %v2401_v45 = vpop.f32.mrf.mxu1  ;;  %v2747_v17 = vmax.f32 %v2398_v22, 0.0  ;;  %2687 = vmatprep.mubr.f32.mxu1 %v2192_v25  ;;  %v1924_v33 = vmul.f32 %v5986_v37, %v1778_v39  ;;  %v1923_v13 = vmul.f32 %v5989_v50, %v1777_v11 }
 0x2f6   :  { %v2402_v35 = vadd.f32 %v2401_v45, %v6648_v60  ;;  %v2196_v32 = vmax.f32 %v2068_v53, 0.0  ;;  %v2195_v18 = vmax.f32 %v2067_v12, 0.0 }
 0x2f7   :  { %v2403_v51 = vpop.f32.mrf.mxu1  ;;  %v3999_v6 = vpop.eup %3998  ;;  %3001 = vmatprep.mubr.f32.mxu0 %v2747_v17  ;;  %v2070_v62 = vadd.f32 %v5997_v61, %v1924_v33  ;;  %v2069_v2 = vadd.f32 %v6000_v7, %v1923_v13 }
 0x2f8   :  { %v2404_v15 = vadd.f32 %v2403_v51, %v6653_v1  ;;  %2688 = vmatmul.mubr.f32.gmra.mxu1 %v2191_v20  ;;  %3002 = vmatmul.mubr.f32.gmra.mxu0 %v2746_v16  ;;  %v1780_v42 = vmul.f32 %v3999_v6, %v6427_v14  ;;  %v1779_v10 = vmul.f32 %v3999_v6, %v6424_v23  ;;  %v2748_v55 = vmax.f32 %v2402_v35, 0.0 }
 0x2f9   :  { %2693 = vmatprep.mubr.f32.mxu1 %v2194_v26  ;;  %v2407_v9 = vpop.f32.mrf.mxu1  ;;  %v2198_v28 = vmax.f32 %v2070_v62, 0.0 }
 0x2fa   :  { %v2749_v29 = vmax.f32 %v2404_v15, 0.0  ;;  %v4001_v41 = vpop.eup %4000  ;;  %v1926_v63 = vmul.f32 %v5986_v37, %v1780_v42  ;;  %v2408_v38 = vadd.f32 %v2407_v9, %v6648_v60  ;;  %v1925_v30 = vmul.f32 %v5989_v50, %v1779_v10 }
 0x2fb   :  { %v2409_v49 = vpop.f32.mrf.mxu1  ;;  %v1782_v14 = vmul.f32 %v4001_v41, %v6444_v40  ;;  %v1781_v52 = vmul.f32 %v4001_v41, %v6441_v24  ;;  %v2197_v24 = vmax.f32 %v2069_v2, 0.0 }
 0x2fc   :  { %3006 = vmatprep.mubr.f32.mxu0 %v2749_v29  ;;  %v4003_v59 = vpop.eup %4002  ;;  %2694 = vmatmul.mubr.f32.gmra.mxu1 %v2193_v56  ;;  %v2410_v23 = vadd.f32 %v2409_v49, %v6653_v1  ;;  %v2072_v48 = vadd.f32 %v5997_v61, %v1926_v63  ;;  %v2750_v5 = vmax.f32 %v2408_v38, 0.0  ;;  %v2071_v25 = vadd.f32 %v6000_v7, %v1925_v30 }
 0x2fd   :  { %3007 = vmatmul.mubr.f32.gmra.mxu0 %v2748_v55  ;;  %2699 = vmatprep.mubr.f32.mxu1 %v2196_v32  ;;  %v1928_v57 = vmul.f32 %v5986_v37, %v1782_v14  ;;  %v1784_v4 = vmul.f32 %v4003_v59, %v6462_v19  ;;  %v1927_v34 = vmul.f32 %v5989_v50, %v1781_v52 }
 0x2fe   :  { %v2413_v31 = vpop.f32.mrf.mxu1  ;;  %v2751_v40 = vmax.f32 %v2410_v23, 0.0  ;;  %v1783_v58 = vmul.f32 %v4003_v59, %v6459_v47  ;;  %v2200_v43 = vmax.f32 %v2072_v48, 0.0  ;;  %v2199_v45 = vmax.f32 %v2071_v25, 0.0 }
 0x2ff   :  { %v2414_v3 = vadd.f32 %v2413_v31, %v6648_v60  ;;  %v2074_v19 = vadd.f32 %v5997_v61, %v1928_v57  ;;  %v1930_v0 = vmul.f32 %v5986_v37, %v1784_v4  ;;  %v2073_v20 = vadd.f32 %v6000_v7, %v1927_v34 }
 0x300   :  { %v2415_v44 = vpop.f32.mrf.mxu1  ;;  %2700 = vmatmul.mubr.f32.gmra.mxu1 %v2195_v18  ;;  %3011 = vmatprep.mubr.f32.mxu0 %v2751_v40  ;;  %v1929_v47 = vmul.f32 %v5989_v50, %v1783_v58 }
 0x301   :  { %v2416_v21 = vadd.f32 %v2415_v44, %v6653_v1  ;;  %2705 = vmatprep.mubr.f32.mxu1 %v2198_v28  ;;  %3012 = vmatmul.mubr.f32.gmra.mxu0 %v2750_v5  ;;  %v2752_v46 = vmax.f32 %v2414_v3, 0.0  ;;  %v2202_v36 = vmax.f32 %v2074_v19, 0.0  ;;  %v2076_v37 = vadd.f32 %v5997_v61, %v1930_v0 }
 0x302   :  { %v2419_v22 = vpop.f32.mrf.mxu1  ;;  %v2201_v16 = vmax.f32 %v2073_v20, 0.0  ;;  %v2075_v35 = vadd.f32 %v6000_v7, %v1929_v47 }
 0x303   :  { %v2753_v8 = vmax.f32 %v2416_v21, 0.0  ;;  %v2420_v27 = vadd.f32 %v2419_v22, %v6648_v60  ;;  %v2204_v50 = vmax.f32 %v2076_v37, 0.0 }
 0x304   :  { %2706 = vmatmul.mubr.f32.gmra.mxu1 %v2197_v24  ;;  %v2421_v39 = vpop.f32.mrf.mxu1  ;;  %v2203_v13 = vmax.f32 %v2075_v35, 0.0 }
 0x305   :  { %3016 = vmatprep.mubr.f32.mxu0 %v2753_v8  ;;  %v2422_v54 = vadd.f32 %v2421_v39, %v6653_v1  ;;  %2711 = vmatprep.mubr.f32.mxu1 %v2200_v43  ;;  %v2754_v26 = vmax.f32 %v2420_v27, 0.0 }
 0x306   :  { %3017 = vmatmul.mubr.f32.gmra.mxu0 %v2752_v46  ;;  %v2425_v11 = vpop.f32.mrf.mxu1 }
 0x307   :  { %v2755_v17 = vmax.f32 %v2422_v54, 0.0  ;;  %v2426_v53 = vadd.f32 %v2425_v11, %v6648_v60 }
 0x308   :  { %2712 = vmatmul.mubr.f32.gmra.mxu1 %v2199_v45  ;;  %v2427_v33 = vpop.f32.mrf.mxu1 }
 0x309   :  { %v2428_v51 = vadd.f32 %v2427_v33, %v6653_v1  ;;  %2717 = vmatprep.mubr.f32.mxu1 %v2202_v36  ;;  %3021 = vmatprep.mubr.f32.mxu0 %v2755_v17  ;;  %v2756_v12 = vmax.f32 %v2426_v53, 0.0 }
 0x30a   :  { %v2431_v6 = vpop.f32.mrf.mxu1  ;;  %3022 = vmatmul.mubr.f32.gmra.mxu0 %v2754_v26 }
 0x30b   :  { %v2757_v15 = vmax.f32 %v2428_v51, 0.0  ;;  %v2432_v61 = vadd.f32 %v2431_v6, %v6648_v60 }
 0x30c   :  { %2718 = vmatmul.mubr.f32.gmra.mxu1 %v2201_v16  ;;  %v2433_v56 = vpop.f32.mrf.mxu1 }
 0x30d   :  { %v2434_v42 = vadd.f32 %v2433_v56, %v6653_v1  ;;  %2723 = vmatprep.mubr.f32.mxu1 %v2204_v50  ;;  %3026 = vmatprep.mubr.f32.mxu0 %v2757_v15  ;;  %v2758_v29 = vmax.f32 %v2432_v61, 0.0 }
 0x30e   :  { %3027 = vmatmul.mubr.f32.gmra.mxu0 %v2756_v12 }
 0x30f   :  { %v2759_v7 = vmax.f32 %v2434_v42, 0.0  ;;  %v2437_v10 = vpop.f32.mrf.mxu1 }
 0x310   :  { %2724 = vmatmul.mubr.f32.gmra.mxu1 %v2203_v13  ;;  %v2438_v9 = vadd.f32 %v2437_v10, %v6648_v60 }
 0x311   :  { %v2439_v32 = vpop.f32.mrf.mxu1  ;;  %3031 = vmatprep.mubr.f32.mxu0 %v2759_v7 }
 0x312   :  { %v2440_v62 = vadd.f32 %v2439_v32, %v6653_v1  ;;  %3032 = vmatmul.mubr.f32.gmra.mxu0 %v2758_v29  ;;  %v2760_v63 = vmax.f32 %v2438_v9, 0.0 }
 0x313   :  { %v2443_v41 = vpop.f32.mrf.mxu1 }
 0x314   :  { %v2761_v55 = vmax.f32 %v2440_v62, 0.0  ;;  %v2444_v38 = vadd.f32 %v2443_v41, %v6648_v60 }
 0x315   :  { %v2445_v49 = vpop.f32.mrf.mxu1 }
 0x316   :  { %v2446_v30 = vadd.f32 %v2445_v49, %v6653_v1  ;;  %3036 = vmatprep.mubr.f32.mxu0 %v2761_v55  ;;  %v2762_v23 = vmax.f32 %v2444_v38, 0.0 }
 0x317   :  { %v2449_v14 = vpop.f32.mrf.mxu1  ;;  %3037 = vmatmul.mubr.f32.gmra.mxu0 %v2760_v63 }
 0x318   :  { %v2763_v59 = vmax.f32 %v2446_v30, 0.0  ;;  %v2450_v18 = vadd.f32 %v2449_v14, %v6648_v60 }
 0x319   :  { %v2451_v2 = vpop.f32.mrf.mxu1 }
 0x31a   :  { %v2452_v52 = vadd.f32 %v2451_v2, %v6653_v1  ;;  %3041 = vmatprep.mubr.f32.mxu0 %v2763_v59  ;;  %v2764_v48 = vmax.f32 %v2450_v18, 0.0 }
 0x31b   :  { %v2455_v31 = vpop.f32.mrf.mxu1  ;;  %3042 = vmatmul.mubr.f32.gmra.mxu0 %v2762_v23 }
 0x31c   :  { %v2765_v28 = vmax.f32 %v2452_v52, 0.0  ;;  %v2456_v57 = vadd.f32 %v2455_v31, %v6648_v60 }
 0x31d   :  { %v2457_v4 = vpop.f32.mrf.mxu1 }
 0x31e   :  { %v2458_v40 = vadd.f32 %v2457_v4, %v6653_v1  ;;  %3046 = vmatprep.mubr.f32.mxu0 %v2765_v28  ;;  %v2766_v44 = vmax.f32 %v2456_v57, 0.0 }
 0x31f   :  { %3047 = vmatmul.mubr.f32.gmra.mxu0 %v2764_v48 }
 0x320   :  { %v2767_v5 = vmax.f32 %v2458_v40, 0.0  ;;  %v2461_v3 = vpop.f32.mrf.mxu1 }
 0x321   :  { %v2462_v25 = vadd.f32 %v2461_v3, %v6648_v60 }
 0x322   :  { %v2463_v21 = vpop.f32.mrf.mxu1  ;;  %3051 = vmatprep.mubr.f32.mxu0 %v2767_v5 }
 0x323   :  { %v2464_v24 = vadd.f32 %v2463_v21, %v6653_v1  ;;  %3052 = vmatmul.mubr.f32.gmra.mxu0 %v2766_v44  ;;  %v2768_v43 = vmax.f32 %v2462_v25, 0.0 }
 0x324   :  { %v2467_v34 = vpop.f32.mrf.mxu1 }
 0x325   :  { %v2769_v58 = vmax.f32 %v2464_v24, 0.0  ;;  %v2468_v19 = vadd.f32 %v2467_v34, %v6648_v60 }
 0x326   :  { %v2469_v0 = vpop.f32.mrf.mxu1 }
 0x327   :  { %v2470_v8 = vadd.f32 %v2469_v0, %v6653_v1  ;;  %3056 = vmatprep.mubr.f32.mxu0 %v2769_v58  ;;  %v2770_v27 = vmax.f32 %v2468_v19, 0.0 }
 0x328   :  { %v2473_v22 = vpop.f32.mrf.mxu1  ;;  %3057 = vmatmul.mubr.f32.gmra.mxu0 %v2768_v43 }
 0x329   :  { %v2771_v46 = vmax.f32 %v2470_v8, 0.0  ;;  %v2474_v39 = vadd.f32 %v2473_v22, %v6648_v60 }
 0x32a   :  { %v2475_v45 = vpop.f32.mrf.mxu1 }
 0x32b   :  { %v2476_v20 = vadd.f32 %v2475_v45, %v6653_v1  ;;  %3061 = vmatprep.mubr.f32.mxu0 %v2771_v46  ;;  %v2772_v36 = vmax.f32 %v2474_v39, 0.0 }
 0x32c   :  { %v2479_v47 = vpop.f32.mrf.mxu1  ;;  %3062 = vmatmul.mubr.f32.gmra.mxu0 %v2770_v27 }
 0x32d   :  { %v2773_v54 = vmax.f32 %v2476_v20, 0.0  ;;  %v2480_v37 = vadd.f32 %v2479_v47, %v6648_v60 }
 0x32e   :  { %v2481_v11 = vpop.f32.mrf.mxu1 }
 0x32f   :  { %v2482_v17 = vadd.f32 %v2481_v11, %v6653_v1  ;;  %3066 = vmatprep.mubr.f32.mxu0 %v2773_v54  ;;  %v2774_v33 = vmax.f32 %v2480_v37, 0.0 }
 0x330   :  { %v2485_v26 = vpop.f32.mrf.mxu1  ;;  %3067 = vmatmul.mubr.f32.gmra.mxu0 %v2772_v36 }
 0x331   :  { %v2775_v53 = vmax.f32 %v2482_v17, 0.0  ;;  %v2486_v16 = vadd.f32 %v2485_v26, %v6648_v60 }
 0x332   :  { %v2487_v35 = vpop.f32.mrf.mxu1 }
 0x333   :  { %v2488_v51 = vadd.f32 %v2487_v35, %v6653_v1  ;;  %3071 = vmatprep.mubr.f32.mxu0 %v2775_v53  ;;  %v2776_v15 = vmax.f32 %v2486_v16, 0.0 }
 0x334   :  { %v2491_v50 = vpop.f32.mrf.mxu1  ;;  %3072 = vmatmul.mubr.f32.gmra.mxu0 %v2774_v33 }
 0x335   :  { %v2777_v6 = vmax.f32 %v2488_v51, 0.0  ;;  %v2492_v12 = vadd.f32 %v2491_v50, %v6648_v60 }
 0x336   :  { %v2493_v61 = vpop.f32.mrf.mxu1 }
 0x337   :  { %v2494_v56 = vadd.f32 %v2493_v61, %v6653_v1  ;;  %3076 = vmatprep.mubr.f32.mxu0 %v2777_v6  ;;  %v2778_v7 = vmax.f32 %v2492_v12, 0.0 }
 0x338   :  { %v2497_v13 = vpop.f32.mrf.mxu1  ;;  %3077 = vmatmul.mubr.f32.gmra.mxu0 %v2776_v15 }
 0x339   :  { %v2779_v42 = vmax.f32 %v2494_v56, 0.0  ;;  %v2498_v10 = vadd.f32 %v2497_v13, %v6648_v60 }
 0x33a   :  { %v2499_v29 = vpop.f32.mrf.mxu1 }
 0x33b   :  { %v2500_v9 = vadd.f32 %v2499_v29, %v6653_v1  ;;  %3081 = vmatprep.mubr.f32.mxu0 %v2779_v42  ;;  %v2780_v41 = vmax.f32 %v2498_v10, 0.0 }
 0x33c   :  { %v2503_v32 = vpop.f32.mrf.mxu1  ;;  %3082 = vmatmul.mubr.f32.gmra.mxu0 %v2778_v7 }
 0x33d   :  { %v2781_v62 = vmax.f32 %v2500_v9, 0.0  ;;  %v2504_v55 = vadd.f32 %v2503_v32, %v6648_v60 }
 0x33e   :  { %v2505_v63 = vpop.f32.mrf.mxu1 }
 0x33f   :  { %v2506_v38 = vadd.f32 %v2505_v63, %v6653_v1  ;;  %3086 = vmatprep.mubr.f32.mxu0 %v2781_v62  ;;  %v2782_v14 = vmax.f32 %v2504_v55, 0.0 }
 0x340   :  { %v2509_v49 = vpop.f32.mrf.mxu1  ;;  %3087 = vmatmul.mubr.f32.gmra.mxu0 %v2780_v41 }
 0x341   :  { %v2783_v30 = vmax.f32 %v2506_v38, 0.0  ;;  %v2510_v59 = vadd.f32 %v2509_v49, %v6648_v60 }
 0x342   :  { %v2511_v23 = vpop.f32.mrf.mxu1 }
 0x343   :  { %v2512_v18 = vadd.f32 %v2511_v23, %v6653_v1  ;;  %3091 = vmatprep.mubr.f32.mxu0 %v2783_v30  ;;  %v2784_v31 = vmax.f32 %v2510_v59, 0.0 }
 0x344   :  { %v2515_v2 = vpop.f32.mrf.mxu1  ;;  %3092 = vmatmul.mubr.f32.gmra.mxu0 %v2782_v14 }
 0x345   :  { %v2785_v52 = vmax.f32 %v2512_v18, 0.0  ;;  %v2516_v28 = vadd.f32 %v2515_v2, %v6648_v60 }
 0x346   :  { %v2517_v48 = vpop.f32.mrf.mxu1 }
 0x347   :  { %v2518_v57 = vadd.f32 %v2517_v48, %v6653_v1  ;;  %3096 = vmatprep.mubr.f32.mxu0 %v2785_v52  ;;  %v2786_v5 = vmax.f32 %v2516_v28, 0.0 }
 0x348   :  { %v2521_v4 = vpop.f32.mrf.mxu1  ;;  %3097 = vmatmul.mubr.f32.gmra.mxu0 %v2784_v31 }
 0x349   :  { %v2787_v40 = vmax.f32 %v2518_v57, 0.0  ;;  %v2522_v3 = vadd.f32 %v2521_v4, %v6648_v60 }
 0x34a   :  { %v2523_v44 = vpop.f32.mrf.mxu1 }
 0x34b   :  { %v2524_v25 = vadd.f32 %v2523_v44, %v6653_v1  ;;  %3101 = vmatprep.mubr.f32.mxu0 %v2787_v40  ;;  %v2788_v34 = vmax.f32 %v2522_v3, 0.0 }
 0x34c   :  { %v2527_v21 = vpop.f32.mrf.mxu1  ;;  %3102 = vmatmul.mubr.f32.gmra.mxu0 %v2786_v5 }
 0x34d   :  { %v2789_v24 = vmax.f32 %v2524_v25, 0.0  ;;  %v2528_v58 = vadd.f32 %v2527_v21, %v6648_v60 }
 0x34e   :  { %v2529_v43 = vpop.f32.mrf.mxu1 }
 0x34f   :  { %v2530_v19 = vadd.f32 %v2529_v43, %v6653_v1  ;;  %3106 = vmatprep.mubr.f32.mxu0 %v2789_v24  ;;  %v2790_v22 = vmax.f32 %v2528_v58, 0.0 }
 0x350   :  { %v2533_v0 = vpop.f32.mrf.mxu1  ;;  %3107 = vmatmul.mubr.f32.gmra.mxu0 %v2788_v34 }
 0x351   :  { %v2791_v8 = vmax.f32 %v2530_v19, 0.0  ;;  %v2534_v46 = vadd.f32 %v2533_v0, %v6648_v60 }
 0x352   :  { %v2535_v27 = vpop.f32.mrf.mxu1 }
 0x353   :  { %v2536_v39 = vadd.f32 %v2535_v27, %v6653_v1  ;;  %3111 = vmatprep.mubr.f32.mxu0 %v2791_v8  ;;  %v2792_v47 = vmax.f32 %v2534_v46, 0.0 }
 0x354   :  { %v2539_v45 = vpop.f32.mrf.mxu1  ;;  %3112 = vmatmul.mubr.f32.gmra.mxu0 %v2790_v22 }
 0x355   :  { %v2793_v20 = vmax.f32 %v2536_v39, 0.0  ;;  %v2540_v54 = vadd.f32 %v2539_v45, %v6648_v60 }
 0x356   :  { %v2541_v36 = vpop.f32.mrf.mxu1 }
 0x357   :  { %v2542_v37 = vadd.f32 %v2541_v36, %v6653_v1  ;;  %3116 = vmatprep.mubr.f32.mxu0 %v2793_v20  ;;  %v2794_v26 = vmax.f32 %v2540_v54, 0.0 }
 0x358   :  { %v2545_v11 = vpop.f32.mrf.mxu1  ;;  %3117 = vmatmul.mubr.f32.gmra.mxu0 %v2792_v47 }
 0x359   :  { %v2795_v17 = vmax.f32 %v2542_v37, 0.0  ;;  %v2546_v53 = vadd.f32 %v2545_v11, %v6648_v60 }
 0x35a   :  { %v2547_v33 = vpop.f32.mrf.mxu1 }
 0x35b   :  { %v2548_v16 = vadd.f32 %v2547_v33, %v6653_v1  ;;  %3121 = vmatprep.mubr.f32.mxu0 %v2795_v17  ;;  %v2796_v50 = vmax.f32 %v2546_v53, 0.0 }
 0x35c   :  { %v2551_v35 = vpop.f32.mrf.mxu1  ;;  %3122 = vmatmul.mubr.f32.gmra.mxu0 %v2794_v26 }
 0x35d   :  { %v2797_v51 = vmax.f32 %v2548_v16, 0.0  ;;  %v2552_v6 = vadd.f32 %v2551_v35, %v6648_v60 }
 0x35e   :  { %v2553_v15 = vpop.f32.mrf.mxu1 }
 0x35f   :  { %v2554_v12 = vadd.f32 %v2553_v15, %v6653_v1  ;;  %3126 = vmatprep.mubr.f32.mxu0 %v2797_v51  ;;  %v2798_v13 = vmax.f32 %v2552_v6, 0.0 }
 0x360   :  { %v2557_v61 = vpop.f32.mrf.mxu1  ;;  %3127 = vmatmul.mubr.f32.gmra.mxu0 %v2796_v50 }
 0x361   :  { %v2799_v56 = vmax.f32 %v2554_v12, 0.0  ;;  %v2558_v42 = vadd.f32 %v2557_v61, %v6648_v60 }
 0x362   :  { %v2559_v7 = vpop.f32.mrf.mxu1 }
 0x363   :  { %v2560_v10 = vadd.f32 %v2559_v7, %v6653_v1  ;;  %3131 = vmatprep.mubr.f32.mxu0 %v2799_v56  ;;  %v2800_v32 = vmax.f32 %v2558_v42, 0.0 }
 0x364   :  { %v2563_v29 = vpop.f32.mrf.mxu1  ;;  %3132 = vmatmul.mubr.f32.gmra.mxu0 %v2798_v13 }
 0x365   :  { %v2801_v9 = vmax.f32 %v2560_v10, 0.0  ;;  %v2564_v62 = vadd.f32 %v2563_v29, %v6648_v60 }
 0x366   :  { %v2565_v41 = vpop.f32.mrf.mxu1 }
 0x367   :  { %v2566_v55 = vadd.f32 %v2565_v41, %v6653_v1  ;;  %3136 = vmatprep.mubr.f32.mxu0 %v2801_v9  ;;  %v2802_v49 = vmax.f32 %v2564_v62, 0.0  ;;  %v6842_v62 = vld [vmem:[%s7594_s6] ss:$0 sm:$0xff] }
 0x368   :  { %v2569_v63 = vpop.f32.mrf.mxu1  ;;  %3137 = vmatmul.mubr.f32.gmra.mxu0 %v2800_v32 }
 0x369   :  { %v2803_v38 = vmax.f32 %v2566_v55, 0.0  ;;  %v2570_v30 = vadd.f32 %v2569_v63, %v6648_v60 }
 0x36a   :  { %v2571_v14 = vpop.f32.mrf.mxu1 }
 0x36b   :  { %v2572_v59 = vadd.f32 %v2571_v14, %v6653_v1  ;;  %3141 = vmatprep.mubr.f32.mxu0 %v2803_v38  ;;  %v2804_v2 = vmax.f32 %v2570_v30, 0.0 }
 0x36c   :  { %v2575_v23 = vpop.f32.mrf.mxu1  ;;  %3142 = vmatmul.mubr.f32.gmra.mxu0 %v2802_v49 }
 0x36d   :  { %v2805_v18 = vmax.f32 %v2572_v59, 0.0  ;;  %v2576_v52 = vadd.f32 %v2575_v23, %v6648_v60 }
 0x36e   :  { %v2577_v31 = vpop.f32.mrf.mxu1 }
 0x36f   :  { %v2578_v28 = vadd.f32 %v2577_v31, %v6653_v1  ;;  %3146 = vmatprep.mubr.f32.mxu0 %v2805_v18  ;;  %v2806_v4 = vmax.f32 %v2576_v52, 0.0 }
 0x370   :  { %v2581_v48 = vpop.f32.mrf.mxu1  ;;  %3147 = vmatmul.mubr.f32.gmra.mxu0 %v2804_v2 }
 0x371   :  { %v2807_v57 = vmax.f32 %v2578_v28, 0.0  ;;  %v2582_v40 = vadd.f32 %v2581_v48, %v6648_v60 }
 0x372   :  { %v2583_v5 = vpop.f32.mrf.mxu1 }
 0x373   :  { %v2584_v3 = vadd.f32 %v2583_v5, %v6653_v1  ;;  %3151 = vmatprep.mubr.f32.mxu0 %v2807_v57  ;;  %v2808_v21 = vmax.f32 %v2582_v40, 0.0 }
 0x374   :  { %v2587_v44 = vpop.f32.mrf.mxu1  ;;  %3152 = vmatmul.mubr.f32.gmra.mxu0 %v2806_v4 }
 0x375   :  { %v2809_v25 = vmax.f32 %v2584_v3, 0.0  ;;  %v2588_v24 = vadd.f32 %v2587_v44, %v6648_v60 }
 0x376   :  { %v2589_v34 = vpop.f32.mrf.mxu1 }
 0x377   :  { %v2590_v58 = vadd.f32 %v2589_v34, %v6653_v1  ;;  %3156 = vmatprep.mubr.f32.mxu0 %v2809_v25  ;;  %v2810_v0 = vmax.f32 %v2588_v24, 0.0 }
 0x378   :  { %v2593_v43 = vpop.f32.mrf.mxu1  ;;  %3157 = vmatmul.mubr.f32.gmra.mxu0 %v2808_v21 }
 0x379   :  { %v2811_v19 = vmax.f32 %v2590_v58, 0.0  ;;  %v2594_v8 = vadd.f32 %v2593_v43, %v6648_v60 }
 0x37a   :  { %v2595_v22 = vpop.f32.mrf.mxu1 }
 0x37b   :  { %v2596_v46 = vadd.f32 %v2595_v22, %v6653_v1  ;;  %3161 = vmatprep.mubr.f32.mxu0 %v2811_v19  ;;  %v2812_v45 = vmax.f32 %v2594_v8, 0.0 }
 0x37c   :  { %v2599_v27 = vpop.f32.mrf.mxu1  ;;  %3162 = vmatmul.mubr.f32.gmra.mxu0 %v2810_v0 }
 0x37d   :  { %v2813_v39 = vmax.f32 %v2596_v46, 0.0  ;;  %v2600_v20 = vadd.f32 %v2599_v27, %v6648_v60 }
 0x37e   :  { %v2601_v47 = vpop.f32.mrf.mxu1 }
 0x37f   :  { %v2602_v54 = vadd.f32 %v2601_v47, %v6653_v1  ;;  %3166 = vmatprep.mubr.f32.mxu0 %v2813_v39  ;;  %v2814_v11 = vmax.f32 %v2600_v20, 0.0 }
 0x380   :  { %v2605_v36 = vpop.f32.mrf.mxu1  ;;  %3167 = vmatmul.mubr.f32.gmra.mxu0 %v2812_v45 }
 0x381   :  { %v2815_v37 = vmax.f32 %v2602_v54, 0.0  ;;  %v2606_v17 = vadd.f32 %v2605_v36, %v6648_v60 }
 0x382   :  { %v2607_v26 = vpop.f32.mrf.mxu1 }
 0x383   :  { %v2608_v53 = vadd.f32 %v2607_v26, %v6653_v1  ;;  %3171 = vmatprep.mubr.f32.mxu0 %v2815_v37  ;;  %v2816_v35 = vmax.f32 %v2606_v17, 0.0 }
 0x384   :  { %v2611_v33 = vpop.f32.mrf.mxu1  ;;  %3172 = vmatmul.mubr.f32.gmra.mxu0 %v2814_v11 }
 0x385   :  { %v2817_v16 = vmax.f32 %v2608_v53, 0.0  ;;  %v2612_v51 = vadd.f32 %v2611_v33, %v6648_v60 }
 0x386   :  { %v2613_v50 = vpop.f32.mrf.mxu1 }
 0x387   :  { %v2614_v6 = vadd.f32 %v2613_v50, %v6653_v1  ;;  %3176 = vmatprep.mubr.f32.mxu0 %v2817_v16  ;;  %v2818_v61 = vmax.f32 %v2612_v51, 0.0 }
 0x388   :  { %v2617_v15 = vpop.f32.mrf.mxu1  ;;  %3177 = vmatmul.mubr.f32.gmra.mxu0 %v2816_v35 }
 0x389   :  { %v2819_v12 = vmax.f32 %v2614_v6, 0.0  ;;  %v2618_v56 = vadd.f32 %v2617_v15, %v6648_v60 }
 0x38a   :  { %v2619_v13 = vpop.f32.mrf.mxu1 }
 0x38b   :  { %v2620_v42 = vadd.f32 %v2619_v13, %v6653_v1  ;;  %3181 = vmatprep.mubr.f32.mxu0 %v2819_v12  ;;  %v2820_v29 = vmax.f32 %v2618_v56, 0.0 }
 0x38c   :  { %v2623_v7 = vpop.f32.mrf.mxu1  ;;  %3182 = vmatmul.mubr.f32.gmra.mxu0 %v2818_v61 }
 0x38d   :  { %v2821_v10 = vmax.f32 %v2620_v42, 0.0  ;;  %v2624_v9 = vadd.f32 %v2623_v7, %v6648_v60 }
 0x38e   :  { %v2625_v32 = vpop.f32.mrf.mxu1 }
 0x38f   :  { %v2626_v41 = vadd.f32 %v2625_v32, %v6653_v1  ;;  %3186 = vmatprep.mubr.f32.mxu0 %v2821_v10  ;;  %v2822_v30 = vmax.f32 %v2624_v9, 0.0 }
 0x390   :  { %v2629_v55 = vpop.f32.mrf.mxu1  ;;  %3187 = vmatmul.mubr.f32.gmra.mxu0 %v2820_v29 }
 0x391   :  { %v2963_v63 = vpop.f32.mrf.mxu0  ;;  %v2823_v38 = vmax.f32 %v2626_v41, 0.0  ;;  %v2630_v14 = vadd.f32 %v2629_v55, %v6648_v60 }
 0x392   :  { %v6846_v49 = vadd.f32 %v6842_v62, %v2963_v63  ;;  %v2631_v59 = vpop.f32.mrf.mxu1 }
 0x393   :  { %v2965_v23 = vpop.f32.mrf.mxu0  ;;  %v2632_v18 = vadd.f32 %v2631_v59, %v6653_v1  ;;  %3191 = vmatprep.mubr.f32.mxu0 %v2823_v38  ;;  %v2824_v28 = vmax.f32 %v2630_v14, 0.0 }
 0x394   :  { %4004 = vtanh.f32 %v6846_v49  ;;  %v2635_v2 = vpop.f32.mrf.mxu1  ;;  %3192 = vmatmul.mubr.f32.gmra.mxu0 %v2822_v30 }
 0x395   :  { %v2825_v52 = vmax.f32 %v2632_v18, 0.0  ;;  %v2636_v48 = vadd.f32 %v2635_v2, %v6648_v60 }
 0x396   :  { %v2968_v31 = vpop.f32.mrf.mxu0  ;;  %v2637_v57 = vpop.f32.mrf.mxu1 }
 0x397   :  { %v6853_v4 = vadd.f32 %v6842_v62, %v2968_v31  ;;  %v2638_v40 = vadd.f32 %v2637_v57, %v6653_v1  ;;  %3196 = vmatprep.mubr.f32.mxu0 %v2825_v52  ;;  %v2826_v25 = vmax.f32 %v2636_v48, 0.0 }
 0x398   :  { %v2970_v5 = vpop.f32.mrf.mxu0  ;;  %v2641_v3 = vpop.f32.mrf.mxu1  ;;  %3197 = vmatmul.mubr.f32.gmra.mxu0 %v2824_v28 }
 0x399   :  { %4006 = vtanh.f32 %v6853_v4  ;;  %v2827_v44 = vmax.f32 %v2638_v40, 0.0  ;;  %v2642_v21 = vadd.f32 %v2641_v3, %v6648_v60 }
 0x39a   :  { %v2643_v24 = vpop.f32.mrf.mxu1 }
 0x39b   :  { %v2644_v34 = vadd.f32 %v2643_v24, %v6653_v1  ;;  %3201 = vmatprep.mubr.f32.mxu0 %v2827_v44  ;;  %v2973_v58 = vpop.f32.mrf.mxu0  ;;  %v2828_v22 = vmax.f32 %v2642_v21, 0.0  ;;  %v8076_v24 = vlaneseq }
 0x39c   :  { %v2647_v43 = vpop.f32.mrf.mxu1  ;;  %3202 = vmatmul.mubr.f32.gmra.mxu0 %v2826_v25  ;;  %v6860_v19 = vadd.f32 %v6842_v62, %v2973_v58 }
 0x39d   :  { %v2829_v0 = vmax.f32 %v2644_v34, 0.0  ;;  %v2975_v8 = vpop.f32.mrf.mxu0  ;;  %v2648_v46 = vadd.f32 %v2647_v43, %v6648_v60  ;;  %v6886_v34 = vand.u32 127, %v8076_v24 }
 0x39e   :  { %v2649_v27 = vpop.f32.mrf.mxu1  ;;  %4008 = vtanh.f32 %v6860_v19 }
 0x39f   :  { %v2650_v39 = vadd.f32 %v2649_v27, %v6653_v1  ;;  %3206 = vmatprep.mubr.f32.mxu0 %v2829_v0  ;;  %v2830_v17 = vmax.f32 %v2648_v46, 0.0  ;;  %vm3668_vm1 = vcmp.ge.s32.totalorder %v6886_v34, 8 }
 0x3a0   :  { %v2978_v45 = vpop.f32.mrf.mxu0  ;;  %v2653_v47 = vpop.f32.mrf.mxu1  ;;  %3207 = vmatmul.mubr.f32.gmra.mxu0 %v2828_v22 }
 0x3a1   :  { %v4005_v20 = vpop.eup %4004  ;;  %v6866_v54 = vadd.f32 %v6842_v62, %v2978_v45  ;;  %v2831_v37 = vmax.f32 %v2650_v39, 0.0  ;;  %v2654_v26 = vadd.f32 %v2653_v47, %v6648_v60 }
 0x3a2   :  { %v3346_v36 = vadd.f32 1.0, %v4005_v20  ;;  %v2980_v11 = vpop.f32.mrf.mxu0  ;;  %v2655_v53 = vpop.f32.mrf.mxu1 }
 0x3a3   :  { %4010 = vtanh.f32 %v6866_v54  ;;  %v2656_v16 = vadd.f32 %v2655_v53, %v6653_v1  ;;  %3211 = vmatprep.mubr.f32.mxu0 %v2831_v37  ;;  %v2832_v61 = vmax.f32 %v2654_v26, 0.0 }
 0x3a4   :  { %v3410_v33 = vmul.f32 6.0, %v3346_v36  ;;  %v2659_v35 = vpop.f32.mrf.mxu1  ;;  %3212 = vmatmul.mubr.f32.gmra.mxu0 %v2830_v17  ;;  %v2983_v51 = vpop.f32.mrf.mxu0 }
 0x3a5   :  { %v2833_v15 = vmax.f32 %v2656_v16, 0.0  ;;  %v6872_v12 = vadd.f32 %v6842_v62, %v2983_v51  ;;  %v2660_v13 = vadd.f32 %v2659_v35, %v6648_v60 }
 0x3a6   :  { %v4007_v50 = vpop.eup %4006  ;;  %v3474_v6 = vadd.f32 -10.0, %v3410_v33  ;;  %v2661_v42 = vpop.f32.mrf.mxu1 }
 0x3a7   :  { %v3347_v56 = vadd.f32 1.0, %v4007_v50  ;;  %v2985_v7 = vpop.f32.mrf.mxu0  ;;  %v2662_v29 = vadd.f32 %v2661_v42, %v6653_v1  ;;  %3216 = vmatprep.mubr.f32.mxu0 %v2833_v15  ;;  %4012 = vtanh.f32 %v6872_v12  ;;  %v2834_v63 = vmax.f32 %v2660_v13, 0.0 }
 0x3a8   :  { %v3538_v10 = vmul.f32 1.442695, %v3474_v6  ;;  %v2665_v32 = vpop.f32.mrf.mxu1  ;;  %3217 = vmatmul.mubr.f32.gmra.mxu0 %v2832_v61 }
 0x3a9   :  { %v3411_v9 = vmul.f32 6.0, %v3347_v56  ;;  %v2835_v41 = vmax.f32 %v2662_v29, 0.0  ;;  %v2666_v38 = vadd.f32 %v2665_v32, %v6648_v60 }
 0x3aa   :  { %4014 = vpow2.f32 %v3538_v10  ;;  %v2667_v30 = vpop.f32.mrf.mxu1  ;;  %v2988_v23 = vpop.f32.mrf.mxu0 }
 0x3ab   :  { %v3475_v55 = vadd.f32 -10.0, %v3411_v9  ;;  %v4009_v14 = vpop.eup %4008  ;;  %v2668_v59 = vadd.f32 %v2667_v30, %v6653_v1  ;;  %3221 = vmatprep.mubr.f32.mxu0 %v2835_v41  ;;  %v6880_v31 = vadd.f32 %v6842_v62, %v2988_v23  ;;  %v2836_v5 = vmax.f32 %v2666_v38, 0.0 }
 0x3ac   :  { %v3348_v2 = vadd.f32 1.0, %v4009_v14  ;;  %v2671_v52 = vpop.f32.mrf.mxu1  ;;  %3222 = vmatmul.mubr.f32.gmra.mxu0 %v2834_v63  ;;  %v2990_v57 = vpop.f32.mrf.mxu0 }
 0x3ad   :  { %v3540_v18 = vmul.f32 1.442695, %v3475_v55  ;;  %v2837_v28 = vmax.f32 %v2668_v59, 0.0  ;;  %v2672_v48 = vadd.f32 %v2671_v52, %v6648_v60 }
 0x3ae   :  { %v3412_v40 = vmul.f32 6.0, %v3348_v2  ;;  %v2673_v3 = vpop.f32.mrf.mxu1  ;;  %v2993_v21 = vpop.f32.mrf.mxu0 }
 0x3af   :  { %4016 = vpow2.f32 %v3540_v18  ;;  %v2674_v25 = vadd.f32 %v2673_v3, %v6653_v1  ;;  %3226 = vmatprep.mubr.f32.mxu0 %v2837_v28  ;;  %v6889_v8 = vadd.f32 %v6842_v62, %v2993_v21  ;;  %v2838_v22 = vmax.f32 %v2672_v48, 0.0 }
 0x3b0   :  { %v4011_v44 = vpop.eup %4010  ;;  %4018 = vtanh.f32 %v6880_v31  ;;  %v3476_v58 = vadd.f32 -10.0, %v3412_v40  ;;  %v2677_v0 = vpop.f32.mrf.mxu1  ;;  %3227 = vmatmul.mubr.f32.gmra.mxu0 %v2836_v5 }
 0x3b1   :  { %v3349_v43 = vadd.f32 1.0, %v4011_v44  ;;  %v2839_v46 = vmax.f32 %v2674_v25, 0.0  ;;  %v2995_v27 = vpop.f32.mrf.mxu0  ;;  %v2678_v20 = vadd.f32 %v2677_v0, %v6648_v60  ;;  %4020 = vtanh.f32 %v6889_v8 }
 0x3b2   :  { %v3542_v39 = vmul.f32 1.442695, %v3476_v58  ;;  %v2679_v47 = vpop.f32.mrf.mxu1 }
 0x3b3   :  { %v3413_v45 = vmul.f32 6.0, %v3349_v43  ;;  %v2680_v36 = vadd.f32 %v2679_v47, %v6653_v1  ;;  %3231 = vmatprep.mubr.f32.mxu0 %v2839_v46  ;;  %v2998_v26 = vpop.f32.mrf.mxu0  ;;  %v2840_v50 = vmax.f32 %v2678_v20, 0.0 }
 0x3b4   :  { %v4013_v37 = vpop.eup %4012  ;;  %4022 = vpow2.f32 %v3542_v39  ;;  %v2683_v17 = vpop.f32.mrf.mxu1  ;;  %3232 = vmatmul.mubr.f32.gmra.mxu0 %v2838_v22  ;;  %v6896_v16 = vadd.f32 %v6842_v62, %v2998_v26 }
 0x3b5   :  { %v3477_v11 = vadd.f32 -10.0, %v3413_v45  ;;  %v3350_v53 = vadd.f32 1.0, %v4013_v37  ;;  %v2841_v33 = vmax.f32 %v2680_v36, 0.0  ;;  %v2684_v6 = vadd.f32 %v2683_v17, %v6648_v60  ;;  %v3000_v61 = vpop.f32.mrf.mxu0 }
 0x3b6   :  { %v2685_v15 = vpop.f32.mrf.mxu1 }
 0x3b7   :  { %v4015_v35 = vpop.eup %4014  ;;  %v3544_v51 = vmul.f32 1.442695, %v3477_v11  ;;  %v3414_v13 = vmul.f32 6.0, %v3350_v53  ;;  %v2686_v42 = vadd.f32 %v2685_v15, %v6653_v1  ;;  %3236 = vmatprep.mubr.f32.mxu0 %v2841_v33  ;;  %v2842_v32 = vmax.f32 %v2684_v6, 0.0 }
 0x3b8   :  { %v3669_v56 = vsel %vm3668_vm1, %v4015_v35, %v6846_v49  ;;  %v2689_v7 = vpop.f32.mrf.mxu1  ;;  %3237 = vmatmul.mubr.f32.gmra.mxu0 %v2840_v50  ;;  %v3003_v10 = vpop.f32.mrf.mxu0 }
 0x3b9   :  { %3734 = vst.msk [vmem:[%s7595_s7] sm:$0xff] %vm3733_vm2, %v3669_v56  ;;  %4024 = vpow2.f32 %v3544_v51  ;;  %v3478_v29 = vadd.f32 -10.0, %v3414_v13  ;;  %v2843_v9 = vmax.f32 %v2686_v42, 0.0  ;;  %v2690_v49 = vadd.f32 %v2689_v7, %v6648_v60 }
 0x3ba   :  { %4026 = vtanh.f32 %v6896_v16  ;;  %v2691_v41 = vpop.f32.mrf.mxu1  ;;  %v6910_v55 = vadd.f32 %v6842_v62, %v3003_v10  ;;  %v3005_v63 = vpop.f32.mrf.mxu0 }
 0x3bb   :  { %v3546_v30 = vmul.f32 1.442695, %v3478_v29  ;;  %v2692_v14 = vadd.f32 %v2691_v41, %v6653_v1  ;;  %3241 = vmatprep.mubr.f32.mxu0 %v2843_v9  ;;  %v2844_v48 = vmax.f32 %v2690_v49, 0.0 }
 0x3bc   :  { %v4017_v38 = vpop.eup %4016  ;;  %v2695_v18 = vpop.f32.mrf.mxu1  ;;  %4028 = vtanh.f32 %v6910_v55  ;;  %3242 = vmatmul.mubr.f32.gmra.mxu0 %v2842_v32 }
 0x3bd   :  { %v4019_v59 = vpop.eup %4018  ;;  %v3670_v23 = vsel %vm3668_vm1, %v4017_v38, %v6853_v4  ;;  %v3008_v2 = vpop.f32.mrf.mxu0  ;;  %4030 = vpow2.f32 %v3546_v30  ;;  %v2845_v28 = vmax.f32 %v2692_v14, 0.0  ;;  %v2696_v57 = vadd.f32 %v2695_v18, %v6648_v60 }
 0x3be   :  { %3735 = vst.msk [vmem:[%s7595_s7 + $0x8] sm:$0xff] %vm3733_vm2, %v3670_v23  ;;  %v3351_v52 = vadd.f32 1.0, %v4019_v59  ;;  %v2697_v40 = vpop.f32.mrf.mxu1  ;;  %v6923_v5 = vadd.f32 %v6842_v62, %v3008_v2  ;;  %v4021_v3 = vpop.eup %4020 }
 0x3bf   :  { %v3010_v4 = vpop.f32.mrf.mxu0  ;;  %v2698_v25 = vadd.f32 %v2697_v40, %v6653_v1  ;;  %3246 = vmatprep.mubr.f32.mxu0 %v2845_v28  ;;  %v3352_v21 = vadd.f32 1.0, %v4021_v3  ;;  %v2846_v45 = vmax.f32 %v2696_v57, 0.0 }
 0x3c0   :  { %v3415_v44 = vmul.f32 6.0, %v3351_v52  ;;  %v2701_v24 = vpop.f32.mrf.mxu1  ;;  %4032 = vtanh.f32 %v6923_v5  ;;  %3247 = vmatmul.mubr.f32.gmra.mxu0 %v2844_v48 }
 0x3c1   :  { %v4023_v58 = vpop.eup %4022  ;;  %v2847_v0 = vmax.f32 %v2698_v25, 0.0  ;;  %v2702_v22 = vadd.f32 %v2701_v24, %v6648_v60  ;;  %v3013_v46 = vpop.f32.mrf.mxu0  ;;  %v3416_v39 = vmul.f32 6.0, %v3352_v21 }
 0x3c2   :  { %v3479_v43 = vadd.f32 -10.0, %v3415_v44  ;;  %v3671_v27 = vsel %vm3668_vm1, %v4023_v58, %v6860_v19  ;;  %v2703_v20 = vpop.f32.mrf.mxu1  ;;  %v6932_v47 = vadd.f32 %v6842_v62, %v3013_v46 }
 0x3c3   :  { %3736 = vst.msk [vmem:[%s7595_s7 + $0x10] sm:$0xff] %vm3733_vm2, %v3671_v27  ;;  %v2704_v37 = vadd.f32 %v2703_v20, %v6653_v1  ;;  %3251 = vmatprep.mubr.f32.mxu0 %v2847_v0  ;;  %v3015_v11 = vpop.f32.mrf.mxu0  ;;  %v3480_v17 = vadd.f32 -10.0, %v3416_v39  ;;  %v2848_v53 = vmax.f32 %v2702_v22, 0.0 }
 0x3c4   :  { %v3548_v36 = vmul.f32 1.442695, %v3479_v43  ;;  %v2707_v26 = vpop.f32.mrf.mxu1  ;;  %4034 = vtanh.f32 %v6932_v47  ;;  %3252 = vmatmul.mubr.f32.gmra.mxu0 %v2846_v45 }
 0x3c5   :  { %v2849_v33 = vmax.f32 %v2704_v37, 0.0  ;;  %v3550_v6 = vmul.f32 1.442695, %v3480_v17  ;;  %v2708_v15 = vadd.f32 %v2707_v26, %v6648_v60 }
 0x3c6   :  { %v4025_v19 = vpop.eup %4024  ;;  %4036 = vpow2.f32 %v3548_v36  ;;  %v3018_v35 = vpop.f32.mrf.mxu0 }
 0x3c7   :  { %v4027_v51 = vpop.eup %4026  ;;  %v3672_v50 = vsel %vm3668_vm1, %v4025_v19, %v6866_v54  ;;  %v2709_v61 = vpop.f32.mrf.mxu1  ;;  %v6945_v56 = vadd.f32 %v6842_v62, %v3018_v35  ;;  %3256 = vmatprep.mubr.f32.mxu0 %v2849_v33  ;;  %4038 = vpow2.f32 %v3550_v6  ;;  %v2850_v41 = vmax.f32 %v2708_v15, 0.0 }
 0x3c8   :  { %3737 = vst.msk [vmem:[%s7595_s7 + $0x18] sm:$0xff] %vm3733_vm2, %v3672_v50  ;;  %v3353_v13 = vadd.f32 1.0, %v4027_v51  ;;  %v2710_v42 = vadd.f32 %v2709_v61, %v6653_v1  ;;  %v3020_v7 = vpop.f32.mrf.mxu0  ;;  %3257 = vmatmul.mubr.f32.gmra.mxu0 %v2848_v53 }
 0x3c9   :  { %v2713_v10 = vpop.f32.mrf.mxu1  ;;  %v4029_v54 = vpop.eup %4028  ;;  %4040 = vtanh.f32 %v6945_v56 }
 0x3ca   :  { %v3417_v29 = vmul.f32 6.0, %v3353_v13  ;;  %v2851_v9 = vmax.f32 %v2710_v42, 0.0  ;;  %v4031_v32 = vpop.eup %4030  ;;  %v3354_v49 = vadd.f32 1.0, %v4029_v54  ;;  %v2714_v63 = vadd.f32 %v2713_v10, %v6648_v60  ;;  %v3023_v30 = vpop.f32.mrf.mxu0 }
 0x3cb   :  { %v2715_v38 = vpop.f32.mrf.mxu1  ;;  %v3673_v14 = vsel %vm3668_vm1, %v4031_v32, %v6872_v12  ;;  %v6963_v52 = vadd.f32 %v6842_v62, %v3023_v30 }
 0x3cc   :  { %v3481_v59 = vadd.f32 -10.0, %v3417_v29  ;;  %v2716_v23 = vadd.f32 %v2715_v38, %v6653_v1  ;;  %3261 = vmatprep.mubr.f32.mxu0 %v2851_v9  ;;  %3738 = vst.msk [vmem:[%s7595_s7 + $0x20] sm:$0xff] %vm3733_vm2, %v3673_v14  ;;  %v3418_v18 = vmul.f32 6.0, %v3354_v49  ;;  %v3025_v28 = vpop.f32.mrf.mxu0  ;;  %v2852_v44 = vmax.f32 %v2714_v63, 0.0 }
 0x3cd   :  { %v2719_v2 = vpop.f32.mrf.mxu1  ;;  %3262 = vmatmul.mubr.f32.gmra.mxu0 %v2850_v41  ;;  %v4033_v48 = vpop.eup %4032  ;;  %4042 = vtanh.f32 %v6963_v52 }
 0x3ce   :  { %v3552_v57 = vmul.f32 1.442695, %v3481_v59  ;;  %v2853_v40 = vmax.f32 %v2716_v23, 0.0  ;;  %v2720_v12 = vadd.f32 %v2719_v2, %v6648_v60  ;;  %v3482_v4 = vadd.f32 -10.0, %v3418_v18  ;;  %v3028_v21 = vpop.f32.mrf.mxu0 }
 0x3cf   :  { %v3355_v3 = vadd.f32 1.0, %v4033_v48  ;;  %v2721_v25 = vpop.f32.mrf.mxu1  ;;  %v6969_v58 = vadd.f32 %v6842_v62, %v3028_v21 }
 0x3d0   :  { %4044 = vpow2.f32 %v3552_v57  ;;  %v2722_v24 = vadd.f32 %v2721_v25, %v6653_v1  ;;  %3266 = vmatprep.mubr.f32.mxu0 %v2853_v40  ;;  %v3554_v43 = vmul.f32 1.442695, %v3482_v4  ;;  %v3030_v46 = vpop.f32.mrf.mxu0  ;;  %v2854_v39 = vmax.f32 %v2720_v12, 0.0 }
 0x3d1   :  { %v3419_v0 = vmul.f32 6.0, %v3355_v3  ;;  %v2725_v22 = vpop.f32.mrf.mxu1  ;;  %3267 = vmatmul.mubr.f32.gmra.mxu0 %v2852_v44  ;;  %v4035_v27 = vpop.eup %4034  ;;  %4046 = vtanh.f32 %v6969_v58 }
 0x3d2   :  { %v2855_v45 = vmax.f32 %v2722_v24, 0.0  ;;  %4048 = vpow2.f32 %v3554_v43  ;;  %v3356_v37 = vadd.f32 1.0, %v4035_v27  ;;  %v2726_v11 = vadd.f32 %v2725_v22, %v6648_v60  ;;  %v3033_v26 = vpop.f32.mrf.mxu0 }
 0x3d3   :  { %v4037_v20 = vpop.eup %4036  ;;  %v3483_v36 = vadd.f32 -10.0, %v3419_v0  ;;  %v2727_v17 = vpop.f32.mrf.mxu1  ;;  %v6978_v33 = vadd.f32 %v6842_v62, %v3033_v26 }
 0x3d4   :  { %v3674_v19 = vsel %vm3668_vm1, %v4037_v20, %v6880_v31  ;;  %v2728_v53 = vadd.f32 %v2727_v17, %v6653_v1  ;;  %3271 = vmatprep.mubr.f32.mxu0 %v2855_v45  ;;  %v3420_v51 = vmul.f32 6.0, %v3356_v37  ;;  %v3035_v60 = vpop.f32.mrf.mxu0  ;;  %v4039_v50 = vpop.eup %4038  ;;  %v2856_v61 = vmax.f32 %v2726_v11, 0.0 }
 0x3d5   :  { %3739 = vst.msk [vmem:[%s7595_s7 + $0x28] sm:$0xff] %vm3733_vm2, %v3674_v19  ;;  %v3556_v35 = vmul.f32 1.442695, %v3483_v36  ;;  %3272 = vmatmul.mubr.f32.gmra.mxu0 %v2854_v39  ;;  %4050 = vtanh.f32 %v6978_v33  ;;  %v3675_v1 = vsel %vm3668_vm1, %v4039_v50, %v6889_v8 }
 0x3d6   :  { %v2857_v6 = vmax.f32 %v2728_v53, 0.0  ;;  %v4041_v31 = vpop.eup %4040  ;;  %v3484_v15 = vadd.f32 -10.0, %v3420_v51  ;;  %3740 = vst.msk [vmem:[%s7595_s7 + $0x30] sm:$0xff] %vm3733_vm2, %v3675_v1 }
 0x3d7   :  { %4052 = vpow2.f32 %v3556_v35  ;;  %v3357_v13 = vadd.f32 1.0, %v4041_v31  ;;  %v3038_v42 = vpop.f32.mrf.mxu0 }
 0x3d8   :  { %3276 = vmatprep.mubr.f32.mxu0 %v2857_v6  ;;  %v3558_v7 = vmul.f32 1.442695, %v3484_v15  ;;  %v6993_v10 = vadd.f32 %v6842_v62, %v3038_v42 }
 0x3d9   :  { %3277 = vmatmul.mubr.f32.gmra.mxu0 %v2856_v61  ;;  %v3421_v54 = vmul.f32 6.0, %v3357_v13  ;;  %v3040_v29 = vpop.f32.mrf.mxu0 }
 0x3da   :  { %4054 = vpow2.f32 %v3558_v7  ;;  %v4043_v8 = vpop.eup %4042 }
 0x3db   :  { %v3485_v9 = vadd.f32 -10.0, %v3421_v54  ;;  %4056 = vtanh.f32 %v6993_v10  ;;  %v3043_v32 = vpop.f32.mrf.mxu0  ;;  %v3358_v41 = vadd.f32 1.0, %v4043_v8 }
 0x3dc   :  { %v6997_v63 = vadd.f32 %v6842_v62, %v3043_v32 }
 0x3dd   :  { %v4045_v49 = vpop.eup %4044  ;;  %v3560_v30 = vmul.f32 1.442695, %v3485_v9  ;;  %v3045_v14 = vpop.f32.mrf.mxu0  ;;  %v3422_v23 = vmul.f32 6.0, %v3358_v41 }
 0x3de   :  { %v3676_v38 = vsel %vm3668_vm1, %v4045_v49, %v6896_v16  ;;  %v4047_v59 = vpop.eup %4046  ;;  %4058 = vtanh.f32 %v6997_v63 }
 0x3df   :  { %3741 = vst.msk [vmem:[%s7595_s7 + $0x38] sm:$0xff] %vm3733_vm2, %v3676_v38  ;;  %v4049_v18 = vpop.eup %4048  ;;  %4060 = vpow2.f32 %v3560_v30  ;;  %v3359_v2 = vadd.f32 1.0, %v4047_v59  ;;  %v3048_v28 = vpop.f32.mrf.mxu0  ;;  %v3486_v16 = vadd.f32 -10.0, %v3422_v23 }
 0x3e0   :  { %v3677_v48 = vsel %vm3668_vm1, %v4049_v18, %v6910_v55  ;;  %v7011_v57 = vadd.f32 %v6842_v62, %v3048_v28 }
 0x3e1   :  { %3742 = vst.msk [vmem:[%s7595_s7 + $0x40] sm:$0xff] %vm3733_vm2, %v3677_v48  ;;  %v3423_v40 = vmul.f32 6.0, %v3359_v2  ;;  %v3050_v12 = vpop.f32.mrf.mxu0  ;;  %v3562_v3 = vmul.f32 1.442695, %v3486_v16 }
 0x3e2   :  { %v4051_v4 = vpop.eup %4050  ;;  %4062 = vtanh.f32 %v7011_v57 }
 0x3e3   :  { %v3487_v25 = vadd.f32 -10.0, %v3423_v40  ;;  %v3360_v21 = vadd.f32 1.0, %v4051_v4  ;;  %v3053_v24 = vpop.f32.mrf.mxu0  ;;  %4064 = vpow2.f32 %v3562_v3 }
 0x3e4   :  { %v4053_v44 = vpop.eup %4052  ;;  %v7022_v43 = vadd.f32 %v6842_v62, %v3053_v24 }
 0x3e5   :  { %v3678_v55 = vsel %vm3668_vm1, %v4053_v44, %v6923_v5  ;;  %v3564_v0 = vmul.f32 1.442695, %v3487_v25  ;;  %v3424_v22 = vmul.f32 6.0, %v3360_v21  ;;  %v3055_v46 = vpop.f32.mrf.mxu0 }
 0x3e6   :  { %3743 = vst.msk [vmem:[%s7595_s7 + $0x48] sm:$0xff] %vm3733_vm2, %v3678_v55  ;;  %4066 = vtanh.f32 %v7022_v43 }
 0x3e7   :  { %v4055_v27 = vpop.eup %4054  ;;  %4068 = vpow2.f32 %v3564_v0  ;;  %v3488_v39 = vadd.f32 -10.0, %v3424_v22 }
 0x3e8   :  { %v4057_v45 = vpop.eup %4056  ;;  %v3679_v5 = vsel %vm3668_vm1, %v4055_v27, %v6932_v47  ;;  %v3058_v20 = vpop.f32.mrf.mxu0 }
 0x3e9   :  { %3744 = vst.msk [vmem:[%s7595_s7 + $0x50] sm:$0xff] %vm3733_vm2, %v3679_v5  ;;  %v3566_v36 = vmul.f32 1.442695, %v3488_v39  ;;  %v3361_v37 = vadd.f32 1.0, %v4057_v45  ;;  %v7037_v11 = vadd.f32 %v6842_v62, %v3058_v20 }
 0x3ea   :  { %v3060_v17 = vpop.f32.mrf.mxu0 }
 0x3eb   :  { %v4059_v26 = vpop.eup %4058  ;;  %4070 = vpow2.f32 %v3566_v36  ;;  %v3425_v19 = vmul.f32 6.0, %v3361_v37 }
 0x3ec   :  { %v4061_v53 = vpop.eup %4060  ;;  %v3362_v35 = vadd.f32 1.0, %v4059_v26  ;;  %4072 = vtanh.f32 %v7037_v11  ;;  %v3063_v47 = vpop.f32.mrf.mxu0 }
 0x3ed   :  { %v3680_v51 = vsel %vm3668_vm1, %v4061_v53, %v6945_v56  ;;  %v3489_v60 = vadd.f32 -10.0, %v3425_v19  ;;  %v7044_v50 = vadd.f32 %v6842_v62, %v3063_v47 }
 0x3ee   :  { %3745 = vst.msk [vmem:[%s7595_s7 + $0x58] sm:$0xff] %vm3733_vm2, %v3680_v51  ;;  %v3426_v6 = vmul.f32 6.0, %v3362_v35  ;;  %v3065_v31 = vpop.f32.mrf.mxu0 }
 0x3ef   :  { %v4063_v1 = vpop.eup %4062  ;;  %v3568_v15 = vmul.f32 1.442695, %v3489_v60  ;;  %4074 = vtanh.f32 %v7044_v50 }
 0x3f0   :  { %v3490_v61 = vadd.f32 -10.0, %v3426_v6  ;;  %v3363_v13 = vadd.f32 1.0, %v4063_v1  ;;  %v3068_v42 = vpop.f32.mrf.mxu0  ;;  %v4065_v7 = vpop.eup %4064 }
 0x3f1   :  { %4076 = vpow2.f32 %v3568_v15  ;;  %v7052_v56 = vadd.f32 %v6842_v62, %v3068_v42  ;;  %v3681_v54 = vsel %vm3668_vm1, %v4065_v7, %v6963_v52 }
 0x3f2   :  { %v3570_v29 = vmul.f32 1.442695, %v3490_v61  ;;  %v3427_v8 = vmul.f32 6.0, %v3363_v13  ;;  %v3070_v9 = vpop.f32.mrf.mxu0  ;;  %3746 = vst.msk [vmem:[%s7595_s7 + $0x60] sm:$0xff] %vm3733_vm2, %v3681_v54 }
 0x3f3   :  { %v4067_v32 = vpop.eup %4066  ;;  %4078 = vtanh.f32 %v7052_v56 }
 0x3f4   :  { %v4069_v49 = vpop.eup %4068  ;;  %4080 = vpow2.f32 %v3570_v29  ;;  %v3491_v41 = vadd.f32 -10.0, %v3427_v8  ;;  %v3364_v38 = vadd.f32 1.0, %v4067_v32  ;;  %v3073_v30 = vpop.f32.mrf.mxu0 }
 0x3f5   :  { %v3682_v52 = vsel %vm3668_vm1, %v4069_v49, %v6969_v58  ;;  %v7066_v14 = vadd.f32 %v6842_v62, %v3073_v30 }
 0x3f6   :  { %3747 = vst.msk [vmem:[%s7595_s7 + $0x68] sm:$0xff] %vm3733_vm2, %v3682_v52  ;;  %v3572_v59 = vmul.f32 1.442695, %v3491_v41  ;;  %v3428_v23 = vmul.f32 6.0, %v3364_v38  ;;  %v3075_v18 = vpop.f32.mrf.mxu0 }
 0x3f7   :  { %4082 = vtanh.f32 %v7066_v14 }
 0x3f8   :  { %v4071_v2 = vpop.eup %4070  ;;  %4084 = vpow2.f32 %v3572_v59  ;;  %v3492_v28 = vadd.f32 -10.0, %v3428_v23  ;;  %v3078_v48 = vpop.f32.mrf.mxu0 }
 0x3f9   :  { %v4073_v16 = vpop.eup %4072  ;;  %v3683_v58 = vsel %vm3668_vm1, %v4071_v2, %v6978_v33  ;;  %v7077_v40 = vadd.f32 %v6842_v62, %v3078_v48 }
 0x3fa   :  { %3748 = vst.msk [vmem:[%s7595_s7 + $0x70] sm:$0xff] %vm3733_vm2, %v3683_v58  ;;  %v3574_v12 = vmul.f32 1.442695, %v3492_v28  ;;  %v3365_v4 = vadd.f32 1.0, %v4073_v16  ;;  %v3080_v3 = vpop.f32.mrf.mxu0 }
 0x3fb   :  { %4086 = vtanh.f32 %v7077_v40 }
 0x3fc   :  { %v4075_v44 = vpop.eup %4074  ;;  %4088 = vpow2.f32 %v3574_v12  ;;  %v3429_v25 = vmul.f32 6.0, %v3365_v4  ;;  %v3083_v21 = vpop.f32.mrf.mxu0 }
 0x3fd   :  { %v3366_v24 = vadd.f32 1.0, %v4075_v44  ;;  %v7085_v33 = vadd.f32 %v6842_v62, %v3083_v21 }
 0x3fe   :  { %v4077_v55 = vpop.eup %4076  ;;  %v3493_v0 = vadd.f32 -10.0, %v3429_v25  ;;  %v3085_v22 = vpop.f32.mrf.mxu0 }
 0x3ff   :  { %v3684_v46 = vsel %vm3668_vm1, %v4077_v55, %v6993_v10  ;;  %v3430_v27 = vmul.f32 6.0, %v3366_v24  ;;  %4090 = vtanh.f32 %v7085_v33 }
 0x400   :  { %v4079_v39 = vpop.eup %4078  ;;  %3749 = vst.msk [vmem:[%s7595_s7 + $0x78] sm:$0xff] %vm3733_vm2, %v3684_v46  ;;  %v3576_v45 = vmul.f32 1.442695, %v3493_v0  ;;  %v3088_v5 = vpop.f32.mrf.mxu0 }
 0x401   :  { %v4081_v20 = vpop.eup %4080  ;;  %v3494_v36 = vadd.f32 -10.0, %v3430_v27  ;;  %v3367_v37 = vadd.f32 1.0, %v4079_v39  ;;  %v7096_v17 = vadd.f32 %v6842_v62, %v3088_v5 }
 0x402   :  { %v3685_v10 = vsel %vm3668_vm1, %v4081_v20, %v6997_v63  ;;  %4092 = vpow2.f32 %v3576_v45  ;;  %v3090_v26 = vpop.f32.mrf.mxu0 }
 0x403   :  { %3750 = vst.msk [vmem:[%s7595_s7 + $0x80] sm:$0xff] %vm3733_vm2, %v3685_v10  ;;  %v3578_v19 = vmul.f32 1.442695, %v3494_v36  ;;  %v3431_v53 = vmul.f32 6.0, %v3367_v37  ;;  %4094 = vtanh.f32 %v7096_v17 }
 0x404   :  { %v4083_v35 = vpop.eup %4082  ;;  %v3093_v47 = vpop.f32.mrf.mxu0 }
 0x405   :  { %v4085_v51 = vpop.eup %4084  ;;  %4096 = vpow2.f32 %v3578_v19  ;;  %v3495_v60 = vadd.f32 -10.0, %v3431_v53  ;;  %v3368_v6 = vadd.f32 1.0, %v4083_v35  ;;  %v7107_v31 = vadd.f32 %v6842_v62, %v3093_v47 }
 0x406   :  { %v3686_v63 = vsel %vm3668_vm1, %v4085_v51, %v7011_v57  ;;  %v3095_v1 = vpop.f32.mrf.mxu0 }
 0x407   :  { %3751 = vst.msk [vmem:[%s7595_s7 + $0x88] sm:$0xff] %vm3733_vm2, %v3686_v63  ;;  %v3580_v15 = vmul.f32 1.442695, %v3495_v60  ;;  %v3432_v61 = vmul.f32 6.0, %v3368_v6  ;;  %4098 = vtanh.f32 %v7107_v31  ;;  %v7175_v63 = vld [vmem:[%s7594_s6] ss:$0 sm:$0xff] }
 0x408   :  { %v4087_v13 = vpop.eup %4086  ;;  %v3098_v42 = vpop.f32.mrf.mxu0 }
 0x409   :  { %v4089_v7 = vpop.eup %4088  ;;  %4100 = vpow2.f32 %v3580_v15  ;;  %v3496_v54 = vadd.f32 -10.0, %v3432_v61  ;;  %v3369_v29 = vadd.f32 1.0, %v4087_v13  ;;  %v7118_v8 = vadd.f32 %v6842_v62, %v3098_v42 }
 0x40a   :  { %v3687_v57 = vsel %vm3668_vm1, %v4089_v7, %v7022_v43  ;;  %v3100_v9 = vpop.f32.mrf.mxu0 }
 0x40b   :  { %3752 = vst.msk [vmem:[%s7595_s7 + $0x90] sm:$0xff] %vm3733_vm2, %v3687_v57  ;;  %v3582_v32 = vmul.f32 1.442695, %v3496_v54  ;;  %v3433_v49 = vmul.f32 6.0, %v3369_v29  ;;  %4102 = vtanh.f32 %v7118_v8 }
 0x40c   :  { %v4091_v41 = vpop.eup %4090  ;;  %v3103_v38 = vpop.f32.mrf.mxu0 }
 0x40d   :  { %4104 = vpow2.f32 %v3582_v32  ;;  %v3497_v30 = vadd.f32 -10.0, %v3433_v49  ;;  %v3370_v52 = vadd.f32 1.0, %v4091_v41  ;;  %v7129_v59 = vadd.f32 %v6842_v62, %v3103_v38 }
 0x40e   :  { %v3105_v23 = vpop.f32.mrf.mxu0 }
 0x40f   :  { %v4093_v43 = vpop.eup %4092  ;;  %v3584_v18 = vmul.f32 1.442695, %v3497_v30  ;;  %v3434_v2 = vmul.f32 6.0, %v3370_v52  ;;  %4106 = vtanh.f32 %v7129_v59 }
 0x410   :  { %v4095_v28 = vpop.eup %4094  ;;  %v3688_v48 = vsel %vm3668_vm1, %v4093_v43, %v7037_v11  ;;  %v3108_v16 = vpop.f32.mrf.mxu0 }
 0x411   :  { %3753 = vst.msk [vmem:[%s7595_s7 + $0x98] sm:$0xff] %vm3733_vm2, %v3688_v48  ;;  %4108 = vpow2.f32 %v3584_v18  ;;  %v3498_v58 = vadd.f32 -10.0, %v3434_v2  ;;  %v3371_v12 = vadd.f32 1.0, %v4095_v28  ;;  %v7140_v4 = vadd.f32 %v6842_v62, %v3108_v16 }
 0x412   :  { %v4097_v3 = vpop.eup %4096  ;;  %v3110_v44 = vpop.f32.mrf.mxu0 }
 0x413   :  { %v3689_v25 = vsel %vm3668_vm1, %v4097_v3, %v7044_v50  ;;  %v3586_v21 = vmul.f32 1.442695, %v3498_v58  ;;  %v3435_v11 = vmul.f32 6.0, %v3371_v12  ;;  %4110 = vtanh.f32 %v7140_v4 }
 0x414   :  { %v4099_v24 = vpop.eup %4098  ;;  %3754 = vst.msk [vmem:[%s7595_s7 + $0xa0] sm:$0xff] %vm3733_vm2, %v3689_v25  ;;  %v3113_v55 = vpop.f32.mrf.mxu0 }
 0x415   :  { %4112 = vpow2.f32 %v3586_v21  ;;  %v3499_v0 = vadd.f32 -10.0, %v3435_v11  ;;  %v3372_v22 = vadd.f32 1.0, %v4099_v24  ;;  %v7151_v46 = vadd.f32 %v6842_v62, %v3113_v55 }
 0x416   :  { %v4101_v27 = vpop.eup %4100  ;;  %v3115_v39 = vpop.f32.mrf.mxu0 }
 0x417   :  { %v3690_v50 = vsel %vm3668_vm1, %v4101_v27, %v7052_v56  ;;  %v3588_v45 = vmul.f32 1.442695, %v3499_v0  ;;  %v3436_v5 = vmul.f32 6.0, %v3372_v22  ;;  %4114 = vtanh.f32 %v7151_v46 }
 0x418   :  { %v4103_v20 = vpop.eup %4102  ;;  %3755 = vst.msk [vmem:[%s7595_s7 + $0xa8] sm:$0xff] %vm3733_vm2, %v3690_v50  ;;  %v3118_v36 = vpop.f32.mrf.mxu0 }
 0x419   :  { %4116 = vpow2.f32 %v3588_v45  ;;  %v3500_v37 = vadd.f32 -10.0, %v3436_v5  ;;  %v3373_v10 = vadd.f32 1.0, %v4103_v20  ;;  %v7162_v26 = vadd.f32 %v6842_v62, %v3118_v36 }
 0x41a   :  { %v4105_v19 = vpop.eup %4104  ;;  %v3120_v53 = vpop.f32.mrf.mxu0 }
 0x41b   :  { %v3691_v56 = vsel %vm3668_vm1, %v4105_v19, %v7066_v14  ;;  %v3590_v35 = vmul.f32 1.442695, %v3500_v37  ;;  %v3437_v47 = vmul.f32 6.0, %v3373_v10  ;;  %4118 = vtanh.f32 %v7162_v26 }
 0x41c   :  { %v4107_v51 = vpop.eup %4106  ;;  %3756 = vst.msk [vmem:[%s7595_s7 + $0xb0] sm:$0xff] %vm3733_vm2, %v3691_v56  ;;  %v3123_v60 = vpop.f32.mrf.mxu0 }
 0x41d   :  { %4120 = vpow2.f32 %v3590_v35  ;;  %v3501_v62 = vadd.f32 -10.0, %v3437_v47  ;;  %v3374_v6 = vadd.f32 1.0, %v4107_v51  ;;  %v7178_v14 = vadd.f32 %v7175_v63, %v3123_v60 }
 0x41e   :  { %v4109_v1 = vpop.eup %4108  ;;  %v3125_v15 = vpop.f32.mrf.mxu0 }
 0x41f   :  { %v3692_v61 = vsel %vm3668_vm1, %v4109_v1, %v7077_v40  ;;  %v3592_v13 = vmul.f32 1.442695, %v3501_v62  ;;  %v3438_v42 = vmul.f32 6.0, %v3374_v6  ;;  %4122 = vtanh.f32 %v7178_v14 }
 0x420   :  { %v4111_v7 = vpop.eup %4110  ;;  %3757 = vst.msk [vmem:[%s7595_s7 + $0xb8] sm:$0xff] %vm3733_vm2, %v3692_v61  ;;  %v3128_v54 = vpop.f32.mrf.mxu0 }
 0x421   :  { %4124 = vpow2.f32 %v3592_v13  ;;  %v3502_v29 = vadd.f32 -10.0, %v3438_v42  ;;  %v3375_v57 = vadd.f32 1.0, %v4111_v7  ;;  %v7189_v9 = vadd.f32 %v7175_v63, %v3128_v54 }
 0x422   :  { %v4113_v32 = vpop.eup %4112  ;;  %v3130_v49 = vpop.f32.mrf.mxu0 }
 0x423   :  { %v3693_v40 = vsel %vm3668_vm1, %v4113_v32, %v7085_v33  ;;  %v3594_v41 = vmul.f32 1.442695, %v3502_v29  ;;  %v3439_v38 = vmul.f32 6.0, %v3375_v57  ;;  %4126 = vtanh.f32 %v7189_v9 }
 0x424   :  { %v4115_v30 = vpop.eup %4114  ;;  %3758 = vst.msk [vmem:[%s7595_s7 + $0xc0] sm:$0xff] %vm3733_vm2, %v3693_v40  ;;  %v3133_v52 = vpop.f32.mrf.mxu0 }
 0x425   :  { %4128 = vpow2.f32 %v3594_v41  ;;  %v3503_v23 = vadd.f32 -10.0, %v3439_v38  ;;  %v3376_v43 = vadd.f32 1.0, %v4115_v30  ;;  %v7200_v18 = vadd.f32 %v7175_v63, %v3133_v52 }
 0x426   :  { %v4117_v2 = vpop.eup %4116  ;;  %v3135_v28 = vpop.f32.mrf.mxu0 }
 0x427   :  { %v3694_v33 = vsel %vm3668_vm1, %v4117_v2, %v7096_v17  ;;  %v3596_v48 = vmul.f32 1.442695, %v3503_v23  ;;  %v3440_v16 = vmul.f32 6.0, %v3376_v43  ;;  %4130 = vtanh.f32 %v7200_v18 }
 0x428   :  { %v4119_v58 = vpop.eup %4118  ;;  %3759 = vst.msk [vmem:[%s7595_s7 + $0xc8] sm:$0xff] %vm3733_vm2, %v3694_v33  ;;  %v3138_v12 = vpop.f32.mrf.mxu0 }
 0x429   :  { %4132 = vpow2.f32 %v3596_v48  ;;  %v3504_v3 = vadd.f32 -10.0, %v3440_v16  ;;  %v3377_v44 = vadd.f32 1.0, %v4119_v58  ;;  %v7211_v25 = vadd.f32 %v7175_v63, %v3138_v12 }
 0x42a   :  { %v4121_v21 = vpop.eup %4120  ;;  %v3140_v11 = vpop.f32.mrf.mxu0 }
 0x42b   :  { %v3695_v17 = vsel %vm3668_vm1, %v4121_v21, %v7107_v31  ;;  %v3598_v24 = vmul.f32 1.442695, %v3504_v3  ;;  %v3441_v55 = vmul.f32 6.0, %v3377_v44  ;;  %4134 = vtanh.f32 %v7211_v25 }
 0x42c   :  { %v4123_v0 = vpop.eup %4122  ;;  %3760 = vst.msk [vmem:[%s7595_s7 + $0xd0] sm:$0xff] %vm3733_vm2, %v3695_v17  ;;  %v3143_v22 = vpop.f32.mrf.mxu0 }
 0x42d   :  { %4136 = vpow2.f32 %v3598_v24  ;;  %v3505_v27 = vadd.f32 -10.0, %v3441_v55  ;;  %v3378_v39 = vadd.f32 1.0, %v4123_v0  ;;  %v7222_v50 = vadd.f32 %v7175_v63, %v3143_v22 }
 0x42e   :  { %v4125_v45 = vpop.eup %4124  ;;  %v3145_v5 = vpop.f32.mrf.mxu0 }
 0x42f   :  { %v3696_v31 = vsel %vm3668_vm1, %v4125_v45, %v7118_v8  ;;  %v3600_v20 = vmul.f32 1.442695, %v3505_v27  ;;  %v3442_v36 = vmul.f32 6.0, %v3378_v39  ;;  %4138 = vtanh.f32 %v7222_v50 }
 0x430   :  { %v4127_v37 = vpop.eup %4126  ;;  %3761 = vst.msk [vmem:[%s7595_s7 + $0xd8] sm:$0xff] %vm3733_vm2, %v3696_v31  ;;  %v3148_v10 = vpop.f32.mrf.mxu0 }
 0x431   :  { %4140 = vpow2.f32 %v3600_v20  ;;  %v3506_v19 = vadd.f32 -10.0, %v3442_v36  ;;  %v3379_v53 = vadd.f32 1.0, %v4127_v37  ;;  %v7233_v56 = vadd.f32 %v7175_v63, %v3148_v10 }
 0x432   :  { %v4129_v35 = vpop.eup %4128  ;;  %v3150_v47 = vpop.f32.mrf.mxu0 }
 0x433   :  { %v3697_v8 = vsel %vm3668_vm1, %v4129_v35, %v7129_v59  ;;  %v3602_v51 = vmul.f32 1.442695, %v3506_v19  ;;  %v3443_v60 = vmul.f32 6.0, %v3379_v53  ;;  %4142 = vtanh.f32 %v7233_v56 }
 0x434   :  { %v4131_v62 = vpop.eup %4130  ;;  %3762 = vst.msk [vmem:[%s7595_s7 + $0xe0] sm:$0xff] %vm3733_vm2, %v3697_v8  ;;  %v3153_v6 = vpop.f32.mrf.mxu0 }
 0x435   :  { %4144 = vpow2.f32 %v3602_v51  ;;  %v3507_v1 = vadd.f32 -10.0, %v3443_v60  ;;  %v3380_v15 = vadd.f32 1.0, %v4131_v62  ;;  %v7244_v61 = vadd.f32 %v7175_v63, %v3153_v6 }
 0x436   :  { %v4133_v13 = vpop.eup %4132  ;;  %v3155_v42 = vpop.f32.mrf.mxu0 }
 0x437   :  { %v3698_v59 = vsel %vm3668_vm1, %v4133_v13, %v7140_v4  ;;  %v3604_v7 = vmul.f32 1.442695, %v3507_v1  ;;  %v3444_v54 = vmul.f32 6.0, %v3380_v15  ;;  %4146 = vtanh.f32 %v7244_v61 }
 0x438   :  { %v4135_v29 = vpop.eup %4134  ;;  %3763 = vst.msk [vmem:[%s7595_s7 + $0xe8] sm:$0xff] %vm3733_vm2, %v3698_v59  ;;  %v3158_v57 = vpop.f32.mrf.mxu0 }
 0x439   :  { %4148 = vpow2.f32 %v3604_v7  ;;  %v3508_v32 = vadd.f32 -10.0, %v3444_v54  ;;  %v3381_v49 = vadd.f32 1.0, %v4135_v29  ;;  %v7255_v40 = vadd.f32 %v7175_v63, %v3158_v57 }
 0x43a   :  { %v4137_v41 = vpop.eup %4136  ;;  %v3160_v38 = vpop.f32.mrf.mxu0 }
 0x43b   :  { %v3699_v4 = vsel %vm3668_vm1, %v4137_v41, %v7151_v46  ;;  %v3606_v30 = vmul.f32 1.442695, %v3508_v32  ;;  %v3445_v52 = vmul.f32 6.0, %v3381_v49  ;;  %4150 = vtanh.f32 %v7255_v40 }
 0x43c   :  { %v4139_v23 = vpop.eup %4138  ;;  %3764 = vst.msk [vmem:[%s7595_s7 + $0xf0] sm:$0xff] %vm3733_vm2, %v3699_v4  ;;  %v3163_v43 = vpop.f32.mrf.mxu0 }
 0x43d   :  { %4152 = vpow2.f32 %v3606_v30  ;;  %v3509_v2 = vadd.f32 -10.0, %v3445_v52  ;;  %v3382_v28 = vadd.f32 1.0, %v4139_v23  ;;  %v7266_v33 = vadd.f32 %v7175_v63, %v3163_v43 }
 0x43e   :  { %v4141_v48 = vpop.eup %4140  ;;  %v3165_v16 = vpop.f32.mrf.mxu0 }
 0x43f   :  { %v3700_v46 = vsel %vm3668_vm1, %v4141_v48, %v7162_v26  ;;  %v3608_v58 = vmul.f32 1.442695, %v3509_v2  ;;  %v3446_v12 = vmul.f32 6.0, %v3382_v28  ;;  %4154 = vtanh.f32 %v7266_v33 }
 0x440   :  { %v4143_v3 = vpop.eup %4142  ;;  %3765 = vst.msk [vmem:[%s7595_s7 + $0xf8] sm:$0xff] %vm3733_vm2, %v3700_v46  ;;  %v3168_v44 = vpop.f32.mrf.mxu0 }
 0x441   :  { %4156 = vpow2.f32 %v3608_v58  ;;  %v3510_v21 = vadd.f32 -10.0, %v3446_v12  ;;  %v3383_v11 = vadd.f32 1.0, %v4143_v3  ;;  %v7277_v17 = vadd.f32 %v7175_v63, %v3168_v44 }
 0x442   :  { %v4145_v24 = vpop.eup %4144  ;;  %v3170_v55 = vpop.f32.mrf.mxu0 }
 0x443   :  { %v3701_v26 = vsel %vm3668_vm1, %v4145_v24, %v7178_v14  ;;  %v3610_v0 = vmul.f32 1.442695, %v3510_v21  ;;  %v3447_v22 = vmul.f32 6.0, %v3383_v11  ;;  %4158 = vtanh.f32 %v7277_v17 }
 0x444   :  { %v4147_v27 = vpop.eup %4146  ;;  %3766 = vst.msk [vmem:[%s7595_s7 + $0x100] sm:$0xff] %vm3733_vm2, %v3701_v26  ;;  %v3173_v39 = vpop.f32.mrf.mxu0 }
 0x445   :  { %4160 = vpow2.f32 %v3610_v0  ;;  %v3511_v45 = vadd.f32 -10.0, %v3447_v22  ;;  %v3384_v5 = vadd.f32 1.0, %v4147_v27  ;;  %v7288_v31 = vadd.f32 %v7175_v63, %v3173_v39 }
 0x446   :  { %v4149_v20 = vpop.eup %4148  ;;  %v3175_v36 = vpop.f32.mrf.mxu0 }
 0x447   :  { %v3702_v14 = vsel %vm3668_vm1, %v4149_v20, %v7189_v9  ;;  %v3612_v37 = vmul.f32 1.442695, %v3511_v45  ;;  %v3448_v10 = vmul.f32 6.0, %v3384_v5  ;;  %4162 = vtanh.f32 %v7288_v31 }
 0x448   :  { %v4151_v19 = vpop.eup %4150  ;;  %3767 = vst.msk [vmem:[%s7595_s7 + $0x108] sm:$0xff] %vm3733_vm2, %v3702_v14  ;;  %v3178_v53 = vpop.f32.mrf.mxu0 }
 0x449   :  { %4164 = vpow2.f32 %v3612_v37  ;;  %v3512_v35 = vadd.f32 -10.0, %v3448_v10  ;;  %v3385_v47 = vadd.f32 1.0, %v4151_v19  ;;  %v7299_v8 = vadd.f32 %v7175_v63, %v3178_v53 }
 0x44a   :  { %v4153_v51 = vpop.eup %4152  ;;  %v3180_v60 = vpop.f32.mrf.mxu0 }
 0x44b   :  { %v3703_v9 = vsel %vm3668_vm1, %v4153_v51, %v7200_v18  ;;  %v3614_v62 = vmul.f32 1.442695, %v3512_v35  ;;  %v3449_v6 = vmul.f32 6.0, %v3385_v47  ;;  %4166 = vtanh.f32 %v7299_v8 }
 0x44c   :  { %v4155_v1 = vpop.eup %4154  ;;  %3768 = vst.msk [vmem:[%s7595_s7 + $0x110] sm:$0xff] %vm3733_vm2, %v3703_v9  ;;  %v3183_v15 = vpop.f32.mrf.mxu0 }
 0x44d   :  { %4168 = vpow2.f32 %v3614_v62  ;;  %v3513_v13 = vadd.f32 -10.0, %v3449_v6  ;;  %v3386_v42 = vadd.f32 1.0, %v4155_v1  ;;  %v7310_v59 = vadd.f32 %v7175_v63, %v3183_v15 }
 0x44e   :  { %v4157_v7 = vpop.eup %4156  ;;  %v3185_v54 = vpop.f32.mrf.mxu0 }
 0x44f   :  { %v3704_v18 = vsel %vm3668_vm1, %v4157_v7, %v7211_v25  ;;  %v3616_v29 = vmul.f32 1.442695, %v3513_v13  ;;  %v3450_v57 = vmul.f32 6.0, %v3386_v42  ;;  %4170 = vtanh.f32 %v7310_v59 }
 0x450   :  { %v4159_v32 = vpop.eup %4158  ;;  %3769 = vst.msk [vmem:[%s7595_s7 + $0x118] sm:$0xff] %vm3733_vm2, %v3704_v18  ;;  %v3188_v49 = vpop.f32.mrf.mxu0 }
 0x451   :  { %4172 = vpow2.f32 %v3616_v29  ;;  %v3514_v41 = vadd.f32 -10.0, %v3450_v57  ;;  %v3387_v38 = vadd.f32 1.0, %v4159_v32  ;;  %v7321_v4 = vadd.f32 %v7175_v63, %v3188_v49 }
 0x452   :  { %v4161_v30 = vpop.eup %4160  ;;  %v3190_v52 = vpop.f32.mrf.mxu0 }
 0x453   :  { %v3705_v25 = vsel %vm3668_vm1, %v4161_v30, %v7222_v50  ;;  %v3618_v23 = vmul.f32 1.442695, %v3514_v41  ;;  %v3451_v43 = vmul.f32 6.0, %v3387_v38  ;;  %4174 = vtanh.f32 %v7321_v4 }
 0x454   :  { %v4163_v2 = vpop.eup %4162  ;;  %3770 = vst.msk [vmem:[%s7595_s7 + $0x120] sm:$0xff] %vm3733_vm2, %v3705_v25  ;;  %v3193_v28 = vpop.f32.mrf.mxu0 }
 0x455   :  { %4176 = vpow2.f32 %v3618_v23  ;;  %v3515_v48 = vadd.f32 -10.0, %v3451_v43  ;;  %v3388_v16 = vadd.f32 1.0, %v4163_v2  ;;  %v7332_v46 = vadd.f32 %v7175_v63, %v3193_v28 }
 0x456   :  { %v4165_v58 = vpop.eup %4164  ;;  %v3195_v12 = vpop.f32.mrf.mxu0 }
 0x457   :  { %v3706_v50 = vsel %vm3668_vm1, %v4165_v58, %v7233_v56  ;;  %v3620_v3 = vmul.f32 1.442695, %v3515_v48  ;;  %v3452_v44 = vmul.f32 6.0, %v3388_v16  ;;  %4178 = vtanh.f32 %v7332_v46 }
 0x458   :  { %v4167_v21 = vpop.eup %4166  ;;  %3771 = vst.msk [vmem:[%s7595_s7 + $0x128] sm:$0xff] %vm3733_vm2, %v3706_v50  ;;  %v3198_v11 = vpop.f32.mrf.mxu0 }
 0x459   :  { %4180 = vpow2.f32 %v3620_v3  ;;  %v3516_v24 = vadd.f32 -10.0, %v3452_v44  ;;  %v3389_v55 = vadd.f32 1.0, %v4167_v21  ;;  %v7343_v26 = vadd.f32 %v7175_v63, %v3198_v11 }
 0x45a   :  { %v4169_v0 = vpop.eup %4168  ;;  %v3200_v22 = vpop.f32.mrf.mxu0 }
 0x45b   :  { %v3707_v56 = vsel %vm3668_vm1, %v4169_v0, %v7244_v61  ;;  %v3622_v27 = vmul.f32 1.442695, %v3516_v24  ;;  %v3453_v39 = vmul.f32 6.0, %v3389_v55  ;;  %4182 = vtanh.f32 %v7343_v26 }
 0x45c   :  { %v4171_v45 = vpop.eup %4170  ;;  %3772 = vst.msk [vmem:[%s7595_s7 + $0x130] sm:$0xff] %vm3733_vm2, %v3707_v56  ;;  %v3203_v5 = vpop.f32.mrf.mxu0 }
 0x45d   :  { %4184 = vpow2.f32 %v3622_v27  ;;  %v3517_v20 = vadd.f32 -10.0, %v3453_v39  ;;  %v3390_v36 = vadd.f32 1.0, %v4171_v45  ;;  %v7354_v14 = vadd.f32 %v7175_v63, %v3203_v5 }
 0x45e   :  { %v4173_v37 = vpop.eup %4172  ;;  %v3205_v10 = vpop.f32.mrf.mxu0 }
 0x45f   :  { %v3708_v61 = vsel %vm3668_vm1, %v4173_v37, %v7255_v40  ;;  %v3624_v19 = vmul.f32 1.442695, %v3517_v20  ;;  %v3454_v53 = vmul.f32 6.0, %v3390_v36  ;;  %4186 = vtanh.f32 %v7354_v14 }
 0x460   :  { %v4175_v35 = vpop.eup %4174  ;;  %3773 = vst.msk [vmem:[%s7595_s7 + $0x138] sm:$0xff] %vm3733_vm2, %v3708_v61  ;;  %v3208_v47 = vpop.f32.mrf.mxu0 }
 0x461   :  { %4188 = vpow2.f32 %v3624_v19  ;;  %v3518_v51 = vadd.f32 -10.0, %v3454_v53  ;;  %v3391_v60 = vadd.f32 1.0, %v4175_v35  ;;  %v7365_v9 = vadd.f32 %v7175_v63, %v3208_v47 }
 0x462   :  { %v4177_v62 = vpop.eup %4176  ;;  %v3210_v6 = vpop.f32.mrf.mxu0 }
 0x463   :  { %v3709_v40 = vsel %vm3668_vm1, %v4177_v62, %v7266_v33  ;;  %v3626_v1 = vmul.f32 1.442695, %v3518_v51  ;;  %v3455_v15 = vmul.f32 6.0, %v3391_v60  ;;  %4190 = vtanh.f32 %v7365_v9 }
 0x464   :  { %v4179_v13 = vpop.eup %4178  ;;  %3774 = vst.msk [vmem:[%s7595_s7 + $0x140] sm:$0xff] %vm3733_vm2, %v3709_v40  ;;  %v3213_v42 = vpop.f32.mrf.mxu0 }
 0x465   :  { %4192 = vpow2.f32 %v3626_v1  ;;  %v3519_v7 = vadd.f32 -10.0, %v3455_v15  ;;  %v3392_v54 = vadd.f32 1.0, %v4179_v13  ;;  %v7376_v18 = vadd.f32 %v7175_v63, %v3213_v42 }
 0x466   :  { %v4181_v29 = vpop.eup %4180  ;;  %v3215_v57 = vpop.f32.mrf.mxu0 }
 0x467   :  { %v3710_v33 = vsel %vm3668_vm1, %v4181_v29, %v7277_v17  ;;  %v3628_v32 = vmul.f32 1.442695, %v3519_v7  ;;  %v3456_v49 = vmul.f32 6.0, %v3392_v54  ;;  %4194 = vtanh.f32 %v7376_v18 }
 0x468   :  { %v4183_v41 = vpop.eup %4182  ;;  %3775 = vst.msk [vmem:[%s7595_s7 + $0x148] sm:$0xff] %vm3733_vm2, %v3710_v33  ;;  %v3218_v38 = vpop.f32.mrf.mxu0 }
 0x469   :  { %4196 = vpow2.f32 %v3628_v32  ;;  %v3520_v30 = vadd.f32 -10.0, %v3456_v49  ;;  %v3393_v52 = vadd.f32 1.0, %v4183_v41  ;;  %v7387_v25 = vadd.f32 %v7175_v63, %v3218_v38 }
 0x46a   :  { %v4185_v23 = vpop.eup %4184  ;;  %v3220_v43 = vpop.f32.mrf.mxu0 }
 0x46b   :  { %v3711_v17 = vsel %vm3668_vm1, %v4185_v23, %v7288_v31  ;;  %v3630_v2 = vmul.f32 1.442695, %v3520_v30  ;;  %v3457_v28 = vmul.f32 6.0, %v3393_v52  ;;  %4198 = vtanh.f32 %v7387_v25 }
 0x46c   :  { %v4187_v48 = vpop.eup %4186  ;;  %3776 = vst.msk [vmem:[%s7595_s7 + $0x150] sm:$0xff] %vm3733_vm2, %v3711_v17  ;;  %v3223_v16 = vpop.f32.mrf.mxu0 }
 0x46d   :  { %4200 = vpow2.f32 %v3630_v2  ;;  %v3521_v58 = vadd.f32 -10.0, %v3457_v28  ;;  %v3394_v12 = vadd.f32 1.0, %v4187_v48  ;;  %v7398_v50 = vadd.f32 %v7175_v63, %v3223_v16 }
 0x46e   :  { %v4189_v3 = vpop.eup %4188  ;;  %v3225_v44 = vpop.f32.mrf.mxu0 }
 0x46f   :  { %v3712_v31 = vsel %vm3668_vm1, %v4189_v3, %v7299_v8  ;;  %v3632_v21 = vmul.f32 1.442695, %v3521_v58  ;;  %v3458_v11 = vmul.f32 6.0, %v3394_v12  ;;  %4202 = vtanh.f32 %v7398_v50 }
 0x470   :  { %v4191_v24 = vpop.eup %4190  ;;  %3777 = vst.msk [vmem:[%s7595_s7 + $0x158] sm:$0xff] %vm3733_vm2, %v3712_v31  ;;  %v3228_v55 = vpop.f32.mrf.mxu0 }
 0x471   :  { %4204 = vpow2.f32 %v3632_v21  ;;  %v3522_v0 = vadd.f32 -10.0, %v3458_v11  ;;  %v3395_v22 = vadd.f32 1.0, %v4191_v24  ;;  %v7409_v56 = vadd.f32 %v7175_v63, %v3228_v55 }
 0x472   :  { %v4193_v27 = vpop.eup %4192  ;;  %v3230_v39 = vpop.f32.mrf.mxu0 }
 0x473   :  { %v3713_v8 = vsel %vm3668_vm1, %v4193_v27, %v7310_v59  ;;  %v3634_v45 = vmul.f32 1.442695, %v3522_v0  ;;  %v3459_v5 = vmul.f32 6.0, %v3395_v22  ;;  %4206 = vtanh.f32 %v7409_v56 }
 0x474   :  { %v4195_v20 = vpop.eup %4194  ;;  %3778 = vst.msk [vmem:[%s7595_s7 + $0x160] sm:$0xff] %vm3733_vm2, %v3713_v8  ;;  %v3233_v36 = vpop.f32.mrf.mxu0 }
 0x475   :  { %4208 = vpow2.f32 %v3634_v45  ;;  %v3523_v37 = vadd.f32 -10.0, %v3459_v5  ;;  %v3396_v10 = vadd.f32 1.0, %v4195_v20  ;;  %v7420_v61 = vadd.f32 %v7175_v63, %v3233_v36 }
 0x476   :  { %v4197_v19 = vpop.eup %4196  ;;  %v3235_v53 = vpop.f32.mrf.mxu0 }
 0x477   :  { %v3714_v59 = vsel %vm3668_vm1, %v4197_v19, %v7321_v4  ;;  %v3636_v35 = vmul.f32 1.442695, %v3523_v37  ;;  %v3460_v47 = vmul.f32 6.0, %v3396_v10  ;;  %4210 = vtanh.f32 %v7420_v61 }
 0x478   :  { %v4199_v51 = vpop.eup %4198  ;;  %3779 = vst.msk [vmem:[%s7595_s7 + $0x168] sm:$0xff] %vm3733_vm2, %v3714_v59  ;;  %v3238_v60 = vpop.f32.mrf.mxu0 }
 0x479   :  { %4212 = vpow2.f32 %v3636_v35  ;;  %v3524_v62 = vadd.f32 -10.0, %v3460_v47  ;;  %v3397_v6 = vadd.f32 1.0, %v4199_v51  ;;  %v7431_v40 = vadd.f32 %v7175_v63, %v3238_v60 }
 0x47a   :  { %v4201_v1 = vpop.eup %4200  ;;  %v3240_v15 = vpop.f32.mrf.mxu0 }
 0x47b   :  { %v3715_v4 = vsel %vm3668_vm1, %v4201_v1, %v7332_v46  ;;  %v3638_v13 = vmul.f32 1.442695, %v3524_v62  ;;  %v3461_v42 = vmul.f32 6.0, %v3397_v6  ;;  %4214 = vtanh.f32 %v7431_v40 }
 0x47c   :  { %v4203_v7 = vpop.eup %4202  ;;  %3780 = vst.msk [vmem:[%s7595_s7 + $0x170] sm:$0xff] %vm3733_vm2, %v3715_v4  ;;  %v3243_v54 = vpop.f32.mrf.mxu0 }
 0x47d   :  { %4216 = vpow2.f32 %v3638_v13  ;;  %v3525_v29 = vadd.f32 -10.0, %v3461_v42  ;;  %v3398_v57 = vadd.f32 1.0, %v4203_v7  ;;  %v7442_v33 = vadd.f32 %v7175_v63, %v3243_v54 }
 0x47e   :  { %v4205_v32 = vpop.eup %4204  ;;  %v3245_v49 = vpop.f32.mrf.mxu0 }
 0x47f   :  { %v3716_v46 = vsel %vm3668_vm1, %v4205_v32, %v7343_v26  ;;  %v3640_v41 = vmul.f32 1.442695, %v3525_v29  ;;  %v3462_v38 = vmul.f32 6.0, %v3398_v57  ;;  %4218 = vtanh.f32 %v7442_v33 }
 0x480   :  { %v4207_v30 = vpop.eup %4206  ;;  %3781 = vst.msk [vmem:[%s7595_s7 + $0x178] sm:$0xff] %vm3733_vm2, %v3716_v46  ;;  %v3248_v52 = vpop.f32.mrf.mxu0 }
 0x481   :  { %4220 = vpow2.f32 %v3640_v41  ;;  %v3526_v23 = vadd.f32 -10.0, %v3462_v38  ;;  %v3399_v43 = vadd.f32 1.0, %v4207_v30  ;;  %v7453_v17 = vadd.f32 %v7175_v63, %v3248_v52 }
 0x482   :  { %v4209_v2 = vpop.eup %4208  ;;  %v3250_v28 = vpop.f32.mrf.mxu0 }
 0x483   :  { %v3717_v26 = vsel %vm3668_vm1, %v4209_v2, %v7354_v14  ;;  %v3642_v48 = vmul.f32 1.442695, %v3526_v23  ;;  %v3463_v16 = vmul.f32 6.0, %v3399_v43  ;;  %4222 = vtanh.f32 %v7453_v17 }
 0x484   :  { %v4211_v58 = vpop.eup %4210  ;;  %3782 = vst.msk [vmem:[%s7595_s7 + $0x180] sm:$0xff] %vm3733_vm2, %v3717_v26  ;;  %v3253_v12 = vpop.f32.mrf.mxu0 }
 0x485   :  { %4224 = vpow2.f32 %v3642_v48  ;;  %v3527_v3 = vadd.f32 -10.0, %v3463_v16  ;;  %v3400_v44 = vadd.f32 1.0, %v4211_v58  ;;  %v7464_v31 = vadd.f32 %v7175_v63, %v3253_v12 }
 0x486   :  { %v4213_v21 = vpop.eup %4212  ;;  %v3255_v11 = vpop.f32.mrf.mxu0 }
 0x487   :  { %v3718_v14 = vsel %vm3668_vm1, %v4213_v21, %v7365_v9  ;;  %v3644_v24 = vmul.f32 1.442695, %v3527_v3  ;;  %v3464_v55 = vmul.f32 6.0, %v3400_v44  ;;  %4226 = vtanh.f32 %v7464_v31 }
 0x488   :  { %v4215_v0 = vpop.eup %4214  ;;  %3783 = vst.msk [vmem:[%s7595_s7 + $0x188] sm:$0xff] %vm3733_vm2, %v3718_v14  ;;  %v3258_v22 = vpop.f32.mrf.mxu0 }
 0x489   :  { %4228 = vpow2.f32 %v3644_v24  ;;  %v3528_v27 = vadd.f32 -10.0, %v3464_v55  ;;  %v3401_v39 = vadd.f32 1.0, %v4215_v0  ;;  %v7475_v8 = vadd.f32 %v7175_v63, %v3258_v22 }
 0x48a   :  { %v4217_v45 = vpop.eup %4216  ;;  %v3260_v5 = vpop.f32.mrf.mxu0 }
 0x48b   :  { %v3719_v9 = vsel %vm3668_vm1, %v4217_v45, %v7376_v18  ;;  %v3646_v20 = vmul.f32 1.442695, %v3528_v27  ;;  %v3465_v36 = vmul.f32 6.0, %v3401_v39  ;;  %4230 = vtanh.f32 %v7475_v8 }
 0x48c   :  { %v4219_v37 = vpop.eup %4218  ;;  %3784 = vst.msk [vmem:[%s7595_s7 + $0x190] sm:$0xff] %vm3733_vm2, %v3719_v9 }
 0x48d   :  { %v3263_v10 = vpop.f32.mrf.mxu0  ;;  %4232 = vpow2.f32 %v3646_v20  ;;  %v3529_v19 = vadd.f32 -10.0, %v3465_v36  ;;  %v3402_v53 = vadd.f32 1.0, %v4219_v37 }
 0x48e   :  { %v7486_v59 = vadd.f32 %v7175_v63, %v3263_v10  ;;  %v4221_v35 = vpop.eup %4220 }
 0x48f   :  { %v3265_v47 = vpop.f32.mrf.mxu0  ;;  %v3720_v18 = vsel %vm3668_vm1, %v4221_v35, %v7387_v25  ;;  %v3648_v51 = vmul.f32 1.442695, %v3529_v19  ;;  %v3466_v60 = vmul.f32 6.0, %v3402_v53 }
 0x490   :  { %4234 = vtanh.f32 %v7486_v59  ;;  %v4223_v62 = vpop.eup %4222  ;;  %3785 = vst.msk [vmem:[%s7595_s7 + $0x198] sm:$0xff] %vm3733_vm2, %v3720_v18 }
 0x491   :  { %v3268_v6 = vpop.f32.mrf.mxu0  ;;  %4236 = vpow2.f32 %v3648_v51  ;;  %v3530_v1 = vadd.f32 -10.0, %v3466_v60  ;;  %v3403_v15 = vadd.f32 1.0, %v4223_v62 }
 0x492   :  { %v7497_v4 = vadd.f32 %v7175_v63, %v3268_v6  ;;  %v4225_v13 = vpop.eup %4224 }
 0x493   :  { %v3270_v42 = vpop.f32.mrf.mxu0  ;;  %v3721_v25 = vsel %vm3668_vm1, %v4225_v13, %v7398_v50  ;;  %v3650_v7 = vmul.f32 1.442695, %v3530_v1  ;;  %v3467_v54 = vmul.f32 6.0, %v3403_v15 }
 0x494   :  { %4238 = vtanh.f32 %v7497_v4  ;;  %v4227_v29 = vpop.eup %4226  ;;  %3786 = vst.msk [vmem:[%s7595_s7 + $0x1a0] sm:$0xff] %vm3733_vm2, %v3721_v25 }
 0x495   :  { %v3273_v57 = vpop.f32.mrf.mxu0  ;;  %4240 = vpow2.f32 %v3650_v7  ;;  %v3531_v32 = vadd.f32 -10.0, %v3467_v54  ;;  %v3404_v49 = vadd.f32 1.0, %v4227_v29 }
 0x496   :  { %v7508_v46 = vadd.f32 %v7175_v63, %v3273_v57  ;;  %v4229_v41 = vpop.eup %4228 }
 0x497   :  { %v3275_v38 = vpop.f32.mrf.mxu0  ;;  %v3722_v50 = vsel %vm3668_vm1, %v4229_v41, %v7409_v56  ;;  %v3652_v30 = vmul.f32 1.442695, %v3531_v32  ;;  %v3468_v52 = vmul.f32 6.0, %v3404_v49 }
 0x498   :  { %4242 = vtanh.f32 %v7508_v46  ;;  %v4231_v23 = vpop.eup %4230  ;;  %3787 = vst.msk [vmem:[%s7595_s7 + $0x1a8] sm:$0xff] %vm3733_vm2, %v3722_v50 }
 0x499   :  { %v3278_v43 = vpop.f32.mrf.mxu0  ;;  %4244 = vpow2.f32 %v3652_v30  ;;  %v3532_v2 = vadd.f32 -10.0, %v3468_v52  ;;  %v3405_v28 = vadd.f32 1.0, %v4231_v23 }
 0x49a   :  { %v3279_v26 = vadd.f32 %v7175_v63, %v3278_v43  ;;  %v4233_v48 = vpop.eup %4232 }
 0x49b   :  { %v3280_v16 = vpop.f32.mrf.mxu0  ;;  %v3723_v56 = vsel %vm3668_vm1, %v4233_v48, %v7420_v61  ;;  %v3654_v58 = vmul.f32 1.442695, %v3532_v2  ;;  %v3469_v12 = vmul.f32 6.0, %v3405_v28 }
 0x49c   :  { %4246 = vtanh.f32 %v3279_v26  ;;  %3788 = vst.msk [vmem:[%s7595_s7 + $0x1b0] sm:$0xff] %vm3733_vm2, %v3723_v56 }
 0x49d   :  { %v4235_v3 = vpop.eup %4234  ;;  %4248 = vpow2.f32 %v3654_v58  ;;  %v3533_v44 = vadd.f32 -10.0, %v3469_v12 }
 0x49e   :  { %v3406_v21 = vadd.f32 1.0, %v4235_v3  ;;  %v4237_v11 = vpop.eup %4236 }
 0x49f   :  { %v3724_v63 = vsel %vm3668_vm1, %v4237_v11, %v7431_v40  ;;  %v3656_v14 = vmul.f32 1.442695, %v3533_v44 }
 0x4a0   :  { %v3470_v24 = vmul.f32 6.0, %v3406_v21  ;;  %3789 = vst.msk [vmem:[%s7595_s7 + $0x1b8] sm:$0xff] %vm3733_vm2, %v3724_v63 }
 0x4a1   :  { %v4239_v61 = vpop.eup %4238  ;;  %4250 = vpow2.f32 %v3656_v14 }
 0x4a2   :  { %v3534_v55 = vadd.f32 -10.0, %v3470_v24  ;;  %v3407_v0 = vadd.f32 1.0, %v4239_v61  ;;  %v4241_v22 = vpop.eup %4240 }
 0x4a3   :  { %v3725_v27 = vsel %vm3668_vm1, %v4241_v22, %v7442_v33 }
 0x4a4   :  { %v3658_v39 = vmul.f32 1.442695, %v3534_v55  ;;  %v3471_v45 = vmul.f32 6.0, %v3407_v0  ;;  %3790 = vst.msk [vmem:[%s7595_s7 + $0x1c0] sm:$0xff] %vm3733_vm2, %v3725_v27 }
 0x4a5   :  { %v4243_v5 = vpop.eup %4242 }
 0x4a6   :  { %4252 = vpow2.f32 %v3658_v39  ;;  %v3535_v40 = vadd.f32 -10.0, %v3471_v45  ;;  %v3408_v9 = vadd.f32 1.0, %v4243_v5  ;;  %v4245_v20 = vpop.eup %4244 }
 0x4a7   :  { %v3726_v36 = vsel %vm3668_vm1, %v4245_v20, %v7453_v17 }
 0x4a8   :  { %v3660_v37 = vmul.f32 1.442695, %v3535_v40  ;;  %v3472_v10 = vmul.f32 6.0, %v3408_v9  ;;  %3791 = vst.msk [vmem:[%s7595_s7 + $0x1c8] sm:$0xff] %vm3733_vm2, %v3726_v36 }
 0x4a9   :  { %v4247_v19 = vpop.eup %4246 }
 0x4aa   :  { %4254 = vpow2.f32 %v3660_v37  ;;  %v3536_v33 = vadd.f32 -10.0, %v3472_v10  ;;  %v3409_v53 = vadd.f32 1.0, %v4247_v19  ;;  %v4249_v35 = vpop.eup %4248 }
 0x4ab   :  { %v3727_v47 = vsel %vm3668_vm1, %v4249_v35, %v7464_v31 }
 0x4ac   :  { %v3662_v18 = vmul.f32 1.442695, %v3536_v33  ;;  %v3473_v51 = vmul.f32 6.0, %v3409_v53  ;;  %3792 = vst.msk [vmem:[%s7595_s7 + $0x1d0] sm:$0xff] %vm3733_vm2, %v3727_v47 }
 0x4ae   :  { %4256 = vpow2.f32 %v3662_v18  ;;  %v3537_v17 = vadd.f32 -10.0, %v3473_v51  ;;  %v4251_v60 = vpop.eup %4250 }
 0x4af   :  { %v3728_v62 = vsel %vm3668_vm1, %v4251_v60, %v7475_v8 }
 0x4b0   :  { %v3664_v6 = vmul.f32 1.442695, %v3537_v17  ;;  %3793 = vst.msk [vmem:[%s7595_s7 + $0x1d8] sm:$0xff] %vm3733_vm2, %v3728_v62 }
 0x4b2   :  { %4258 = vpow2.f32 %v3664_v6 }
 0x4b3   :  { %v4253_v31 = vpop.eup %4252 }
 0x4b4   :  { %v3729_v1 = vsel %vm3668_vm1, %v4253_v31, %v7486_v59 }
 0x4b5   :  { %3794 = vst.msk [vmem:[%s7595_s7 + $0x1e0] sm:$0xff] %vm3733_vm2, %v3729_v1 }
 0x4b7   :  { %v4255_v15 = vpop.eup %4254 }
 0x4b8   :  { %v3730_v8 = vsel %vm3668_vm1, %v4255_v15, %v7497_v4 }
 0x4b9   :  { %3795 = vst.msk [vmem:[%s7595_s7 + $0x1e8] sm:$0xff] %vm3733_vm2, %v3730_v8 }
 0x4bb   :  { %v4257_v13 = vpop.eup %4256 }
 0x4bc   :  { %v3731_v59 = vsel %vm3668_vm1, %v4257_v13, %v7508_v46 }
 0x4bd   :  { %3796 = vst.msk [vmem:[%s7595_s7 + $0x1f0] sm:$0xff] %vm3733_vm2, %v3731_v59 }
 0x4bf   :  { %v4259_v42 = vpop.eup %4258 }
 0x4c0   :  { %v3732_v25 = vsel %vm3668_vm1, %v4259_v42, %v3279_v26 }
 0x4c1   :  { %3797 = vst.msk [vmem:[%s7595_s7 + $0x1f8] sm:$0xff] %vm3733_vm2, %v3732_v25 }

</bundles_post_ra>
